<compile_context>
chip_gen: v7x
topology: tpu7x:2x2x1
jax: 0.10.0
libtpu: 0.0.40
codegen_flags: <defaults>
</compile_context>

<pallas_src>
import functools

import jax
import jax.numpy as jnp
from jax import lax
from jax.experimental import pallas as pl
from jax.experimental.pallas import tpu as pltpu


def _round_up(n, m):
    return (n + m - 1) // m * m


# ---------------------------------------------------------------------------
# Fused kernel: conv1 -> conv2a -> conv2b (+ f32 residual, relu).
# One image per grid step; all intermediates stay in VMEM / live values.
# ---------------------------------------------------------------------------
def _double_conv_kernel(x_ref, w_ref, sb_ref, o_ref, a_ref, b_ref,
                        *, H, W, Cin, Cout, Kp):
    f32, bf16 = jnp.float32, jnp.bfloat16

    # Halo-only zeroing: the interiors are fully overwritten every step, so
    # only the 1-pixel border strips need to be zero.  Done unconditionally so
    # it stays correct when the "parallel" batch axis is sharded across
    # TensorCores (scratch is per-core and not zero-initialised).
    def zero_halo(ref, c):
        zr = jnp.zeros((1, W + 2, c), bf16)
        zc = jnp.zeros((H + 2, 1, c), bf16)
        ref[0:1, :, :] = zr
        ref[H + 1:H + 2, :, :] = zr
        ref[:, 0:1, :] = zc
        ref[:, W + 1:W + 2, :] = zc

    zero_halo(a_ref, Cin)
    zero_halo(b_ref, Cout)

    # Stage the (already bf16) input into the zero-halo buffer (pad=1 in-kernel).
    # NOTE: the +1 interior offset is sublane-unaligned (masked store); at these
    # tile sizes it is negligible.  An asymmetric halo / pltpu.roll layout would
    # turn these into full-vreg stores.
    a_ref[1:H + 1, 1:W + 1, :] = x_ref[0]

    def im2col9(ref, c):
        """(H+2, W+2, c) zero-halo buffer -> (H*W, Kp) bf16 with all nine
        (dy, dx) taps packed into the contraction dim (9*c <= Kp = 128)."""
        src = ref[...]
        slabs = [src[dy:dy + H, dx:dx + W, :]
                 for dy in range(3) for dx in range(3)]
        if Kp > 9 * c:
            slabs.append(jnp.zeros((H, W, Kp - 9 * c), bf16))
        return jnp.concatenate(slabs, axis=-1).reshape(H * W, Kp)

    def conv_bn_relu(src_ref, c, widx, srow, brow, residual=None):
        """3x3 'SAME' conv (ONE MXU matmul, K=Kp) + folded BN affine
        (+ optional f32 residual) + relu.  Returns (H*W, Np) f32."""
        a = im2col9(src_ref, c)
        acc = jnp.dot(a, w_ref[widx], preferred_element_type=f32)
        y = acc * sb_ref[srow:srow + 1, :] + sb_ref[brow:brow + 1, :]
        if residual is not None:
            y = y + residual
        return jnp.maximum(y, 0.0)

    # conv1 -> y1 kept live in f32 (it is also the exact residual source).
    y1 = conv_bn_relu(a_ref, Cin, 0, 0, 1)
    b_ref[1:H + 1, 1:W + 1, :] = y1[:, :Cout].reshape(H, W, Cout).astype(bf16)

    # conv2 (first half) -> y2, staged into the same buffer (the staged bf16 y1
    # has already been consumed; the residual uses the live f32 y1).
    y2 = conv_bn_relu(b_ref, Cout, 1, 2, 3)
    b_ref[1:H + 1, 1:W + 1, :] = y2[:, :Cout].reshape(H, W, Cout).astype(bf16)

    # conv2 (second half) + f32 residual + relu; only this goes back to HBM
    # (bf16 -> half the output DMA traffic).
    y3 = conv_bn_relu(b_ref, Cout, 2, 4, 5, residual=y1)
    o_ref[0] = y3[:, :Cout].reshape(H, W, Cout).astype(o_ref.dtype)


# ---------------------------------------------------------------------------
# Wrapper-side (one-time, weights-only) packing glue
# ---------------------------------------------------------------------------
def _pack_w9(w_hwio, kp, np_):
    """(3,3,Cin,Cout) HWIO -> (Kp, Np) bf16 with all 9 taps folded into K."""
    kh, kw, cin, cout = w_hwio.shape
    wf = w_hwio.astype(jnp.float32).reshape(kh * kw * cin, cout)
    wp = jnp.zeros((kp, np_), jnp.float32).at[:kh * kw * cin, :cout].set(wf)
    return wp.astype(jnp.bfloat16)


def _pad_vec(v, n):
    return jnp.zeros((n,), jnp.float32).at[:v.shape[0]].set(v.astype(jnp.float32))


def double_conv_forward(x_nchw, params):
    """Forward pass of double_conv (stride=1, use_se=False). NCHW in / out."""
    # TODO(synk): stride>1 and the optional SE branch (use_se=True) are not
    # exercised by the default constructor args and are not implemented.
    # NOTE: if the surrounding model can stay NHWC, drop these transposes and
    # keep activations NHWC end-to-end (two fewer HBM round trips).
    x = jnp.transpose(x_nchw, (0, 2, 3, 1)).astype(jnp.bfloat16)   # NHWC, bf16 in
    B, H, W, Cin = x.shape
    Cout = params["w1"].shape[-1]

    if 9 * Cin > 128 or 9 * Cout > 128:
        # TODO(synk): wide-channel fallback (dx-only packing, K = 3*Cpad, three
        # K-tiled matmuls per conv) is not implemented; this kernel targets the
        # small channel counts this module is used with.
        raise NotImplementedError("9-tap packed path requires 9*in_ch <= 128 "
                                  "and 9*out_ch <= 128")
    Kp = 128                       # contraction width: one MXU K pass per conv
    Np = _round_up(Cout, 128)      # lane-aligned matmul N

    w = jnp.stack([_pack_w9(params["w1"], Kp, Np),
                   _pack_w9(params["w2"], Kp, Np),
                   _pack_w9(params["w3"], Kp, Np)])                 # (3, Kp, Np)
    sb = jnp.stack([_pad_vec(params[k], Np)
                    for k in ("s1", "b1", "s2", "b2", "s3", "b3")])  # (6, Np)

    kernel = functools.partial(_double_conv_kernel, H=H, W=W,
                               Cin=Cin, Cout=Cout, Kp=Kp)

    # TODO(synk): for large H (v7x: 64 MiB physical VMEM) add a row-tile grid
    # axis (B, cdiv(H, TH)) with a 3-row input halo (y1 needs TH+4 staged rows,
    # y2 needs TH+2) so the staging buffers and im2col/acc temporaries stay
    # bounded and each TensorCore gets many grid steps to pipeline.
    grid_spec = pltpu.PrefetchScalarGridSpec(
        num_scalar_prefetch=0,
        grid=(B,),
        in_specs=[
            pl.BlockSpec((1, H, W, Cin), lambda b: (b, 0, 0, 0)),
            # Constant index_map -> never refetched; single-buffer to save VMEM.
            pl.BlockSpec((3, Kp, Np), lambda b: (0, 0, 0),
                         pipeline_mode=pl.Buffered(1)),
            pl.BlockSpec((6, Np), lambda b: (0, 0),
                         pipeline_mode=pl.Buffered(1)),
        ],
        out_specs=pl.BlockSpec((1, H, W, Cout), lambda b: (b, 0, 0, 0)),
        scratch_shapes=[
            pltpu.VMEM((H + 2, W + 2, Cin), jnp.bfloat16),    # zero-halo x
            pltpu.VMEM((H + 2, W + 2, Cout), jnp.bfloat16),   # zero-halo y1/y2
        ],
    )

    out = pl.pallas_call(
        kernel,
        out_shape=jax.ShapeDtypeStruct((B, H, W, Cout), jnp.bfloat16),
        grid_spec=grid_spec,
        compiler_params=pltpu.CompilerParams(
            # Megacore over batch. Per-step VMEM need at these sizes is ~1 MiB;
            # the limit only leaves headroom (< v7x's 64 MiB physical; raise
            # toward ~100 MiB on v6e if per-step tiles are grown).
            dimension_semantics=("parallel",),
            vmem_limit_bytes=48 * 1024 * 1024),
    )(x, w, sb)

    return jnp.transpose(out, (0, 3, 1, 2)).astype(jnp.float32)   # NCHW f32


# ---------------------------------------------------------------------------
# Synthetic parameters (shapes mirror the PyTorch module; BN folded in eval)
# ---------------------------------------------------------------------------
def _fold_bn(gamma, beta, mean, var, conv_bias, eps=1e-5):
    scale = gamma / jnp.sqrt(var + eps)
    bias = beta + scale * (conv_bias - mean)
    return scale.astype(jnp.float32), bias.astype(jnp.float32)


def init_double_conv_params(key, in_ch, out_ch):
    ks = jax.random.split(key, 9)

    def conv_w(k, cin, cout):  # HWIO layout for the kernel
        return (0.1 * jax.random.normal(k, (3, 3, cin, cout))).astype(jnp.float32)

    def conv_b(k, cout):
        return (0.1 * jax.random.normal(k, (cout,))).astype(jnp.float32)

    def bn(k, c):
        g = 1.0 + 0.1 * jax.random.normal(k, (c,))
        return (g.astype(jnp.float32), jnp.zeros((c,), jnp.float32),
                jnp.zeros((c,), jnp.float32), jnp.ones((c,), jnp.float32))

    p = {}
    p["w1"] = conv_w(ks[0], in_ch, out_ch)
    p["s1"], p["b1"] = _fold_bn(*bn(ks[1], out_ch), conv_b(ks[2], out_ch))
    p["w2"] = conv_w(ks[3], out_ch, out_ch)
    p["s2"], p["b2"] = _fold_bn(*bn(ks[4], out_ch), conv_b(ks[5], out_ch))
    p["w3"] = conv_w(ks[6], out_ch, out_ch)
    p["s3"], p["b3"] = _fold_bn(*bn(ks[7], out_ch), conv_b(ks[8], out_ch))
    return p


def _reference_forward(x_nchw, params):
    """Plain-JAX f32 reference (lax.conv) used only for a sanity check."""
    x = jnp.transpose(x_nchw, (0, 2, 3, 1)).astype(jnp.float32)
    dn = ("NHWC", "HWIO", "NHWC")

    def conv_bn(x, w, s, b):
        y = lax.conv_general_dilated(x, w, (1, 1), "SAME", dimension_numbers=dn)
        return y * s + b

    y1 = jax.nn.relu(conv_bn(x, params["w1"], params["s1"], params["b1"]))
    y2 = jax.nn.relu(conv_bn(y1, params["w2"], params["s2"], params["b2"]))
    out = jax.nn.relu(conv_bn(y2, params["w3"], params["s3"], params["b3"]) + y1)
    return jnp.transpose(out, (0, 3, 1, 2))


if __name__ == "__main__":
    B, in_ch, out_ch, H, W = 2, 4, 8, 16, 16
    key = jax.random.PRNGKey(0)
    k_x, k_p = jax.random.split(key)

    x = jax.random.normal(k_x, (B, in_ch, H, W), dtype=jnp.float32)
    params = init_double_conv_params(k_p, in_ch, out_ch)

    fwd = jax.jit(double_conv_forward)
    out = fwd(x, params)
    jax.block_until_ready(out)
    assert out.shape == (B, out_ch, H, W)

    # Loose-tolerance sanity check vs. a plain-JAX f32 reference
    # (kernel runs bf16 matmuls / bf16 inter-layer staging / bf16 output; the
    # residual add itself is exact f32).
    ref = _reference_forward(x, params)
    max_err = float(jnp.max(jnp.abs(out - ref)))
    assert max_err < 0.1, f"max abs error vs reference: {max_err}"

    print("KERNEL_OK")
</pallas_src>

<mosaic_0001>
module attributes {stable_mosaic.version = 11 : i64} {
  func.func @_double_conv_kernel(%arg0: i32, %arg1: memref<1x16x16x4xbf16, #tpu.memory_space<vmem>>, %arg2: memref<3x128x128xbf16, #tpu.memory_space<vmem>>, %arg3: memref<6x128xf32, #tpu.memory_space<vmem>>, %arg4: memref<1x16x16x8xbf16, #tpu.memory_space<vmem>>, %arg5: memref<18x18x4xbf16, #tpu.memory_space<vmem>>, %arg6: memref<18x18x8xbf16, #tpu.memory_space<vmem>>) attributes {dimension_semantics = [#tpu.dimension_semantics<parallel>], iteration_bounds = array<i64: 2>, scalar_prefetch = 0 : i64, scratch_operands = 2 : i64, tpu.core_type = #tpu.core_type<tc>, window_params = [{transform_indices = @transform_0, window_bounds = array<i64: 1, 16, 16, 4>}, {pipeline_mode = #tpu.pipeline_mode<synchronous>, transform_indices = @transform_1, window_bounds = array<i64: 3, 128, 128>}, {pipeline_mode = #tpu.pipeline_mode<synchronous>, transform_indices = @transform_2, window_bounds = array<i64: 6, 128>}, {transform_indices = @transform_3, window_bounds = array<i64: 1, 16, 16, 8>}]} {
    %cst = arith.constant 0.000000e+00 : bf16
    %0 = vector.broadcast %cst : bf16 to vector<1x18x4xbf16>
    %cst_0 = arith.constant 0.000000e+00 : bf16
    %1 = vector.broadcast %cst_0 : bf16 to vector<18x1x4xbf16>
    %c0 = arith.constant 0 : index
    %c0_1 = arith.constant 0 : index
    %c0_2 = arith.constant 0 : index
    %2 = vector.load %arg5[%c0, %c0_1, %c0_2] : memref<18x18x4xbf16, #tpu.memory_space<vmem>>, vector<1x18x4xbf16>
    tpu.vector_store %arg5[%c0, %c0_1, %c0_2], %0 {strides = array<i32>} : memref<18x18x4xbf16, #tpu.memory_space<vmem>>, vector<1x18x4xbf16>,
    %c17 = arith.constant 17 : index
    %c0_3 = arith.constant 0 : index
    %c0_4 = arith.constant 0 : index
    %3 = vector.load %arg5[%c17, %c0_3, %c0_4] : memref<18x18x4xbf16, #tpu.memory_space<vmem>>, vector<1x18x4xbf16>
    tpu.vector_store %arg5[%c17, %c0_3, %c0_4], %0 {strides = array<i32>} : memref<18x18x4xbf16, #tpu.memory_space<vmem>>, vector<1x18x4xbf16>,
    %c0_5 = arith.constant 0 : index
    %c0_6 = arith.constant 0 : index
    %c0_7 = arith.constant 0 : index
    %4 = vector.load %arg5[%c0_5, %c0_6, %c0_7] : memref<18x18x4xbf16, #tpu.memory_space<vmem>>, vector<18x1x4xbf16>
    tpu.vector_store %arg5[%c0_5, %c0_6, %c0_7], %1 {strides = array<i32>} : memref<18x18x4xbf16, #tpu.memory_space<vmem>>, vector<18x1x4xbf16>,
    %c0_8 = arith.constant 0 : index
    %c17_9 = arith.constant 17 : index
    %c0_10 = arith.constant 0 : index
    %5 = vector.load %arg5[%c0_8, %c17_9, %c0_10] : memref<18x18x4xbf16, #tpu.memory_space<vmem>>, vector<18x1x4xbf16>
    tpu.vector_store %arg5[%c0_8, %c17_9, %c0_10], %1 {strides = array<i32>} : memref<18x18x4xbf16, #tpu.memory_space<vmem>>, vector<18x1x4xbf16>,
    %cst_11 = arith.constant 0.000000e+00 : bf16
    %6 = vector.broadcast %cst_11 : bf16 to vector<1x18x8xbf16>
    %cst_12 = arith.constant 0.000000e+00 : bf16
    %7 = vector.broadcast %cst_12 : bf16 to vector<18x1x8xbf16>
    %c0_13 = arith.constant 0 : index
    %c0_14 = arith.constant 0 : index
    %c0_15 = arith.constant 0 : index
    %8 = vector.load %arg6[%c0_13, %c0_14, %c0_15] : memref<18x18x8xbf16, #tpu.memory_space<vmem>>, vector<1x18x8xbf16>
    tpu.vector_store %arg6[%c0_13, %c0_14, %c0_15], %6 {strides = array<i32>} : memref<18x18x8xbf16, #tpu.memory_space<vmem>>, vector<1x18x8xbf16>,
    %c17_16 = arith.constant 17 : index
    %c0_17 = arith.constant 0 : index
    %c0_18 = arith.constant 0 : index
    %9 = vector.load %arg6[%c17_16, %c0_17, %c0_18] : memref<18x18x8xbf16, #tpu.memory_space<vmem>>, vector<1x18x8xbf16>
    tpu.vector_store %arg6[%c17_16, %c0_17, %c0_18], %6 {strides = array<i32>} : memref<18x18x8xbf16, #tpu.memory_space<vmem>>, vector<1x18x8xbf16>,
    %c0_19 = arith.constant 0 : index
    %c0_20 = arith.constant 0 : index
    %c0_21 = arith.constant 0 : index
    %10 = vector.load %arg6[%c0_19, %c0_20, %c0_21] : memref<18x18x8xbf16, #tpu.memory_space<vmem>>, vector<18x1x8xbf16>
    tpu.vector_store %arg6[%c0_19, %c0_20, %c0_21], %7 {strides = array<i32>} : memref<18x18x8xbf16, #tpu.memory_space<vmem>>, vector<18x1x8xbf16>,
    %c0_22 = arith.constant 0 : index
    %c17_23 = arith.constant 17 : index
    %c0_24 = arith.constant 0 : index
    %11 = vector.load %arg6[%c0_22, %c17_23, %c0_24] : memref<18x18x8xbf16, #tpu.memory_space<vmem>>, vector<18x1x8xbf16>
    tpu.vector_store %arg6[%c0_22, %c17_23, %c0_24], %7 {strides = array<i32>} : memref<18x18x8xbf16, #tpu.memory_space<vmem>>, vector<18x1x8xbf16>,
    %c0_25 = arith.constant 0 : index
    %c0_26 = arith.constant 0 : index
    %c0_27 = arith.constant 0 : index
    %c0_28 = arith.constant 0 : index
    %12 = vector.load %arg1[%c0_25, %c0_26, %c0_27, %c0_28] : memref<1x16x16x4xbf16, #tpu.memory_space<vmem>>, vector<1x16x16x4xbf16>
    %13 = vector.shape_cast %12 : vector<1x16x16x4xbf16> to vector<16x16x4xbf16>
    %c1 = arith.constant 1 : index
    %c1_29 = arith.constant 1 : index
    %c0_30 = arith.constant 0 : index
    %14 = vector.load %arg5[%c1, %c1_29, %c0_30] : memref<18x18x4xbf16, #tpu.memory_space<vmem>>, vector<16x16x4xbf16>
    tpu.vector_store %arg5[%c1, %c1_29, %c0_30], %13 {strides = array<i32>} : memref<18x18x4xbf16, #tpu.memory_space<vmem>>, vector<16x16x4xbf16>,
    %c0_31 = arith.constant 0 : index
    %c0_32 = arith.constant 0 : index
    %c0_33 = arith.constant 0 : index
    %15 = vector.load %arg5[%c0_31, %c0_32, %c0_33] : memref<18x18x4xbf16, #tpu.memory_space<vmem>>, vector<18x18x4xbf16>
    %16 = vector.extract_strided_slice %15 {offsets = [0, 0, 0], sizes = [16, 16, 4], strides = [1, 1, 1]} : vector<18x18x4xbf16> to vector<16x16x4xbf16>
    %17 = vector.extract_strided_slice %15 {offsets = [0, 1, 0], sizes = [16, 16, 4], strides = [1, 1, 1]} : vector<18x18x4xbf16> to vector<16x16x4xbf16>
    %18 = vector.extract_strided_slice %15 {offsets = [0, 2, 0], sizes = [16, 16, 4], strides = [1, 1, 1]} : vector<18x18x4xbf16> to vector<16x16x4xbf16>
    %19 = vector.extract_strided_slice %15 {offsets = [1, 0, 0], sizes = [16, 16, 4], strides = [1, 1, 1]} : vector<18x18x4xbf16> to vector<16x16x4xbf16>
    %20 = vector.extract_strided_slice %15 {offsets = [1, 1, 0], sizes = [16, 16, 4], strides = [1, 1, 1]} : vector<18x18x4xbf16> to vector<16x16x4xbf16>
    %21 = vector.extract_strided_slice %15 {offsets = [1, 2, 0], sizes = [16, 16, 4], strides = [1, 1, 1]} : vector<18x18x4xbf16> to vector<16x16x4xbf16>
    %22 = vector.extract_strided_slice %15 {offsets = [2, 0, 0], sizes = [16, 16, 4], strides = [1, 1, 1]} : vector<18x18x4xbf16> to vector<16x16x4xbf16>
    %23 = vector.extract_strided_slice %15 {offsets = [2, 1, 0], sizes = [16, 16, 4], strides = [1, 1, 1]} : vector<18x18x4xbf16> to vector<16x16x4xbf16>
    %24 = vector.extract_strided_slice %15 {offsets = [2, 2, 0], sizes = [16, 16, 4], strides = [1, 1, 1]} : vector<18x18x4xbf16> to vector<16x16x4xbf16>
    %cst_34 = arith.constant 0.000000e+00 : bf16
    %25 = vector.broadcast %cst_34 : bf16 to vector<16x16x92xbf16>
    %26 = tpu.concatenate %16, %17, %18, %19, %20, %21, %22, %23, %24, %25 in 2 : vector<16x16x4xbf16>, vector<16x16x4xbf16>, vector<16x16x4xbf16>, vector<16x16x4xbf16>, vector<16x16x4xbf16>, vector<16x16x4xbf16>, vector<16x16x4xbf16>, vector<16x16x4xbf16>, vector<16x16x4xbf16>, vector<16x16x92xbf16> -> vector<16x16x128xbf16>
    %27 = vector.shape_cast %26 : vector<16x16x128xbf16> to vector<256x128xbf16>
    %c0_35 = arith.constant 0 : index
    %c0_36 = arith.constant 0 : index
    %c0_37 = arith.constant 0 : index
    %28 = vector.load %arg2[%c0_35, %c0_36, %c0_37] : memref<3x128x128xbf16, #tpu.memory_space<vmem>>, vector<1x128x128xbf16>
    %29 = vector.shape_cast %28 : vector<1x128x128xbf16> to vector<128x128xbf16>
    %cst_38 = arith.constant dense<0.000000e+00> : vector<256x128xf32>
    %30 = tpu.matmul %27, %29, %cst_38 {dimension_numbers = #tpu.dot_dimension_numbers<[1], [0], [0], [1], [0, 0, 1, 1], [], []>} : vector<256x128xbf16>, vector<128x128xbf16>, vector<256x128xf32> -> vector<256x128xf32>
    %c0_39 = arith.constant 0 : index
    %c0_40 = arith.constant 0 : index
    %31 = vector.load %arg3[%c0_39, %c0_40] : memref<6x128xf32, #tpu.memory_space<vmem>>, vector<1x128xf32>
    %32 = vector.broadcast %31 : vector<1x128xf32> to vector<256x128xf32>
    %33 = arith.mulf %30, %32 : vector<256x128xf32>
    %c1_41 = arith.constant 1 : index
    %c0_42 = arith.constant 0 : index
    %34 = vector.load %arg3[%c1_41, %c0_42] : memref<6x128xf32, #tpu.memory_space<vmem>>, vector<1x128xf32>
    %35 = vector.broadcast %34 : vector<1x128xf32> to vector<256x128xf32>
    %36 = arith.addf %33, %35 : vector<256x128xf32>
    %cst_43 = arith.constant 0.000000e+00 : f32
    %37 = vector.broadcast %cst_43 : f32 to vector<256x128xf32>
    %38 = arith.maximumf %36, %37 : vector<256x128xf32>
    %39 = vector.extract_strided_slice %38 {offsets = [0, 0], sizes = [256, 8], strides = [1, 1]} : vector<256x128xf32> to vector<256x8xf32>
    %40 = vector.shape_cast %39 : vector<256x8xf32> to vector<16x16x8xf32>
    %41 = arith.truncf %40 : vector<16x16x8xf32> to vector<16x16x8xbf16>
    %c1_44 = arith.constant 1 : index
    %c1_45 = arith.constant 1 : index
    %c0_46 = arith.constant 0 : index
    %42 = vector.load %arg6[%c1_44, %c1_45, %c0_46] : memref<18x18x8xbf16, #tpu.memory_space<vmem>>, vector<16x16x8xbf16>
    tpu.vector_store %arg6[%c1_44, %c1_45, %c0_46], %41 {strides = array<i32>} : memref<18x18x8xbf16, #tpu.memory_space<vmem>>, vector<16x16x8xbf16>,
    %c0_47 = arith.constant 0 : index
    %c0_48 = arith.constant 0 : index
    %c0_49 = arith.constant 0 : index
    %43 = vector.load %arg6[%c0_47, %c0_48, %c0_49] : memref<18x18x8xbf16, #tpu.memory_space<vmem>>, vector<18x18x8xbf16>
    %44 = vector.extract_strided_slice %43 {offsets = [0, 0, 0], sizes = [16, 16, 8], strides = [1, 1, 1]} : vector<18x18x8xbf16> to vector<16x16x8xbf16>
    %45 = vector.extract_strided_slice %43 {offsets = [0, 1, 0], sizes = [16, 16, 8], strides = [1, 1, 1]} : vector<18x18x8xbf16> to vector<16x16x8xbf16>
    %46 = vector.extract_strided_slice %43 {offsets = [0, 2, 0], sizes = [16, 16, 8], strides = [1, 1, 1]} : vector<18x18x8xbf16> to vector<16x16x8xbf16>
    %47 = vector.extract_strided_slice %43 {offsets = [1, 0, 0], sizes = [16, 16, 8], strides = [1, 1, 1]} : vector<18x18x8xbf16> to vector<16x16x8xbf16>
    %48 = vector.extract_strided_slice %43 {offsets = [1, 1, 0], sizes = [16, 16, 8], strides = [1, 1, 1]} : vector<18x18x8xbf16> to vector<16x16x8xbf16>
    %49 = vector.extract_strided_slice %43 {offsets = [1, 2, 0], sizes = [16, 16, 8], strides = [1, 1, 1]} : vector<18x18x8xbf16> to vector<16x16x8xbf16>
    %50 = vector.extract_strided_slice %43 {offsets = [2, 0, 0], sizes = [16, 16, 8], strides = [1, 1, 1]} : vector<18x18x8xbf16> to vector<16x16x8xbf16>
    %51 = vector.extract_strided_slice %43 {offsets = [2, 1, 0], sizes = [16, 16, 8], strides = [1, 1, 1]} : vector<18x18x8xbf16> to vector<16x16x8xbf16>
    %52 = vector.extract_strided_slice %43 {offsets = [2, 2, 0], sizes = [16, 16, 8], strides = [1, 1, 1]} : vector<18x18x8xbf16> to vector<16x16x8xbf16>
    %cst_50 = arith.constant 0.000000e+00 : bf16
    %53 = vector.broadcast %cst_50 : bf16 to vector<16x16x56xbf16>
    %54 = tpu.concatenate %44, %45, %46, %47, %48, %49, %50, %51, %52, %53 in 2 : vector<16x16x8xbf16>, vector<16x16x8xbf16>, vector<16x16x8xbf16>, vector<16x16x8xbf16>, vector<16x16x8xbf16>, vector<16x16x8xbf16>, vector<16x16x8xbf16>, vector<16x16x8xbf16>, vector<16x16x8xbf16>, vector<16x16x56xbf16> -> vector<16x16x128xbf16>
    %55 = vector.shape_cast %54 : vector<16x16x128xbf16> to vector<256x128xbf16>
    %c1_51 = arith.constant 1 : index
    %c0_52 = arith.constant 0 : index
    %c0_53 = arith.constant 0 : index
    %56 = vector.load %arg2[%c1_51, %c0_52, %c0_53] : memref<3x128x128xbf16, #tpu.memory_space<vmem>>, vector<1x128x128xbf16>
    %57 = vector.shape_cast %56 : vector<1x128x128xbf16> to vector<128x128xbf16>
    %cst_54 = arith.constant dense<0.000000e+00> : vector<256x128xf32>
    %58 = tpu.matmul %55, %57, %cst_54 {dimension_numbers = #tpu.dot_dimension_numbers<[1], [0], [0], [1], [0, 0, 1, 1], [], []>} : vector<256x128xbf16>, vector<128x128xbf16>, vector<256x128xf32> -> vector<256x128xf32>
    %c2 = arith.constant 2 : index
    %c0_55 = arith.constant 0 : index
    %59 = vector.load %arg3[%c2, %c0_55] : memref<6x128xf32, #tpu.memory_space<vmem>>, vector<1x128xf32>
    %60 = vector.broadcast %59 : vector<1x128xf32> to vector<256x128xf32>
    %61 = arith.mulf %58, %60 : vector<256x128xf32>
    %c3 = arith.constant 3 : index
    %c0_56 = arith.constant 0 : index
    %62 = vector.load %arg3[%c3, %c0_56] : memref<6x128xf32, #tpu.memory_space<vmem>>, vector<1x128xf32>
    %63 = vector.broadcast %62 : vector<1x128xf32> to vector<256x128xf32>
    %64 = arith.addf %61, %63 : vector<256x128xf32>
    %cst_57 = arith.constant 0.000000e+00 : f32
    %65 = vector.broadcast %cst_57 : f32 to vector<256x128xf32>
    %66 = arith.maximumf %64, %65 : vector<256x128xf32>
    %67 = vector.extract_strided_slice %66 {offsets = [0, 0], sizes = [256, 8], strides = [1, 1]} : vector<256x128xf32> to vector<256x8xf32>
    %68 = vector.shape_cast %67 : vector<256x8xf32> to vector<16x16x8xf32>
    %69 = arith.truncf %68 : vector<16x16x8xf32> to vector<16x16x8xbf16>
    %c1_58 = arith.constant 1 : index
    %c1_59 = arith.constant 1 : index
    %c0_60 = arith.constant 0 : index
    %70 = vector.load %arg6[%c1_58, %c1_59, %c0_60] : memref<18x18x8xbf16, #tpu.memory_space<vmem>>, vector<16x16x8xbf16>
    tpu.vector_store %arg6[%c1_58, %c1_59, %c0_60], %69 {strides = array<i32>} : memref<18x18x8xbf16, #tpu.memory_space<vmem>>, vector<16x16x8xbf16>,
    %c0_61 = arith.constant 0 : index
    %c0_62 = arith.constant 0 : index
    %c0_63 = arith.constant 0 : index
    %71 = vector.load %arg6[%c0_61, %c0_62, %c0_63] : memref<18x18x8xbf16, #tpu.memory_space<vmem>>, vector<18x18x8xbf16>
    %72 = vector.extract_strided_slice %71 {offsets = [0, 0, 0], sizes = [16, 16, 8], strides = [1, 1, 1]} : vector<18x18x8xbf16> to vector<16x16x8xbf16>
    %73 = vector.extract_strided_slice %71 {offsets = [0, 1, 0], sizes = [16, 16, 8], strides = [1, 1, 1]} : vector<18x18x8xbf16> to vector<16x16x8xbf16>
    %74 = vector.extract_strided_slice %71 {offsets = [0, 2, 0], sizes = [16, 16, 8], strides = [1, 1, 1]} : vector<18x18x8xbf16> to vector<16x16x8xbf16>
    %75 = vector.extract_strided_slice %71 {offsets = [1, 0, 0], sizes = [16, 16, 8], strides = [1, 1, 1]} : vector<18x18x8xbf16> to vector<16x16x8xbf16>
    %76 = vector.extract_strided_slice %71 {offsets = [1, 1, 0], sizes = [16, 16, 8], strides = [1, 1, 1]} : vector<18x18x8xbf16> to vector<16x16x8xbf16>
    %77 = vector.extract_strided_slice %71 {offsets = [1, 2, 0], sizes = [16, 16, 8], strides = [1, 1, 1]} : vector<18x18x8xbf16> to vector<16x16x8xbf16>
    %78 = vector.extract_strided_slice %71 {offsets = [2, 0, 0], sizes = [16, 16, 8], strides = [1, 1, 1]} : vector<18x18x8xbf16> to vector<16x16x8xbf16>
    %79 = vector.extract_strided_slice %71 {offsets = [2, 1, 0], sizes = [16, 16, 8], strides = [1, 1, 1]} : vector<18x18x8xbf16> to vector<16x16x8xbf16>
    %80 = vector.extract_strided_slice %71 {offsets = [2, 2, 0], sizes = [16, 16, 8], strides = [1, 1, 1]} : vector<18x18x8xbf16> to vector<16x16x8xbf16>
    %cst_64 = arith.constant 0.000000e+00 : bf16
    %81 = vector.broadcast %cst_64 : bf16 to vector<16x16x56xbf16>
    %82 = tpu.concatenate %72, %73, %74, %75, %76, %77, %78, %79, %80, %81 in 2 : vector<16x16x8xbf16>, vector<16x16x8xbf16>, vector<16x16x8xbf16>, vector<16x16x8xbf16>, vector<16x16x8xbf16>, vector<16x16x8xbf16>, vector<16x16x8xbf16>, vector<16x16x8xbf16>, vector<16x16x8xbf16>, vector<16x16x56xbf16> -> vector<16x16x128xbf16>
    %83 = vector.shape_cast %82 : vector<16x16x128xbf16> to vector<256x128xbf16>
    %c2_65 = arith.constant 2 : index
    %c0_66 = arith.constant 0 : index
    %c0_67 = arith.constant 0 : index
    %84 = vector.load %arg2[%c2_65, %c0_66, %c0_67] : memref<3x128x128xbf16, #tpu.memory_space<vmem>>, vector<1x128x128xbf16>
    %85 = vector.shape_cast %84 : vector<1x128x128xbf16> to vector<128x128xbf16>
    %cst_68 = arith.constant dense<0.000000e+00> : vector<256x128xf32>
    %86 = tpu.matmul %83, %85, %cst_68 {dimension_numbers = #tpu.dot_dimension_numbers<[1], [0], [0], [1], [0, 0, 1, 1], [], []>} : vector<256x128xbf16>, vector<128x128xbf16>, vector<256x128xf32> -> vector<256x128xf32>
    %c4 = arith.constant 4 : index
    %c0_69 = arith.constant 0 : index
    %87 = vector.load %arg3[%c4, %c0_69] : memref<6x128xf32, #tpu.memory_space<vmem>>, vector<1x128xf32>
    %88 = vector.broadcast %87 : vector<1x128xf32> to vector<256x128xf32>
    %89 = arith.mulf %86, %88 : vector<256x128xf32>
    %c5 = arith.constant 5 : index
    %c0_70 = arith.constant 0 : index
    %90 = vector.load %arg3[%c5, %c0_70] : memref<6x128xf32, #tpu.memory_space<vmem>>, vector<1x128xf32>
    %91 = vector.broadcast %90 : vector<1x128xf32> to vector<256x128xf32>
    %92 = arith.addf %89, %91 : vector<256x128xf32>
    %93 = arith.addf %92, %38 : vector<256x128xf32>
    %cst_71 = arith.constant 0.000000e+00 : f32
    %94 = vector.broadcast %cst_71 : f32 to vector<256x128xf32>
    %95 = arith.maximumf %93, %94 : vector<256x128xf32>
    %96 = vector.extract_strided_slice %95 {offsets = [0, 0], sizes = [256, 8], strides = [1, 1]} : vector<256x128xf32> to vector<256x8xf32>
    %97 = vector.shape_cast %96 : vector<256x8xf32> to vector<16x16x8xf32>
    %98 = arith.truncf %97 : vector<16x16x8xf32> to vector<16x16x8xbf16>
    %c0_72 = arith.constant 0 : index
    %c0_73 = arith.constant 0 : index
    %c0_74 = arith.constant 0 : index
    %c0_75 = arith.constant 0 : index
    %99 = vector.load %arg4[%c0_72, %c0_73, %c0_74, %c0_75] : memref<1x16x16x8xbf16, #tpu.memory_space<vmem>>, vector<1x16x16x8xbf16>
    %100 = vector.shape_cast %99 : vector<1x16x16x8xbf16> to vector<16x16x8xbf16>
    %101 = vector.shape_cast %98 : vector<16x16x8xbf16> to vector<1x16x16x8xbf16>
    tpu.vector_store %arg4[%c0_72, %c0_73, %c0_74, %c0_75], %101 {strides = array<i32>} : memref<1x16x16x8xbf16, #tpu.memory_space<vmem>>, vector<1x16x16x8xbf16>,
    return
  }
  func.func @transform_0(%arg0: i32) -> (i32, i32, i32, i32) {
    %c0_i32 = arith.constant 0 : i32
    %c0_i32_0 = arith.constant 0 : i32
    %c0_i32_1 = arith.constant 0 : i32
    %c0_i32_2 = arith.constant 0 : i32
    return %arg0, %c0_i32, %c0_i32_0, %c0_i32_1 : i32, i32, i32, i32
  }
  func.func @transform_1(%arg0: i32) -> (i32, i32, i32) {
    %c0_i32 = arith.constant 0 : i32
    %c0_i32_0 = arith.constant 0 : i32
    %c0_i32_1 = arith.constant 0 : i32
    %c0_i32_2 = arith.constant 0 : i32
    return %c0_i32, %c0_i32_0, %c0_i32_1 : i32, i32, i32
  }
  func.func @transform_2(%arg0: i32) -> (i32, i32) {
    %c0_i32 = arith.constant 0 : i32
    %c0_i32_0 = arith.constant 0 : i32
    %c0_i32_1 = arith.constant 0 : i32
    return %c0_i32, %c0_i32_0 : i32, i32
  }
  func.func @transform_3(%arg0: i32) -> (i32, i32, i32, i32) {
    %c0_i32 = arith.constant 0 : i32
    %c0_i32_0 = arith.constant 0 : i32
    %c0_i32_1 = arith.constant 0 : i32
    %c0_i32_2 = arith.constant 0 : i32
    return %arg0, %c0_i32, %c0_i32_0, %c0_i32_1 : i32, i32, i32, i32
  }
}

</mosaic_0001>

<bundles_post_ra>
// kernel: double_conv_forward.1
= control target key start
LH: loop header
LB: loop body
LE: loop exit
PB: predicated region body
PF: predicated region fallthrough
CT: control target
= control target key end

     0   :  { %s7114_s12 = smov 0   ;;  %s9986_s0 = inlined_call_operand.vmem [shape: bf16[2,16,16,4], index: 0, kind: input, shape index: {}]   ;;  %s9987_s1 = inlined_call_operand.vmem [shape: bf16[3,128,128], index: 1, kind: input, shape index: {}]   ;;  %s9988_s2 = inlined_call_operand.vmem [shape: f32[6,128], index: 2, kind: input, shape index: {}]   ;;  %s9989_s3 = inlined_call_operand.vmem [shape: bf16[2,16,16,8], index: 3, kind: output, shape index: {}]  }
   0x1 LB: > { %s6237_s13 = sadd.s32 4294967295, %s7079_s12   ;;  %p6241_p0 = scmp.ge.s32.totalorder %s7079_s12, 1  ;;  %s7079_s12 = sphi %s7114_s12, %s13_s12  }
   0x2   : > { %p137_p1 = scmp.lt.s32.totalorder %s7079_s12, 3 }
   0x4   : > { %p138_p2 = pnand %p6241_p0, %p137_p1 }
   0x6   : > { %141 = sbr.rel (%p138_p2) target bundleno = 1619 (0x653), region = 32 }
   0xd   : > { %vm172_vm0 = vcmask 27648   ;;  %vm175_vm1 = vcmask 24576   ;;  %vm9992_vm2 = vsmask.f32 256  ;;  %v7081_v0 = vmov 0   ;;  %p161_p3 = scmp.lt.s32.totalorder %s6237_s13, 1 }
   0xe   : > { %173 = vst.msk [vmem:[#allocation2] sm:$0xf] %vm172_vm0, %v7081_v0  ;;  %174 = vst.msk [vmem:[#allocation2 + $0x4] sm:$0xf] %vm172_vm0, %v7081_v0  ;;  %vm9991_vm4 = vsmask.f32 7938 }
   0xf   : > { %176 = vst.msk [vmem:[#allocation2 + $0x8] sm:$0x1] %vm175_vm1, %v7081_v0  ;;  %vm7130_vm3 = vmand %vm175_vm1, %vm9992_vm2  ;;  %vm9990_vm5 = vcmask 60416   ;;  %v187_v2 = vld [vmem:[#allocation2 + $0xc] sm:$0x1]  ;;  %s10244_s13 = smov (!%p161_p3, %s6237_s13), 1 }
  0x10   : > { %178 = vst.msk [vmem:[#allocation2 + $0xcc] sm:$0xf] %vm172_vm0, %v7081_v0  ;;  %179 = vst.msk [vmem:[#allocation2 + $0xd0] sm:$0xf] %vm172_vm0, %v7081_v0  ;;  %v190_v3 = vld [vmem:[#allocation2 + $0x18] sm:$0x1] }
  0x11   : > { %180 = vst.msk [vmem:[#allocation2 + $0xd4] sm:$0x1] %vm175_vm1, %v7081_v0  ;;  %v188_v4 = vsel %vm7130_vm3, 0, %v187_v2  ;;  %v191_v5 = vsel %vm7130_vm3, 0, %v190_v3  ;;  %v193_v6 = vld [vmem:[#allocation2 + $0x24] sm:$0x1]  ;;  %vm7154_vm6 = vmand %vm175_vm1, %vm9991_vm4 }
  0x12   : > { %295 = vst.msk [vmem:[#allocation3] sm:$0xf] %vm9990_vm5, %v7081_v0  ;;  %296 = vst.msk [vmem:[#allocation3 + $0x4] sm:$0xf] %vm9990_vm5, %v7081_v0  ;;  %v194_v8 = vsel %vm7130_vm3, 0, %v193_v6  ;;  %s6562_s14 = sshll.u32 %s10244_s13, 7 }
  0x13   : > { %300 = vst.msk [vmem:[#allocation3 + $0xcc] sm:$0xf] %vm9990_vm5, %v7081_v0  ;;  %301 = vst.msk [vmem:[#allocation3 + $0xd0] sm:$0xf] %vm9990_vm5, %v7081_v0  ;;  %v243_v9 = vld [vmem:[#allocation2 + $0x14] sm:$0x1]  ;;  %s7172_s17 = scalar_lea.vmem %s9986_s0, %s6562_s14 }
  0x14   : > { %189 = vst [vmem:[#allocation2 + $0xc] sm:$0x1] %v188_v4  ;;  %192 = vst [vmem:[#allocation2 + $0x18] sm:$0x1] %v191_v5  ;;  %v244_v10 = vsel %vm7154_vm6, 0, %v243_v9  ;;  %vm1290_vm8 = vcmask 1046528  }
  0x15   : > { %195 = vst [vmem:[#allocation2 + $0x24] sm:$0x1] %v194_v8  ;;  %v246_v11 = vld [vmem:[#allocation2 + $0x20] sm:$0x1]  ;;  %245 = vst [vmem:[#allocation2 + $0x14] sm:$0x1] %v244_v10 }
  0x16   : > { %v247_v12 = vsel %vm7154_vm6, 0, %v246_v11  ;;  %v249_v13 = vld [vmem:[#allocation2 + $0x2c] sm:$0x1]  ;;  %vm446_vm7 = vsmask.f32 4368  ;;  %v10038_v30 = vmov 0  ;;  %vm7192_vm10 = vmand %vm172_vm0, %vm9991_vm4 }
  0x17   : > { %248 = vst [vmem:[#allocation2 + $0x20] sm:$0x1] %v247_v12  ;;  %v250_v14 = vsel %vm7154_vm6, 0, %v249_v13  ;;  %v184_v15 = vld [vmem:[#allocation2] sm:$0x1]  ;;  %vm7186_vm9 = vmor %vm9992_vm2, %vm446_vm7  ;;  %v6934_v57 = vld [vmem:[%s9987_s1 + $0x8] sm:$0xff]  }
  0x18   : > { %v240_v16 = vld [vmem:[#allocation2 + $0x8] sm:$0x1]  ;;  %251 = vst [vmem:[#allocation2 + $0x2c] sm:$0x1] %v250_v14  ;;  %v196_v17 = vld [vmem:[#allocation2 + $0x30] sm:$0x1] }
  0x19   : > { %v185_v18 = vsel %vm7130_vm3, 0, %v184_v15  ;;  %v241_v19 = vsel %vm7154_vm6, 0, %v240_v16  ;;  %v414_v20 = vld [vmem:[%s7172_s17] sm:$0xf]  ;;  %v415_v21 = vld [vmem:[%s7172_s17 + $0x4] sm:$0xf] }
  0x1a   : > { %186 = vst [vmem:[#allocation2] sm:$0x1] %v185_v18  ;;  %242 = vst [vmem:[#allocation2 + $0x8] sm:$0x1] %v241_v19  ;;  %v449_v22 = vshrl.u32 %v414_v20, 16  ;;  %v452_v23 = vshll.u32 %v414_v20, 16 }
  0x1b   : > { %v457_v24 = vshrl.u32 %v415_v21, 16  ;;  %v460_v25 = vshll.u32 %v415_v21, 16  ;;  %v416_v26 = vld [vmem:[%s7172_s17 + $0x8] sm:$0xf]  ;;  %v417_v27 = vld [vmem:[%s7172_s17 + $0xc] sm:$0xf] }
  0x1c   : > { %v466_v28 = vshrl.u32 %v416_v26, 16  ;;  %v469_v29 = vshll.u32 %v416_v26, 16  ;;  %v10039_v30 = vsel %vm7186_vm9, 4294967295, %v10038_v30  ;;  %v451_v31 = vrot.slane %v449_v22, 7  ;;  %v771_v33 = vld [vmem:[#allocation2 + $0xc] sm:$0xf] }
  0x1d   : > { %10040 = vst [vmem:[#allocation4_spill] sm:$0xff] %v10039_v30  ;;  %v459_v32 = vrot.slane %v457_v24, 7  ;;  %v474_v34 = vshrl.u32 %v417_v27, 16  ;;  %v477_v35 = vshll.u32 %v417_v27, 16  ;;  %v418_v38 = vld [vmem:[%s7172_s17 + $0x10] sm:$0xf] }
  0x1e   : > { %v468_v37 = vrot.slane %v466_v28, 7  ;;  %v419_v39 = vld [vmem:[%s7172_s17 + $0x14] sm:$0xf]  ;;  %v197_v40 = vsel %vm7130_vm3, 0, %v196_v17  ;;  %v454_v41 = vor.u32 %v452_v23, %v451_v31  ;;  %v455_v42 = vrot.slane %v451_v31, 4  ;;  %v6932_v50 = vld [vmem:[%s9987_s1] sm:$0xff]  }
  0x1f   : > { %v462_v43 = vor.u32 %v460_v25, %v459_v32  ;;  %v7200_v44 = vrot.slane %v474_v34, 7  ;;  %v778_v45 = vld [vmem:[#allocation2 + $0x18] sm:$0xf]  ;;  %198 = vst [vmem:[#allocation2 + $0x30] sm:$0x1] %v197_v40  ;;  %v483_v48 = vshrl.u32 %v418_v38, 16  ;;  %6732 = vmatprep.subr.bf16.mxu0 %v6932_v50  ;;  %6876 = vmatprep.subr.bf16.mxu1 %v6932_v50 }
  0x20   : > { %v471_v46 = vor.u32 %v469_v29, %v468_v37  ;;  %v472_v47 = vrot.slane %v468_v37, 4  ;;  %v486_v49 = vshll.u32 %v418_v38, 16  ;;  %v772_v52 = vsel %vm7192_vm10, %v454_v41, %v771_v33  ;;  %v785_v55 = vld [vmem:[#allocation2 + $0x24] sm:$0xf]  ;;  %v775_v56 = vld [vmem:[#allocation2 + $0x14] sm:$0x1]  ;;  %6733 = vmatpush3.bf16.msra.mxu0 %v6932_v50  ;;  %6884 = vmatpush3.bf16.msra.mxu1 %v6932_v50 }
  0x21   : > { %v463_v51 = vsel %vm7186_vm9, %v455_v42, %v462_v43  ;;  %v479_v53 = vor.u32 %v477_v35, %v7200_v44  ;;  %v491_v54 = vshrl.u32 %v419_v39, 16  ;;  %v7213_v58 = vld [vmem:[#allocation2] sm:$0xff]   ;;  %773 = vst [vmem:[#allocation2 + $0xc] sm:$0xf] %v772_v52  ;;  %v485_v60 = vrot.slane %v483_v48, 7  ;;  %6734 = vmatprep.subr.bf16.mxu0 %v6934_v57  ;;  %6877 = vmatprep.subr.bf16.mxu1 %v6934_v57  ;;  %v6935_v15 = vld [vmem:[%s9987_s1 + $0x10] sm:$0xff]  }
  0x22   : > { %774 = vst.msk [vmem:[#allocation2 + $0x10] sm:$0xf] %vm172_vm0, %v463_v51  ;;  %v779_v59 = vsel %vm7192_vm10, %v471_v46, %v778_v45  ;;  %v6914_v61 = vld [vmem:[#allocation2 + $0x8] ss:$0 sps:$4 sm:$0x11]   ;;  %v494_v2 = vshll.u32 %v419_v39, 16 }
  0x23   : > { %v480_v62 = vsel %vm7186_vm9, %v472_v47, %v479_v53  ;;  %780 = vst [vmem:[#allocation2 + $0x18] sm:$0xf] %v779_v59  ;;  %v493_v63 = vrot.slane %v491_v54, 7  ;;  %v464_v3 = vrot.slane %v459_v32, 4  ;;  %v1291_v4 = vrot.slane %v7213_v58, 1  ;;  %s7082_s24 = smov 8  }
  0x24   : > { %781 = vst.msk [vmem:[#allocation2 + $0x1c] sm:$0xf] %vm172_vm0, %v480_v62  ;;  %v488_v5 = vor.u32 %v486_v49, %v485_v60  ;;  %v489_v6 = vrot.slane %v485_v60, 4  ;;  %v782_v8 = vld [vmem:[#allocation2 + $0x20] sm:$0x1]  ;;  %v1292_v10 = vrot.slane %v6914_v61, 1  ;;  %6735 = vmatpush3.bf16.msra.mxu0 %v6934_v57  ;;  %6885 = vmatpush3.bf16.msra.mxu1 %v6934_v57 }
  0x25   : > { %v789_v9 = vld [vmem:[#allocation2 + $0x2c] sm:$0x1]  ;;  %v496_v11 = vor.u32 %v494_v2, %v493_v63  ;;  %vm1065_vm11 = vsmask.f32 7424  ;;  %v1067_v12 = vshrl.u32 %v7213_v58, 16  ;;  %v1069_v13 = vshll.u32 %v7213_v58, 16  ;;  %6736 = vmatprep.subr.bf16.mxu0 %v6935_v15  ;;  %6878 = vmatprep.subr.bf16.mxu1 %v6935_v15 }
  0x26   : > { %v420_v14 = vld [vmem:[%s7172_s17 + $0x18] sm:$0xf]  ;;  %v786_v16 = vsel %vm7192_vm10, %v488_v5, %v785_v55  ;;  %v776_v17 = vsel %vm7130_vm3, %v464_v3, %v775_v56  ;;  %v481_v18 = vrot.slane %v7200_v44, 4  ;;  %v498_v19 = vrot.slane %v493_v63, 4  ;;  %v421_v20 = vld [vmem:[%s7172_s17 + $0x1c] sm:$0xf] }
  0x27   : > { %v1293_v21 = vsel %vm1290_vm8, %v1291_v4, %v1292_v10  ;;  %v497_v22 = vsel %vm7186_vm9, %v489_v6, %v496_v11  ;;  %787 = vst [vmem:[#allocation2 + $0x24] sm:$0xf] %v786_v16  ;;  %v1071_v23 = vrot.slane %v1069_v13, 1  ;;  %v1074_v24 = vshll.u32 %v6914_v61, 16  ;;  %777 = vst [vmem:[#allocation2 + $0x14] sm:$0x1] %v776_v17 }
  0x28   : > { %v252_v25 = vld [vmem:[#allocation2 + $0x38] sm:$0x1]  ;;  %v199_v26 = vld [vmem:[#allocation2 + $0x3c] sm:$0x1]  ;;  %1339 = vrot.lane.b32.xlu1 %v1293_v21, %s7082_s24  ;;  %788 = vst.msk [vmem:[#allocation2 + $0x28] sm:$0xf] %vm172_vm0, %v497_v22  ;;  %v783_v27 = vsel %vm7130_vm3, %v481_v18, %v782_v8  ;;  %v790_v28 = vsel %vm7130_vm3, %v498_v19, %v789_v9  ;;  %6737 = vmatpush3.bf16.msra.mxu0 %v6935_v15 }
  0x29   : > { %v500_v29 = vshrl.u32 %v420_v14, 16  ;;  %v503_v31 = vshll.u32 %v420_v14, 16  ;;  %v7244_v32 = vld [vmem:[%s7172_s17 + $0x20] sm:$0xf]  ;;  %v7246_v33 = vld [vmem:[#allocation2 + $0xc] sm:$0xff]   ;;  %v508_v34 = vshrl.u32 %v421_v20, 16  ;;  %v1072_v42 = vor.u32 %v1071_v23, %v1067_v12  ;;  %6886 = vmatpush3.bf16.msra.mxu1 %v6935_v15 }
  0x2a   : > { %784 = vst [vmem:[#allocation2 + $0x20] sm:$0x1] %v783_v27  ;;  %791 = vst [vmem:[#allocation2 + $0x2c] sm:$0x1] %v790_v28  ;;  %v792_v35 = vld [vmem:[#allocation2 + $0x30] sm:$0xf] }
  0x2b   : > { %v502_v37 = vrot.slane %v500_v29, 7  ;;  %v511_v38 = vshll.u32 %v421_v20, 16  ;;  %v253_v39 = vsel %vm7154_vm6, 0, %v252_v25  ;;  %v200_v40 = vsel %vm7130_vm3, 0, %v199_v26  ;;  %s7083_s25 = smov 12   ;;  %v7254_v41 = vld [vmem:[#allocation2 + $0x18] sm:$0xff]  }
  0x2c   : > { %1376 = vrot.lane.b32.xlu0 %v7246_v33, %s7083_s25  ;;  %v1076_v43 = vrot.slane %v1074_v24, 1  ;;  %v1081_v44 = vshll.u32 %v7246_v33, 16  ;;  %254 = vst [vmem:[#allocation2 + $0x38] sm:$0x1] %v253_v39  ;;  %201 = vst [vmem:[#allocation2 + $0x3c] sm:$0x1] %v200_v40  ;;  %1378 = vrot.lane.b32.xlu1 %v7254_v41, %s7083_s25 }
  0x2d   : > { %v505_v45 = vor.u32 %v503_v31, %v502_v37  ;;  %v506_v46 = vrot.slane %v502_v37, 4  ;;  %v510_v47 = vrot.slane %v508_v34, 7  ;;  %v517_v48 = vshrl.u32 %v7244_v32, 16  ;;  %v6936_v49 = vld [vmem:[%s9987_s1 + $0x18] sm:$0xff]   ;;  %s7084_s28 = smov 24   ;;  %s7085_s29 = smov 4  }
  0x2e   : > { %v1294_v50 = vrot.slane %v7246_v33, 1  ;;  %v1091_v51 = vshrl.u32 %v7254_v41, 16  ;;  %v1093_v52 = vshll.u32 %v7254_v41, 16  ;;  %v1079_v53 = vshrl.u32 %v7246_v33, 16  ;;  %6738 = vmatprep.subr.bf16.mxu0 %v6936_v49  ;;  %6879 = vmatprep.subr.bf16.mxu1 %v6936_v49  ;;  %v7286_v11 = vld [vmem:[%s7172_s17 + $0x24] sm:$0xf] }
  0x2f   : > { %v1083_v54 = vrot.slane %v1081_v44, 1  ;;  %v513_v55 = vor.u32 %v511_v38, %v510_v47  ;;  %v793_v56 = vsel %vm7192_vm10, %v505_v45, %v792_v35  ;;  %v515_v57 = vrot.slane %v510_v47, 4  ;;  %v7271_v58 = vld [vmem:[#allocation2 + $0x24] sm:$0xff]   ;;  %v6918_v59 = vld [vmem:[#allocation2 + $0x14] ss:$0 sps:$4 sm:$0x11]   ;;  %6739 = vmatpush3.bf16.msra.mxu0 %v6936_v49  ;;  %6887 = vmatpush3.bf16.msra.mxu1 %v6936_v49 }
  0x30   : > { %1495 = vrot.lane.b32.xlu0 %v7254_v41, %s7084_s28  ;;  %794 = vst [vmem:[#allocation2 + $0x30] sm:$0xf] %v793_v56  ;;  %v1077_v60 = vsel %vm1065_vm11, %v1072_v42, %v1076_v43  ;;  %v7276_v63 = vrot.slane %v517_v48, 7  ;;  %1497 = vrot.lane.b32.xlu1 %v7271_v58, %s7084_s28  ;;  %v1295_v2 = vrot.slane %v6918_v59, 1  ;;  %v1095_v3 = vrot.slane %v1093_v52, 1  ;;  %v6937_v18 = vld [vmem:[%s9987_s1 + $0x20] sm:$0xff]  }
  0x31   : > { %v6919_v61 = vld [vmem:[#allocation2 + $0x20] ss:$0 sps:$4 sm:$0x11]   ;;  %v514_v62 = vsel %vm7186_vm9, %v506_v46, %v513_v55  ;;  %v1086_v4 = vshll.u32 %v6918_v59, 16  ;;  %v1105_v5 = vshll.u32 %v7271_v58, 16  ;;  %v1297_v6 = vrot.slane %v7254_v41, 1  ;;  %6740 = vmatprep.subr.bf16.mxu0 %v6937_v18  ;;  %6880 = vmatprep.subr.bf16.mxu1 %v6937_v18 }
  0x32   : > { %795 = vst.msk [vmem:[#allocation2 + $0x34] sm:$0xf] %vm172_vm0, %v514_v62  ;;  %v1298_v8 = vrot.slane %v6919_v61, 1  ;;  %v1098_v9 = vshll.u32 %v6919_v61, 16  ;;  %v255_v12 = vld [vmem:[#allocation2 + $0x44] sm:$0x1]  ;;  %v1296_v13 = vsel %vm1290_vm8, %v1294_v50, %v1295_v2  ;;  %v1084_v19 = vor.u32 %v1083_v54, %v1079_v53 }
  0x33   : > { %v7283_v10 = vld [vmem:[#allocation2 + $0x2c] ss:$0 sps:$4 sm:$0x11]   ;;  %v796_v14 = vld [vmem:[#allocation2 + $0x38] sm:$0x1]  ;;  %v520_v15 = vshll.u32 %v7244_v32, 16  ;;  %v1096_v25 = vor.u32 %v1095_v3, %v1091_v51  ;;  %6741 = vmatpush3.bf16.msra.mxu0 %v6937_v18  ;;  %6888 = vmatpush3.bf16.msra.mxu1 %v6937_v18 }
  0x34   : > { %1258 = vrot.lane.b32.xlu0 %v1077_v60, %s7085_s29  ;;  %v202_v16 = vld [vmem:[#allocation2 + $0x48] sm:$0x1]  ;;  %v1103_v20 = vshrl.u32 %v7271_v58, 16  ;;  %v1107_v21 = vrot.slane %v1105_v5, 1  ;;  %v1110_v22 = vshll.u32 %v7283_v10, 16  ;;  %1341 = vrot.lane.b32.xlu1 %v1296_v13, %s7082_s24  ;;  %v1088_v26 = vrot.slane %v1086_v4, 1 }
  0x35   : > { %v7292_v17 = vld [vmem:[%s7172_s17 + $0x28] sm:$0xf]  ;;  %v799_v23 = vld [vmem:[#allocation2 + $0x3c] sm:$0xf]  ;;  %v797_v27 = vsel %vm7130_vm3, %v515_v57, %v796_v14  ;;  %v522_v28 = vor.u32 %v520_v15, %v7276_v63  ;;  %v425_v29 = vld [vmem:[%s7172_s17 + $0x2c] sm:$0xf]  ;;  %v7308_v32 = vsel %vm1290_vm8, %v1297_v6, %v1298_v8 }
  0x36   : > { %v6939_v24 = vld [vmem:[%s9987_s1 + $0x28] sm:$0xff]   ;;  %v258_v31 = vld [vmem:[#allocation2 + $0x50] sm:$0x1]  ;;  %v1100_v33 = vrot.slane %v1098_v9, 1  ;;  %v1112_v34 = vrot.slane %v1110_v22, 1  ;;  %v523_v35 = vrot.slane %v7276_v63, 4  ;;  %v1108_v42 = vor.u32 %v1107_v21, %v1103_v20 }
  0x37   : > { %798 = vst [vmem:[#allocation2 + $0x38] sm:$0x1] %v797_v27  ;;  %s7086_s7 = smov 20   ;;  %v525_v37 = vshrl.u32 %v7286_v11, 16  ;;  %v528_v38 = vshll.u32 %v7286_v11, 16  ;;  %v800_v39 = vsel %vm7192_vm10, %v522_v28, %v799_v23  ;;  %v256_v40 = vsel %vm7154_vm6, 0, %v255_v12  ;;  %6742 = vmatprep.subr.bf16.mxu0 %v6939_v24  ;;  %6881 = vmatprep.subr.bf16.mxu1 %v6939_v24 }
  0x38   : > { %1458 = vrot.lane.b32.xlu0 %v1296_v13, %s7086_s7  ;;  %v205_v41 = vld [vmem:[#allocation2 + $0x54] sm:$0x1]  ;;  %801 = vst [vmem:[#allocation2 + $0x3c] sm:$0xf] %v800_v39  ;;  %257 = vst [vmem:[#allocation2 + $0x44] sm:$0x1] %v256_v40  ;;  %1460 = vrot.lane.b32.xlu1 %v7308_v32, %s7086_s7  ;;  %v7331_v52 = vsel %vm1065_vm11, %v1096_v25, %v1100_v33  ;;  %v1089_v55 = vsel %vm1065_vm11, %v1084_v19, %v1088_v26 }
  0x39   : > { %v203_v43 = vsel %vm7130_vm3, 0, %v202_v16  ;;  %v534_v44 = vshrl.u32 %v7292_v17, 16  ;;  %v537_v45 = vshll.u32 %v7292_v17, 16  ;;  %v6941_v46 = vld [vmem:[%s9987_s1 + $0x30] sm:$0xff]   ;;  %v527_v47 = vrot.slane %v525_v37, 7  ;;  %s7087_s10 = smov 32   ;;  %6743 = vmatpush3.bf16.msra.mxu0 %v6939_v24  ;;  %6889 = vmatpush3.bf16.msra.mxu1 %v6939_v24 }
  0x3a   : > { %204 = vst [vmem:[#allocation2 + $0x48] sm:$0x1] %v203_v43  ;;  %v542_v48 = vshrl.u32 %v425_v29, 16  ;;  %v545_v49 = vshll.u32 %v425_v29, 16  ;;  %v259_v50 = vsel %vm7154_vm6, 0, %v258_v31  ;;  %v1300_v53 = vrot.slane %v7271_v58, 1  ;;  %6744 = vmatprep.subr.bf16.mxu0 %v6941_v46  ;;  %6882 = vmatprep.subr.bf16.mxu1 %v6941_v46 }
  0x3b   : > { %v426_v51 = vld [vmem:[%s7172_s17 + $0x30] sm:$0xf]  ;;  %v536_v54 = vrot.slane %v534_v44, 7  ;;  %260 = vst [vmem:[#allocation2 + $0x50] sm:$0x1] %v259_v50  ;;  %v530_v56 = vor.u32 %v528_v38, %v527_v47  ;;  %v206_v59 = vsel %vm7130_vm3, 0, %v205_v41  ;;  %v7341_v61 = vsel %vm1065_vm11, %v1108_v42, %v1112_v34 }
  0x3c   : > { %1577 = vrot.lane.b32.xlu0 %v7308_v32, %s7087_s10  ;;  %v544_v57 = vrot.slane %v542_v48, 7  ;;  %v427_v60 = vld [vmem:[%s7172_s17 + $0x34] sm:$0xf]  ;;  %v532_v62 = vrot.slane %v527_v47, 4  ;;  %207 = vst [vmem:[#allocation2 + $0x54] sm:$0x1] %v206_v59 }
  0x3d   : > { %v540_v63 = vrot.slane %v536_v54, 4  ;;  %v551_v2 = vshrl.u32 %v426_v51, 16  ;;  %v6942_v3 = vld [vmem:[%s9987_s1 + $0x38] sm:$0xff]   ;;  %s7088_s16 = smov 16   ;;  %v531_v4 = vsel %vm7186_vm9, %v523_v35, %v530_v56  ;;  %v539_v5 = vor.u32 %v537_v45, %v536_v54  ;;  %v208_v9 = vld [vmem:[#allocation2 + $0x60] sm:$0x1]  ;;  %6745 = vmatpush3.bf16.msra.mxu0 %v6941_v46  ;;  %6890 = vmatpush3.bf16.msra.mxu1 %v6941_v46 }
  0x3e   : > { %1425 = vrot.lane.b32.xlu1 %v7331_v52, %s7088_s16  ;;  %v547_v6 = vor.u32 %v545_v49, %v544_v57  ;;  %v261_v8 = vld [vmem:[#allocation2 + $0x5c] sm:$0x1]  ;;  %802 = vst.msk [vmem:[#allocation2 + $0x40] sm:$0xf] %vm172_vm0, %v531_v4  ;;  %v549_v11 = vrot.slane %v544_v57, 4  ;;  %v554_v13 = vshll.u32 %v426_v51, 16  ;;  %6746 = vmatprep.subr.bf16.mxu0 %v6942_v3 }
  0x3f   : > { %v553_v12 = vrot.slane %v551_v2, 7  ;;  %v559_v14 = vshrl.u32 %v427_v60, 16  ;;  %v7352_v15 = vld [vmem:[%s7172_s17 + $0x38] sm:$0xf]  ;;  %v803_v16 = vld [vmem:[#allocation2 + $0x44] sm:$0x1]  ;;  %6883 = vmatprep.subr.bf16.mxu1 %v6942_v3 }
  0x40   : > { %1260 = vrot.lane.b32.xlu0 %v1089_v55, %s7085_s29  ;;  %v548_v17 = vsel %vm7186_vm9, %v540_v63, %v547_v6  ;;  %v429_v18 = vld [vmem:[%s7172_s17 + $0x3c] sm:$0xf]  ;;  %v264_v19 = vld [vmem:[#allocation2 + $0x68] sm:$0x1]  ;;  %v7358_v20 = vld [vmem:[#allocation2 + $0x30] sm:$0xff]   ;;  %v804_v21 = vsel %vm7130_vm3, %v532_v62, %v803_v16  ;;  %s7089_s18 = smov 28  }
  0x41   : > { %v806_v22 = vld [vmem:[#allocation2 + $0x48] sm:$0xf]  ;;  %809 = vst.msk [vmem:[#allocation2 + $0x4c] sm:$0xf] %vm172_vm0, %v548_v17  ;;  %v556_v23 = vor.u32 %v554_v13, %v553_v12  ;;  %v7363_v24 = vrot.slane %v559_v14, 7  ;;  %v557_v28 = vrot.slane %v553_v12, 4  ;;  %6747 = vmatpush3.bf16.msra.mxu0 %v6942_v3  ;;  %6891 = vmatpush3.bf16.msra.mxu1 %v6942_v3 }
  0x42   : > { %v211_v25 = vld [vmem:[#allocation2 + $0x6c] sm:$0x1]  ;;  %1544 = vrot.lane.b32.xlu1 %v7341_v61, %s7089_s18  ;;  %805 = vst [vmem:[#allocation2 + $0x44] sm:$0x1] %v804_v21  ;;  %v807_v26 = vsel %vm7192_vm10, %v539_v5, %v806_v22  ;;  %v810_v27 = vld [vmem:[#allocation2 + $0x50] sm:$0x1] }
  0x43   : > { %v562_v29 = vshll.u32 %v427_v60, 16  ;;  %808 = vst [vmem:[#allocation2 + $0x48] sm:$0xf] %v807_v26  ;;  %v811_v31 = vsel %vm7130_vm3, %v549_v11, %v810_v27  ;;  %v262_v33 = vsel %vm7154_vm6, 0, %v261_v8  ;;  %v209_v34 = vsel %vm7130_vm3, 0, %v208_v9  ;;  %s7090_s22 = smov 48  }
  0x44   : > { %v430_v35 = vld [vmem:[%s7172_s17 + $0x40] sm:$0xf]  ;;  %1423 = vrot.lane.b32.xlu0 %v1089_v55, %s7088_s16  ;;  %v1301_v37 = vrot.slane %v7283_v10, 1  ;;  %v7378_v38 = vld [vmem:[#allocation2 + $0x38] ss:$0 sps:$4 sm:$0x11]  }
  0x45   : > { %812 = vst [vmem:[#allocation2 + $0x50] sm:$0x1] %v811_v31  ;;  %v564_v39 = vor.u32 %v562_v29, %v7363_v24  ;;  %v813_v40 = vld [vmem:[#allocation2 + $0x54] sm:$0xf]  ;;  %263 = vst [vmem:[#allocation2 + $0x5c] sm:$0x1] %v262_v33 }
  0x46   : > { %210 = vst [vmem:[#allocation2 + $0x60] sm:$0x1] %v209_v34  ;;  %v568_v41 = vshrl.u32 %v7352_v15, 16  ;;  %v571_v42 = vshll.u32 %v7352_v15, 16  ;;  %v814_v43 = vsel %vm7192_vm10, %v556_v23, %v813_v40  ;;  %v576_v44 = vshrl.u32 %v429_v18, 16  ;;  %1262 = vrot.lane.b32.xlu1 %v7331_v52, %s7085_s29  ;;  %v7417_v13 = vld [vmem:[#allocation2 + $0x3c] sm:$0xff]  }
  0x47   : > { %v579_v45 = vshll.u32 %v429_v18, 16  ;;  %v265_v10 = vsel %vm7154_vm6, 0, %v264_v19  ;;  %v565_v46 = vsel %vm7186_vm9, %v557_v28, %v564_v39  ;;  %815 = vst [vmem:[#allocation2 + $0x54] sm:$0xf] %v814_v43  ;;  %v212_v48 = vsel %vm7130_vm3, 0, %v211_v25  ;;  %s7091_s23 = smov 64  }
  0x48   : > { %v570_v47 = vrot.slane %v568_v41, 7  ;;  %266 = vst [vmem:[#allocation2 + $0x68] sm:$0x1] %v265_v10  ;;  %v585_v49 = vshrl.u32 %v430_v35, 16  ;;  %v1117_v50 = vshll.u32 %v7358_v20, 16  ;;  %v578_v51 = vrot.slane %v576_v44, 7  ;;  %1542 = vrot.lane.b32.xlu0 %v7331_v52, %s7089_s18 }
  0x49   : > { %816 = vst.msk [vmem:[#allocation2 + $0x58] sm:$0xf] %vm172_vm0, %v565_v46  ;;  %213 = vst [vmem:[#allocation2 + $0x6c] sm:$0x1] %v212_v48  ;;  %v7400_v54 = vsel %vm1290_vm8, %v1300_v53, %v1301_v37  ;;  %v431_v55 = vld [vmem:[%s7172_s17 + $0x44] sm:$0xf] }
  0x4a   : > { %v1115_v56 = vshrl.u32 %v7358_v20, 16  ;;  %v566_v57 = vrot.slane %v7363_v24, 4  ;;  %v574_v59 = vrot.slane %v570_v47, 4  ;;  %v581_v60 = vor.u32 %v579_v45, %v578_v51  ;;  %1264 = vrot.lane.b32.xlu1 %v7341_v61, %s7085_s29  ;;  %v267_v16 = vld [vmem:[#allocation2 + $0x74] sm:$0x1]  ;;  %s7093_s26 = smov 56  }
  0x4b   : > { %v1122_v62 = vshll.u32 %v7378_v38, 16  ;;  %v573_v63 = vor.u32 %v571_v42, %v570_v47  ;;  %v587_v2 = vrot.slane %v585_v49, 7  ;;  %v588_v52 = vshll.u32 %v430_v35, 16  ;;  %v7436_v29 = vld [vmem:[#allocation2 + $0x44] ss:$0 sps:$4 sm:$0x11]  }
  0x4c   : > { %v1119_v3 = vrot.slane %v1117_v50, 1  ;;  %v817_v4 = vld [vmem:[#allocation2 + $0x5c] sm:$0x1]  ;;  %v582_v53 = vsel %vm7186_vm9, %v574_v59, %v581_v60  ;;  %v593_v5 = vshrl.u32 %v431_v55, 16  ;;  %1579 = vrot.lane.b32.xlu0 %v7400_v54, %s7087_s10  ;;  %v583_v9 = vrot.slane %v578_v51, 4 }
  0x4d   : > { %823 = vst.msk [vmem:[#allocation2 + $0x64] sm:$0xf] %vm172_vm0, %v582_v53  ;;  %v818_v6 = vsel %vm7130_vm3, %v566_v57, %v817_v4  ;;  %v820_v8 = vld [vmem:[#allocation2 + $0x60] sm:$0xf]  ;;  %v596_v11 = vshll.u32 %v431_v55, 16  ;;  %v1124_v12 = vrot.slane %v1122_v62, 1  ;;  %v590_v15 = vor.u32 %v588_v52, %v587_v2 }
  0x4e   : > { %1345 = vrot.lane.b32.xlu1 %v7400_v54, %s7082_s24  ;;  %819 = vst [vmem:[#allocation2 + $0x5c] sm:$0x1] %v818_v6  ;;  %v821_v14 = vsel %vm7192_vm10, %v573_v63, %v820_v8  ;;  %v1120_v17 = vor.u32 %v1119_v3, %v1115_v56  ;;  %v591_v19 = vrot.slane %v587_v2, 4  ;;  %v595_v21 = vrot.slane %v593_v5, 7  ;;  %v214_v34 = vld [vmem:[#allocation2 + $0x78] sm:$0x1] }
  0x4f   : > { %822 = vst [vmem:[#allocation2 + $0x60] sm:$0xf] %v821_v14  ;;  %v824_v18 = vld [vmem:[#allocation2 + $0x68] sm:$0x1]  ;;  %v1303_v23 = vrot.slane %v7358_v20, 1  ;;  %v1304_v26 = vrot.slane %v7378_v38, 1 }
  0x50   : > { %v827_v22 = vld [vmem:[#allocation2 + $0x6c] sm:$0xf]  ;;  %1343 = vrot.lane.b32.xlu0 %v7308_v32, %s7082_s24  ;;  %v825_v24 = vsel %vm7130_vm3, %v583_v9, %v824_v18  ;;  %v598_v25 = vor.u32 %v596_v11, %v595_v21  ;;  %v268_v28 = vsel %vm7154_vm6, 0, %v267_v16  ;;  %v7434_v32 = vsel %vm1065_vm11, %v1120_v17, %v1124_v12  ;;  %v432_v35 = vld [vmem:[%s7172_s17 + $0x48] sm:$0xf] }
  0x51   : > { %826 = vst [vmem:[#allocation2 + $0x68] sm:$0x1] %v825_v24  ;;  %v828_v27 = vsel %vm7192_vm10, %v590_v15, %v827_v22  ;;  %v1129_v31 = vshll.u32 %v7417_v13, 16  ;;  %269 = vst [vmem:[#allocation2 + $0x74] sm:$0x1] %v268_v28  ;;  %v215_v37 = vsel %vm7130_vm3, 0, %v214_v34  ;;  %v7450_v38 = vsel %vm1290_vm8, %v1303_v23, %v1304_v26 }
  0x52   : > { %1382 = vrot.lane.b32.xlu1 %v7358_v20, %s7083_s25  ;;  %v599_v33 = vsel %vm7186_vm9, %v591_v19, %v598_v25  ;;  %829 = vst [vmem:[#allocation2 + $0x6c] sm:$0xf] %v828_v27  ;;  %v1127_v39 = vshrl.u32 %v7417_v13, 16  ;;  %216 = vst [vmem:[#allocation2 + $0x78] sm:$0x1] %v215_v37  ;;  %v602_v41 = vshrl.u32 %v432_v35, 16 }
  0x53   : > { %830 = vst.msk [vmem:[#allocation2 + $0x70] sm:$0xf] %vm172_vm0, %v599_v33  ;;  %v433_v40 = vld [vmem:[%s7172_s17 + $0x4c] sm:$0xf]  ;;  %v1131_v42 = vrot.slane %v1129_v31, 1  ;;  %v600_v43 = vrot.slane %v595_v21, 4 }
  0x54   : > { %1380 = vrot.lane.b32.xlu0 %v7271_v58, %s7083_s25  ;;  %v1134_v58 = vshll.u32 %v7436_v29, 16  ;;  %v605_v44 = vshll.u32 %v432_v35, 16  ;;  %v604_v45 = vrot.slane %v602_v41, 7  ;;  %v610_v10 = vshrl.u32 %v433_v40, 16  ;;  %v270_v56 = vld [vmem:[#allocation2 + $0x80] sm:$0x1] }
  0x55   : > { %v1132_v48 = vor.u32 %v1131_v42, %v1127_v39  ;;  %v217_v2 = vld [vmem:[#allocation2 + $0x84] sm:$0x1]  ;;  %v434_v52 = vld [vmem:[%s7172_s17 + $0x50] sm:$0xf]  ;;  %v435_v3 = vld [vmem:[%s7172_s17 + $0x54] sm:$0xf] }
  0x56   : > { %1429 = vrot.lane.b32.xlu1 %v7434_v32, %s7088_s16  ;;  %v607_v47 = vor.u32 %v605_v44, %v604_v45  ;;  %v1136_v49 = vrot.slane %v1134_v58, 1  ;;  %v608_v51 = vrot.slane %v604_v45, 4  ;;  %v612_v55 = vrot.slane %v610_v10, 7  ;;  %v7481_v4 = vld [vmem:[#allocation2 + $0x48] sm:$0xff]   ;;  %v220_v18 = vld [vmem:[#allocation2 + $0x90] sm:$0x1] }
  0x57   : > { %v218_v53 = vsel %vm7130_vm3, 0, %v217_v2  ;;  %v619_v5 = vshrl.u32 %v434_v52, 16  ;;  %v627_v6 = vshrl.u32 %v435_v3, 16  ;;  %v1306_v8 = vrot.slane %v7417_v13, 1  ;;  %v436_v22 = vld [vmem:[%s7172_s17 + $0x58] sm:$0xf] }
  0x58   : > { %1427 = vrot.lane.b32.xlu0 %v7341_v61, %s7088_s16  ;;  %v831_v46 = vld [vmem:[#allocation2 + $0x74] sm:$0x1]  ;;  %v613_v61 = vshll.u32 %v433_v40, 16  ;;  %v7468_v62 = vsel %vm1065_vm11, %v1132_v48, %v1136_v49  ;;  %v1307_v9 = vrot.slane %v7436_v29, 1  ;;  %219 = vst [vmem:[#allocation2 + $0x84] sm:$0x1] %v218_v53 }
  0x59   : > { %v832_v50 = vsel %vm7130_vm3, %v600_v43, %v831_v46  ;;  %v834_v57 = vld [vmem:[#allocation2 + $0x78] sm:$0xf]  ;;  %v622_v11 = vshll.u32 %v434_v52, 16  ;;  %v630_v12 = vshll.u32 %v435_v3, 16  ;;  %v617_v14 = vrot.slane %v612_v55, 4 }
  0x5a   : > { %1464 = vrot.lane.b32.xlu1 %v7450_v38, %s7086_s7  ;;  %833 = vst [vmem:[#allocation2 + $0x74] sm:$0x1] %v832_v50  ;;  %v615_v59 = vor.u32 %v613_v61, %v612_v55  ;;  %v835_v60 = vsel %vm7192_vm10, %v607_v47, %v834_v57  ;;  %v621_v15 = vrot.slane %v619_v5, 7  ;;  %v629_v16 = vrot.slane %v627_v6, 7  ;;  %v437_v26 = vld [vmem:[%s7172_s17 + $0x5c] sm:$0xf] }
  0x5b   : > { %836 = vst [vmem:[#allocation2 + $0x78] sm:$0xf] %v835_v60  ;;  %v7491_v19 = vld [vmem:[#allocation2 + $0x50] ss:$0 sps:$4 sm:$0x11]   ;;  %v221_v21 = vsel %vm7130_vm3, 0, %v220_v18  ;;  %v7507_v37 = vsel %vm1290_vm8, %v1306_v8, %v1307_v9 }
  0x5c   : > { %1462 = vrot.lane.b32.xlu0 %v7400_v54, %s7086_s7  ;;  %v271_v54 = vsel %vm7154_vm6, 0, %v270_v56  ;;  %v616_v63 = vsel %vm7186_vm9, %v608_v51, %v615_v59  ;;  %v1141_v23 = vshll.u32 %v7481_v4, 16  ;;  %v625_v24 = vrot.slane %v621_v15, 4  ;;  %222 = vst [vmem:[#allocation2 + $0x90] sm:$0x1] %v221_v21  ;;  %v7528_v52 = vld [vmem:[#allocation2 + $0x54] sm:$0xff]  }
  0x5d   : > { %272 = vst [vmem:[#allocation2 + $0x80] sm:$0x1] %v271_v54  ;;  %837 = vst.msk [vmem:[#allocation2 + $0x7c] sm:$0xf] %vm172_vm0, %v616_v63  ;;  %v632_v25 = vor.u32 %v630_v12, %v629_v16  ;;  %v624_v28 = vor.u32 %v622_v11, %v621_v15  ;;  %v636_v29 = vshrl.u32 %v436_v22, 16  ;;  %v639_v31 = vshll.u32 %v436_v22, 16 }
  0x5e   : > { %1501 = vrot.lane.b32.xlu1 %v7417_v13, %s7084_s28  ;;  %v647_v35 = vshll.u32 %v437_v26, 16  ;;  %v634_v39 = vrot.slane %v629_v16, 4  ;;  %v276_v41 = vld [vmem:[#allocation2 + $0x98] sm:$0x1]  ;;  %v223_v42 = vld [vmem:[#allocation2 + $0x9c] sm:$0x1] }
  0x5f   : > { %v633_v34 = vsel %vm7186_vm9, %v625_v24, %v632_v25  ;;  %v638_v40 = vrot.slane %v636_v29, 7  ;;  %v1139_v58 = vshrl.u32 %v7481_v4, 16  ;;  %v1143_v43 = vrot.slane %v1141_v23, 1  ;;  %v841_v45 = vld [vmem:[#allocation2 + $0x84] sm:$0xf] }
  0x60   : > { %1499 = vrot.lane.b32.xlu0 %v7358_v20, %s7084_s28  ;;  %v273_v20 = vld [vmem:[#allocation2 + $0x8c] sm:$0x1]  ;;  %844 = vst.msk [vmem:[#allocation2 + $0x88] sm:$0xf] %vm172_vm0, %v633_v34  ;;  %v1146_v44 = vshll.u32 %v7491_v19, 16  ;;  %v842_v46 = vsel %vm7192_vm10, %v624_v28, %v841_v45  ;;  %v277_v49 = vsel %vm7154_vm6, 0, %v276_v41 }
  0x61   : > { %v274_v17 = vsel %vm7154_vm6, 0, %v273_v20  ;;  %v641_v47 = vor.u32 %v639_v31, %v638_v40  ;;  %v642_v48 = vrot.slane %v638_v40, 4  ;;  %v438_v50 = vld [vmem:[%s7172_s17 + $0x60] sm:$0xf]  ;;  %v439_v51 = vld [vmem:[%s7172_s17 + $0x64] sm:$0xf]  ;;  %v1144_v2 = vor.u32 %v1143_v43, %v1139_v58 }
  0x62   : > { %1548 = vrot.lane.b32.xlu1 %v7468_v62, %s7089_s18  ;;  %275 = vst [vmem:[#allocation2 + $0x8c] sm:$0x1] %v274_v17  ;;  %843 = vst [vmem:[#allocation2 + $0x84] sm:$0xf] %v842_v46  ;;  %v224_v56 = vsel %vm7130_vm3, 0, %v223_v42  ;;  %v653_v60 = vshrl.u32 %v438_v50, 16 }
  0x63   : > { %278 = vst [vmem:[#allocation2 + $0x98] sm:$0x1] %v277_v49  ;;  %v848_v59 = vld [vmem:[#allocation2 + $0x90] sm:$0xf]  ;;  %225 = vst [vmem:[#allocation2 + $0x9c] sm:$0x1] %v224_v56 }
  0x64   : > { %1546 = vrot.lane.b32.xlu0 %v7434_v32, %s7089_s18  ;;  %v838_v27 = vld [vmem:[#allocation2 + $0x80] sm:$0x1]  ;;  %v656_v54 = vshll.u32 %v438_v50, 16  ;;  %v661_v63 = vshrl.u32 %v439_v51, 16  ;;  %v849_v53 = vsel %vm7192_vm10, %v641_v47, %v848_v59  ;;  %v664_v5 = vshll.u32 %v439_v51, 16  ;;  %v7578_v46 = vld [vmem:[#allocation2 + $0x6c] sm:$0xff]  }
  0x65   : > { %v839_v33 = vsel %vm7130_vm3, %v617_v14, %v838_v27  ;;  %v279_v6 = vld [vmem:[#allocation2 + $0xa4] sm:$0x1]  ;;  %v1148_v20 = vrot.slane %v1146_v44, 1  ;;  %850 = vst [vmem:[#allocation2 + $0x90] sm:$0xf] %v849_v53  ;;  %v655_v8 = vrot.slane %v653_v60, 7 }
  0x66   : > { %1266 = vrot.lane.b32.xlu1 %v7434_v32, %s7085_s29  ;;  %v644_v32 = vshrl.u32 %v437_v26, 16  ;;  %840 = vst [vmem:[#allocation2 + $0x80] sm:$0x1] %v839_v33  ;;  %v663_v9 = vrot.slane %v661_v63, 7  ;;  %v280_v11 = vsel %vm7154_vm6, 0, %v279_v6  ;;  %v1309_v18 = vrot.slane %v7481_v4, 1 }
  0x67   : > { %281 = vst [vmem:[#allocation2 + $0xa4] sm:$0x1] %v280_v11  ;;  %v6928_v14 = vld [vmem:[#allocation2 + $0x5c] ss:$0 sps:$4 sm:$0x11]   ;;  %v658_v15 = vor.u32 %v656_v54, %v655_v8  ;;  %v659_v16 = vrot.slane %v655_v8, 4  ;;  %v1149_v21 = vsel %vm1065_vm11, %v1144_v2, %v1148_v20 }
  0x68   : > { %1581 = vrot.lane.b32.xlu0 %v7450_v38, %s7087_s10  ;;  %v646_v10 = vrot.slane %v644_v32, 7  ;;  %v666_v17 = vor.u32 %v664_v5, %v663_v9  ;;  %v1310_v22 = vrot.slane %v7491_v19, 1  ;;  %v1153_v23 = vshll.u32 %v7528_v52, 16  ;;  %v6930_v58 = vld [vmem:[#allocation2 + $0x68] ss:$0 sps:$4 sm:$0x11]  }
  0x69   : > { %v845_v55 = vld [vmem:[#allocation2 + $0x8c] sm:$0x1]  ;;  %v668_v27 = vrot.slane %v663_v9, 4  ;;  %v1151_v29 = vshrl.u32 %v7528_v52, 16  ;;  %v1312_v40 = vrot.slane %v7528_v52, 1  ;;  %v1313_v41 = vrot.slane %v6928_v14, 1 }
  0x6a   : > { %1268 = vrot.lane.b32.xlu1 %v7468_v62, %s7085_s29  ;;  %v649_v61 = vor.u32 %v647_v35, %v646_v10  ;;  %v846_v57 = vsel %vm7130_vm3, %v634_v39, %v845_v55  ;;  %v651_v12 = vrot.slane %v646_v10, 4  ;;  %v852_v24 = vld [vmem:[#allocation2 + $0x98] sm:$0x1]  ;;  %v855_v26 = vld [vmem:[#allocation2 + $0x9c] sm:$0xf]  ;;  %v1311_v28 = vsel %vm1290_vm8, %v1309_v18, %v1310_v22 }
  0x6b   : > { %847 = vst [vmem:[#allocation2 + $0x8c] sm:$0x1] %v846_v57  ;;  %v856_v19 = vsel %vm7192_vm10, %v658_v15, %v855_v26  ;;  %v1155_v31 = vrot.slane %v1153_v23, 1  ;;  %v1170_v44 = vshll.u32 %v6930_v58, 16  ;;  %v1316_v49 = vrot.slane %v6930_v58, 1  ;;  %v7602_v5 = vld [vmem:[#allocation2 + $0x78] sm:$0xff]  }
  0x6c   : > { %1583 = vrot.lane.b32.xlu0 %v7507_v37, %s7087_s10  ;;  %v650_v3 = vsel %vm7186_vm9, %v642_v48, %v649_v61  ;;  %v853_v25 = vsel %vm7130_vm3, %v651_v12, %v852_v24  ;;  %857 = vst [vmem:[#allocation2 + $0x9c] sm:$0xf] %v856_v19  ;;  %v6933_v50 = vld [vmem:[#allocation2 + $0x74] ss:$0 sps:$4 sm:$0x11]   ;;  %v1177_v51 = vshll.u32 %v7578_v46, 16 }
  0x6d   : > { %851 = vst.msk [vmem:[#allocation2 + $0x94] sm:$0xf] %vm172_vm0, %v650_v3  ;;  %854 = vst [vmem:[#allocation2 + $0x98] sm:$0x1] %v853_v25  ;;  %v1156_v32 = vor.u32 %v1155_v31, %v1151_v29  ;;  %v1172_v10 = vrot.slane %v1170_v44, 1  ;;  %v1175_v61 = vshrl.u32 %v7578_v46, 16 }
  0x6e   : > { %1349 = vrot.lane.b32.xlu1 %v7507_v37, %s7082_s24  ;;  %v859_v33 = vld [vmem:[#allocation2 + $0xa4] sm:$0x1]  ;;  %v1179_v56 = vrot.slane %v1177_v51, 1  ;;  %v1182_v57 = vshll.u32 %v6933_v50, 16  ;;  %v1318_v20 = vrot.slane %v7578_v46, 1  ;;  %v1319_v8 = vrot.slane %v6933_v50, 1 }
  0x6f   : > { %v860_v34 = vsel %vm7130_vm3, %v668_v27, %v859_v33  ;;  %v6940_v11 = vld [vmem:[#allocation2 + $0x80] ss:$0 sps:$4 sm:$0x11]   ;;  %v1189_v12 = vshll.u32 %v7602_v5, 16  ;;  %vm1609_vm12 = vcmask 31744   ;;  %v7617_v25 = vld [vmem:[#allocation2 + $0x84] sm:$0xff]  }
  0x70   : > { %1347 = vrot.lane.b32.xlu0 %v7450_v38, %s7082_s24  ;;  %v667_v38 = vsel %vm7186_vm9, %v659_v16, %v666_v17  ;;  %861 = vst [vmem:[#allocation2 + $0xa4] sm:$0x1] %v860_v34  ;;  %v1180_v60 = vor.u32 %v1179_v56, %v1175_v61  ;;  %v1184_v54 = vrot.slane %v1182_v57, 1  ;;  %v1320_v15 = vsel %vm1290_vm8, %v1318_v20, %v1319_v8  ;;  %v7045_v26 = vld [vmem:[#allocation2] sm:$0xff]   ;;  %v7046_v33 = vld [vmem:[#allocation2 + $0xc] sm:$0xff]  }
  0x71   : > { %858 = vst.msk [vmem:[#allocation2 + $0xa0] sm:$0xf] %vm172_vm0, %v667_v38  ;;  %v1187_v17 = vshrl.u32 %v7602_v5, 16  ;;  %v1191_v18 = vrot.slane %v1189_v12, 1  ;;  %vm1642_vm13 = vcmask 64512   ;;  %vm1675_vm14 = vcmask 97280  }
  0x72   : > { %1386 = vrot.lane.b32.xlu1 %v7481_v4, %s7083_s25  ;;  %v7595_v2 = vsel %vm1065_vm11, %v1180_v60, %v1184_v54  ;;  %vm1708_vm15 = vcmask 130048   ;;  %v1321_v29 = vrot.slane %v7602_v5, 1  ;;  %v1322_v31 = vrot.slane %v6940_v11, 1 }
  0x73   : > { %v1192_v24 = vor.u32 %v1191_v18, %v1187_v17  ;;  %vm1741_vm1 = vcmask 162816   ;;  %vm1774_vm7 = vcmask 195584   ;;  %v1199_v44 = vshrl.u32 %v7617_v25, 16 }
  0x74   : > { %1384 = vrot.lane.b32.xlu0 %v7417_v13, %s7083_s25  ;;  %v1158_v13 = vshll.u32 %v6928_v14, 16  ;;  %vm9994_vm5 = vcmask 261120   ;;  %vm9995_vm4 = vcmask 228352   ;;  %vm9993_vm2 = vcmask 293888   ;;  %v7665_v20 = vld [vmem:[#allocation2 + $0x90] sm:$0xff]  }
  0x76   : > { %1433 = vrot.lane.b32.xlu1 %v1149_v21, %s7088_s16  ;;  %v1160_v35 = vrot.slane %v1158_v13, 1 }
  0x78   : > { %1431 = vrot.lane.b32.xlu0 %v7468_v62, %s7088_s16  ;;  %v1161_v39 = vsel %vm1065_vm11, %v1156_v32, %v1160_v35  ;;  %v6929_v62 = vld [vmem:[#allocation2 + $0x60] sm:$0xff]   ;;  %v6944_v35 = vld [vmem:[#allocation2 + $0x8c] ss:$0 sps:$4 sm:$0x11]  }
  0x79   : > { %v1165_v42 = vshll.u32 %v6929_v62, 16  ;;  %v1163_v43 = vshrl.u32 %v6929_v62, 16  ;;  %v1315_v48 = vrot.slane %v6929_v62, 1 }
  0x7a   : > { %1468 = vrot.lane.b32.xlu1 %v1311_v28, %s7086_s7 }
  0x7b   : > { %v1317_v55 = vsel %vm1290_vm8, %v1315_v48, %v1316_v49 }
  0x7c   : > { %1466 = vrot.lane.b32.xlu0 %v7507_v37, %s7086_s7  ;;  %v1314_v37 = vsel %vm1290_vm8, %v1312_v40, %v1313_v41 }
  0x7e   : > { %1505 = vrot.lane.b32.xlu1 %v7528_v52, %s7084_s28 }
  0x80   : > { %1503 = vrot.lane.b32.xlu0 %v7481_v4, %s7084_s28  ;;  %v1167_v4 = vrot.slane %v1165_v42, 1 }
  0x82   : > { %1552 = vrot.lane.b32.xlu1 %v1161_v39, %s7089_s18  ;;  %v1168_v45 = vor.u32 %v1167_v4, %v1163_v43  ;;  %v1323_v43 = vsel %vm1290_vm8, %v1321_v29, %v1322_v31  ;;  %v282_v31 = vld [vmem:[#allocation2 + $0xb0] sm:$0x1] }
  0x84   : > { %1550 = vrot.lane.b32.xlu0 %v1149_v21, %s7089_s18  ;;  %v1173_v47 = vsel %vm1065_vm11, %v1168_v45, %v1172_v10  ;;  %v1206_v10 = vshll.u32 %v6944_v35, 16 }
  0x86   : > { %1270 = vrot.lane.b32.xlu1 %v1149_v21, %s7085_s29  ;;  %v1194_v21 = vshll.u32 %v6940_v11, 16  ;;  %v1208_v57 = vrot.slane %v1206_v10, 1  ;;  %v1325_v11 = vrot.slane %v6944_v35, 1  ;;  %v1327_v35 = vrot.slane %v7665_v20, 1 }
  0x88   : > { %1585 = vrot.lane.b32.xlu0 %v1311_v28, %s7087_s10  ;;  %v1196_v38 = vrot.slane %v1194_v21, 1  ;;  %v1211_v21 = vshrl.u32 %v7665_v20, 16 }
  0x8a   : > { %1272 = vrot.lane.b32.xlu1 %v1161_v39, %s7085_s29  ;;  %v1197_v32 = vsel %vm1065_vm11, %v1192_v24, %v1196_v38  ;;  %v226_v38 = vld [vmem:[#allocation2 + $0xa8] sm:$0x1] }
  0x8c   : > { %1587 = vrot.lane.b32.xlu0 %v1314_v37, %s7087_s10 }
  0x8e   : > { %1353 = vrot.lane.b32.xlu1 %v1314_v37, %s7082_s24 }
  0x90   : > { %1351 = vrot.lane.b32.xlu0 %v1311_v28, %s7082_s24 }
  0x92   : > { %1390 = vrot.lane.b32.xlu1 %v6929_v62, %s7083_s25 }
  0x94   : > { %1388 = vrot.lane.b32.xlu0 %v7528_v52, %s7083_s25 }
  0x96   : > { %1437 = vrot.lane.b32.xlu1 %v1173_v47, %s7088_s16 }
  0x98   : > { %1435 = vrot.lane.b32.xlu0 %v1161_v39, %s7088_s16  ;;  %v1201_v39 = vshll.u32 %v7617_v25, 16 }
  0x9a   : > { %1472 = vrot.lane.b32.xlu1 %v1317_v55, %s7086_s7  ;;  %v1340_v59 = vpop.permute.xlu1 %1339  ;;  %v1203_v45 = vrot.slane %v1201_v39, 1 }
  0x9c   : > { %1470 = vrot.lane.b32.xlu0 %v1314_v37, %s7086_s7  ;;  %v1204_v56 = vor.u32 %v1203_v45, %v1199_v44 }
  0x9e   : > { %v1377_v63 = vpop.permute.xlu0 %1376  ;;  %1509 = vrot.lane.b32.xlu1 %v7578_v46, %s7084_s28  ;;  %v1379_v3 = vpop.permute.xlu1 %1378 }
  0xa0   : > { %1507 = vrot.lane.b32.xlu0 %v6929_v62, %s7084_s28 }
  0xa2   : > { %v7598_v53 = vpop.permute.xlu0 %1495  ;;  %1556 = vrot.lane.b32.xlu1 %v7595_v2, %s7089_s18  ;;  %v7605_v6 = vpop.permute.xlu1 %1497 }
  0xa4   : > { %1554 = vrot.lane.b32.xlu0 %v1173_v47, %s7089_s18 }
  0xa6   : > { %v1259_v9 = vpop.permute.xlu0 %1258  ;;  %1274 = vrot.lane.b32.xlu1 %v1173_v47, %s7085_s29  ;;  %v1342_v14 = vpop.permute.xlu1 %1341 }
  0xa7   : > { %v1611_v27 = vsel %vm1609_vm12, %v7045_v26, %v1259_v9  ;;  %v1324_v9 = vrot.slane %v7617_v25, 1 }
  0xa8   : > { %1589 = vrot.lane.b32.xlu0 %v1317_v55, %s7087_s10  ;;  %v1644_v13 = vsel %vm1642_vm13, %v1611_v27, %v1340_v59  ;;  %v7688_v27 = vld [vmem:[#allocation2 + $0x9c] sm:$0xff]  }
  0xa9   : > { %v1677_v58 = vsel %vm1675_vm14, %v1644_v13, %v1377_v63  ;;  %v7677_v17 = vsel %vm1290_vm8, %v1324_v9, %v1325_v11  ;;  %v1225_v44 = vshll.u32 %v7688_v27, 16 }
  0xaa   : > { %v1459_v16 = vpop.permute.xlu0 %1458  ;;  %1276 = vrot.lane.b32.xlu1 %v7595_v2, %s7085_s29  ;;  %v1461_v22 = vpop.permute.xlu1 %1460 }
  0xac   : > { %1591 = vrot.lane.b32.xlu0 %v1320_v15, %s7087_s10 }
  0xae   : > { %v1578_v23 = vpop.permute.xlu0 %1577  ;;  %1357 = vrot.lane.b32.xlu1 %v1320_v15, %s7082_s24 }
  0xb0   : > { %1355 = vrot.lane.b32.xlu0 %v1317_v55, %s7082_s24  ;;  %v1426_v19 = vpop.permute.xlu1 %1425 }
  0xb2   : > { %v1261_v28 = vpop.permute.xlu0 %1260  ;;  %1394 = vrot.lane.b32.xlu1 %v7602_v5, %s7083_s25 }
  0xb3   : > { %v1613_v34 = vsel %vm1609_vm12, %v7046_v33, %v1261_v28  ;;  %v440_v33 = vld [vmem:[%s7172_s17 + $0x68] sm:$0xf] }
  0xb4   : > { %v1646_v62 = vsel %vm1642_vm13, %v1613_v34, %v1342_v14  ;;  %1392 = vrot.lane.b32.xlu0 %v7578_v46, %s7083_s25  ;;  %v1545_v40 = vpop.permute.xlu1 %1544  ;;  %v6946_v14 = vld [vmem:[#allocation2 + $0x98] ss:$0 sps:$4 sm:$0x11]   ;;  %v441_v34 = vld [vmem:[%s7172_s17 + $0x6c] sm:$0xf]  ;;  %v670_v39 = vshrl.u32 %v440_v33, 16 }
  0xb5   : > { %v1679_v41 = vsel %vm1675_vm14, %v1646_v62, %v1379_v3  ;;  %v7658_v3 = vsel %vm1065_vm11, %v1204_v56, %v1208_v57  ;;  %v678_v62 = vshrl.u32 %v441_v34, 16 }
  0xb6   : > { %v1712_v42 = vsel %vm1708_vm15, %v1679_v41, %v1426_v19  ;;  %v1424_v37 = vpop.permute.xlu0 %1423  ;;  %1441 = vrot.lane.b32.xlu1 %v1197_v32, %s7088_s16  ;;  %v227_v19 = vsel %vm7130_vm3, 0, %v226_v38  ;;  %v672_v10 = vrot.slane %v670_v39, 7  ;;  %v442_v39 = vld [vmem:[%s7172_s17 + $0x70] sm:$0xf] }
  0xb7   : > { %v1710_v4 = vsel %vm1708_vm15, %v1677_v58, %v1424_v37  ;;  %v1745_v47 = vsel %vm1741_vm1, %v1712_v42, %v1461_v22  ;;  %228 = vst [vmem:[#allocation2 + $0xa8] sm:$0x1] %v227_v19  ;;  %v7048_v42 = vld [vmem:[#allocation2 + $0x24] sm:$0xff]  }
  0xb8   : > { %v1743_v48 = vsel %vm1741_vm1, %v1710_v4, %v1459_v16  ;;  %1439 = vrot.lane.b32.xlu0 %v7595_v2, %s7088_s16  ;;  %v7642_v49 = vpop.permute.xlu1 %1262  ;;  %v1778_v55 = vsel %vm1774_vm7, %v1745_v47, %v7605_v6  ;;  %v7705_v4 = vld [vmem:[#allocation2 + $0xa4] ss:$0 sps:$4 sm:$0x11]   ;;  %v673_v47 = vshll.u32 %v440_v33, 16  ;;  %v676_v57 = vrot.slane %v672_v10, 4 }
  0xb9   : > { %v1776_v50 = vsel %vm1774_vm7, %v1743_v48, %v7598_v53  ;;  %v1811_v54 = vsel %vm9995_vm4, %v1778_v55, %v1545_v40  ;;  %v7047_v40 = vld [vmem:[#allocation2 + $0x18] sm:$0xff]   ;;  %v680_v48 = vrot.slane %v678_v62, 7  ;;  %v443_v62 = vld [vmem:[%s7172_s17 + $0x74] sm:$0xf] }
  0xba   : > { %v1543_v51 = vpop.permute.xlu0 %1542  ;;  %1476 = vrot.lane.b32.xlu1 %v1323_v43, %s7086_s7  ;;  %v1615_v41 = vsel %vm1609_vm12, %v7047_v40, %v7642_v49  ;;  %v1223_v49 = vshrl.u32 %v7688_v27, 16  ;;  %v675_v56 = vor.u32 %v673_v47, %v672_v10  ;;  %v698_v47 = vshll.u32 %v443_v62, 16 }
  0xbb   : > { %v1809_v61 = vsel %vm9995_vm4, %v1776_v50, %v1543_v51  ;;  %v681_v51 = vshll.u32 %v441_v34, 16  ;;  %v285_v34 = vld [vmem:[#allocation2 + $0xbc] sm:$0x1] }
  0xbc   : > { %1474 = vrot.lane.b32.xlu0 %v1320_v15, %s7086_s7  ;;  %v1265_v59 = vpop.permute.xlu1 %1264  ;;  %v1842_v60 = vsel %vm9994_vm5, %v1809_v61, %v1578_v23  ;;  %v1213_v15 = vshll.u32 %v7665_v20, 16  ;;  %v1218_v23 = vshll.u32 %v6946_v14, 16  ;;  %v286_v40 = vsel %vm7154_vm6, 0, %v285_v34 }
  0xbd   : > { %6748 = vmatprep.mubr.msk.bf16.mxu0 %vm9993_vm2, %v1842_v60  ;;  %v1617_v58 = vsel %vm1609_vm12, %v7048_v42, %v1265_v59  ;;  %v695_v42 = vshrl.u32 %v443_v62, 16  ;;  %287 = vst [vmem:[#allocation2 + $0xbc] sm:$0x1] %v286_v40  ;;  %v10044_v62 = vmov 0 }
  0xbe   : > { %v1580_v63 = vpop.permute.xlu0 %1579  ;;  %1513 = vrot.lane.b32.xlu1 %v7617_v25, %s7084_s28  ;;  %v1215_v22 = vrot.slane %v1213_v15, 1  ;;  %v1220_v29 = vrot.slane %v1218_v23, 1  ;;  %v862_v9 = vld [vmem:[#allocation2 + $0xa8] sm:$0xf] }
  0xbf   : > { %v1844_v2 = vsel %vm9994_vm5, %v1811_v54, %v1580_v63  ;;  %v1227_v54 = vrot.slane %v1225_v44, 1  ;;  %v1230_v63 = vshll.u32 %v7705_v4, 16  ;;  %v690_v44 = vshll.u32 %v442_v39, 16 }
  0xc0   : > { %1511 = vrot.lane.b32.xlu0 %v7602_v5, %s7084_s28  ;;  %6749 = vmatmul.mubr.msk.bf16.vlgmr.msra.gmra.mrb[0].mxu0 %vm9993_vm2, %v1844_v2  ;;  %v1346_v53 = vpop.permute.xlu1 %1345  ;;  %v1216_v28 = vor.u32 %v1215_v22, %v1211_v21  ;;  %v683_v2 = vor.u32 %v681_v51, %v680_v48  ;;  %v697_v10 = vrot.slane %v695_v42, 7 }
  0xc1   : > { %v1650_v55 = vsel %vm1642_vm13, %v1617_v58, %v1346_v53  ;;  %v863_v53 = vsel %vm7192_vm10, %v675_v56, %v862_v9 }
  0xc2   : > { %v1344_v6 = vpop.permute.xlu0 %1343  ;;  %1560 = vrot.lane.b32.xlu1 %v7658_v3, %s7089_s18  ;;  %v7709_v45 = vsel %vm1065_vm11, %v1216_v28, %v1220_v29  ;;  %864 = vst [vmem:[#allocation2 + $0xa8] sm:$0xf] %v863_v53  ;;  %v1232_v28 = vrot.slane %v1230_v63, 1  ;;  %v1330_v63 = vrot.slane %v7688_v27, 1  ;;  %v702_v9 = vrot.slane %v697_v10, 4 }
  0xc3   : > { %v1648_v61 = vsel %vm1642_vm13, %v1615_v41, %v1344_v6  ;;  %v685_v6 = vrot.slane %v680_v48, 4  ;;  %v687_v41 = vshrl.u32 %v442_v39, 16 }
  0xc4   : > { %1558 = vrot.lane.b32.xlu0 %v1197_v32, %s7089_s18  ;;  %v7668_v8 = vpop.permute.xlu1 %1382 }
  0xc6   : > { %v1381_v12 = vpop.permute.xlu0 %1380  ;;  %1278 = vrot.lane.b32.xlu1 %v1197_v32, %s7085_s29  ;;  %v283_v32 = vsel %vm7154_vm6, 0, %v282_v31 }
  0xc7   : > { %284 = vst [vmem:[#allocation2 + $0xb0] sm:$0x1] %v283_v32  ;;  %v1681_v59 = vsel %vm1675_vm14, %v1648_v61, %v1381_v12  ;;  %v1683_v12 = vsel %vm1675_vm14, %v1650_v55, %v7668_v8  ;;  %v229_v8 = vld [vmem:[#allocation2 + $0xb4] sm:$0x1]  ;;  %v700_v55 = vor.u32 %v698_v47, %v697_v10 }
  0xc8   : > { %1593 = vrot.lane.b32.xlu0 %v1323_v43, %s7087_s10  ;;  %v7674_v16 = vpop.permute.xlu1 %1429  ;;  %v230_v29 = vsel %vm7130_vm3, 0, %v229_v8 }
  0xc9   : > { %v1716_v31 = vsel %vm1708_vm15, %v1683_v12, %v7674_v16  ;;  %231 = vst [vmem:[#allocation2 + $0xb4] sm:$0x1] %v230_v29  ;;  %v311_v29 = vld [vmem:[#allocation3 + $0x18] sm:$0x1] }
  0xca   : > { %v1428_v18 = vpop.permute.xlu0 %1427  ;;  %1280 = vrot.lane.b32.xlu1 %v7658_v3, %s7085_s29 }
  0xcb   : > { %v1714_v11 = vsel %vm1708_vm15, %v1681_v59, %v1428_v18  ;;  %v684_v18 = vsel %vm7186_vm9, %v676_v57, %v683_v2  ;;  %v444_v59 = vld [vmem:[%s7172_s17 + $0x78] sm:$0xf] }
  0xcc   : > { %1595 = vrot.lane.b32.xlu0 %v7677_v17, %s7087_s10  ;;  %v7684_v24 = vpop.permute.xlu1 %1464  ;;  %865 = vst.msk [vmem:[#allocation2 + $0xac] sm:$0xf] %vm172_vm0, %v684_v18  ;;  %v704_v12 = vshrl.u32 %v444_v59, 16  ;;  %v235_v18 = vld [vmem:[#allocation2 + $0xcc] sm:$0x1]  ;;  %v707_v8 = vshll.u32 %v444_v59, 16 }
  0xcd   : > { %v1749_v32 = vsel %vm1741_vm1, %v1716_v31, %v7684_v24 }
  0xce   : > { %v1463_v26 = vpop.permute.xlu0 %1462  ;;  %1361 = vrot.lane.b32.xlu1 %v7677_v17, %s7082_s24  ;;  %v866_v22 = vld [vmem:[#allocation2 + $0xb0] sm:$0x1] }
  0xcf   : > { %v1747_v15 = vsel %vm1741_vm1, %v1714_v11, %v1463_v26  ;;  %v867_v38 = vsel %vm7130_vm3, %v685_v6, %v866_v22  ;;  %v873_v11 = vld [vmem:[#allocation2 + $0xbc] sm:$0x1]  ;;  %v1331_v6 = vrot.slane %v7705_v4, 1 }
  0xd0   : > { %v7692_v13 = vpop.permute.xlu1 %1501  ;;  %1359 = vrot.lane.b32.xlu0 %v1323_v43, %s7082_s24  ;;  %v1328_v43 = vrot.slane %v6946_v14, 1  ;;  %868 = vst [vmem:[#allocation2 + $0xb0] sm:$0x1] %v867_v38  ;;  %v869_v61 = vld [vmem:[#allocation2 + $0xb4] sm:$0xf]  ;;  %v874_v38 = vsel %vm7130_vm3, %v702_v9, %v873_v11 }
  0xd1   : > { %v1782_v16 = vsel %vm1774_vm7, %v1749_v32, %v7692_v13  ;;  %875 = vst [vmem:[#allocation2 + $0xbc] sm:$0x1] %v874_v38  ;;  %v7811_v34 = vsel %vm1290_vm8, %v1330_v63, %v1331_v6 }
  0xd2   : > { %v1500_v37 = vpop.permute.xlu0 %1499  ;;  %1398 = vrot.lane.b32.xlu1 %v7665_v20, %s7083_s25  ;;  %v7722_v14 = vsel %vm1290_vm8, %v1327_v35, %v1328_v43  ;;  %v689_v43 = vrot.slane %v687_v41, 7 }
  0xd3   : > { %v1780_v23 = vsel %vm1774_vm7, %v1747_v15, %v1500_v37  ;;  %v7776_v56 = vld [vmem:[#allocation2 + $0xa8] sm:$0xff]  }
  0xd4   : > { %v1549_v50 = vpop.permute.xlu1 %1548  ;;  %1396 = vrot.lane.b32.xlu0 %v7617_v25, %s7083_s25  ;;  %v692_v48 = vor.u32 %v690_v44, %v689_v43  ;;  %v288_v15 = vld [vmem:[#allocation2 + $0xc8] sm:$0x1]  ;;  %v1237_v4 = vshll.u32 %v7776_v56, 16  ;;  %v1235_v42 = vshrl.u32 %v7776_v56, 16  ;;  %v1333_v9 = vrot.slane %v7776_v56, 1 }
  0xd5   : > { %v1815_v24 = vsel %vm9995_vm4, %v1782_v16, %v1549_v50  ;;  %v693_v50 = vrot.slane %v689_v43, 4 }
  0xd6   : > { %v1547_v60 = vpop.permute.xlu0 %1546  ;;  %1445 = vrot.lane.b32.xlu1 %v7709_v45, %s7088_s16  ;;  %v870_v57 = vsel %vm7192_vm10, %v692_v48, %v869_v61 }
  0xd7   : > { %v1813_v26 = vsel %vm9995_vm4, %v1780_v23, %v1547_v60  ;;  %v445_v60 = vld [vmem:[%s7172_s17 + $0x7c] sm:$0xf]  ;;  %v701_v2 = vsel %vm7186_vm9, %v693_v50, %v700_v55  ;;  %871 = vst [vmem:[#allocation2 + $0xb4] sm:$0xf] %v870_v57  ;;  %v7049_v57 = vld [vmem:[#allocation2 + $0x30] sm:$0xff]  }
  0xd8   : > { %v7729_v21 = vpop.permute.xlu1 %1266  ;;  %1443 = vrot.lane.b32.xlu0 %v7658_v3, %s7088_s16  ;;  %v1228_v3 = vor.u32 %v1227_v54, %v1223_v49  ;;  %v232_v49 = vld [vmem:[#allocation2 + $0xc0] sm:$0x1]  ;;  %872 = vst.msk [vmem:[#allocation2 + $0xb8] sm:$0xf] %vm172_vm0, %v701_v2 }
  0xd9   : > { %v233_v53 = vsel %vm7130_vm3, 0, %v232_v49  ;;  %v7797_v23 = vld [vmem:[#allocation2 + $0xb0] ss:$0 sps:$4 sm:$0x11]   ;;  %v1619_v59 = vsel %vm1609_vm12, %v7049_v57, %v7729_v21 }
  0xda   : > { %v1582_v19 = vpop.permute.xlu0 %1581  ;;  %1480 = vrot.lane.b32.xlu1 %v7722_v14, %s7086_s7  ;;  %v7764_v37 = vsel %vm1065_vm11, %v1228_v3, %v1232_v28  ;;  %234 = vst [vmem:[#allocation2 + $0xc0] sm:$0x1] %v233_v53  ;;  %v715_v3 = vshll.u32 %v445_v60, 16  ;;  %v289_v28 = vsel %vm7154_vm6, 0, %v288_v15 }
  0xdb   : > { %v1846_v33 = vsel %vm9994_vm5, %v1813_v26, %v1582_v19  ;;  %v712_v26 = vshrl.u32 %v445_v60, 16  ;;  %v706_v19 = vrot.slane %v704_v12, 7  ;;  %290 = vst [vmem:[#allocation2 + $0xc8] sm:$0x1] %v289_v28  ;;  %v7050_v60 = vld [vmem:[#allocation2 + $0x3c] sm:$0xff]  }
  0xdc   : > { %6752 = vmatprep.mubr.msk.bf16.mxu0 %vm9993_vm2, %v1846_v33  ;;  %v7750_v35 = vpop.permute.xlu1 %1268  ;;  %1478 = vrot.lane.b32.xlu0 %v7677_v17, %s7086_s7  ;;  %v236_v33 = vsel %vm7130_vm3, 0, %v235_v18  ;;  %v6952_v11 = vld [vmem:[#allocation2 + $0xbc] ss:$0 sps:$4 sm:$0x11]  }
  0xdd   : > { %v709_v32 = vor.u32 %v707_v8, %v706_v19  ;;  %v710_v39 = vrot.slane %v706_v19, 4  ;;  %237 = vst [vmem:[#allocation2 + $0xcc] sm:$0x1] %v236_v33  ;;  %v1621_v63 = vsel %vm1609_vm12, %v7050_v60, %v7750_v35 }
  0xde   : > { %v1584_v58 = vpop.permute.xlu0 %1583  ;;  %1517 = vrot.lane.b32.xlu1 %v7688_v27, %s7084_s28 }
  0xdf   : > { %v1848_v17 = vsel %vm9994_vm5, %v1815_v24, %v1584_v58  ;;  %vm10043_vm5 = vsmask.f32 256  ;;  %v1239_v24 = vrot.slane %v1237_v4, 1  ;;  %v1242_v58 = vshll.u32 %v7797_v23, 16  ;;  %v7838_v49 = vld [vmem:[#allocation2 + $0xb4] sm:$0xff]  }
  0xe0   : > { %6753 = vmatmul.mubr.msk.bf16.gmra.mrb[4].mxu0 %vm9993_vm2, %v1848_v17  ;;  %v7768_v13 = vpop.permute.xlu1 %1349  ;;  %1515 = vrot.lane.b32.xlu0 %v7665_v20, %s7084_s28  ;;  %vm297_vm2 = vcmask 57344   ;;  %v1249_v53 = vshll.u32 %v7838_v49, 16  ;;  %v1247_v38 = vshrl.u32 %v7838_v49, 16 }
  0xe1   : > { %vm7815_vm4 = vmand %vm297_vm2, %vm10043_vm5  ;;  %298 = vst.msk [vmem:[#allocation3 + $0x8] sm:$0x1] %vm297_vm2, %v7081_v0  ;;  %v876_v43 = vld [vmem:[#allocation2 + $0xc0] sm:$0xf]  ;;  %v1240_v48 = vor.u32 %v1239_v24, %v1235_v42  ;;  %v1244_v50 = vrot.slane %v1242_v58, 1  ;;  %v1654_v21 = vsel %vm1642_vm13, %v1621_v63, %v7768_v13  ;;  %vm10049_vm5 = vcmask 293888  }
  0xe2   : > { %v7772_v51 = vpop.permute.xlu0 %1347  ;;  %1564 = vrot.lane.b32.xlu1 %v7764_v37, %s7089_s18  ;;  %v10045_v62 = vsel %vm7815_vm4, 4294967295, %v10044_v62  ;;  %302 = vst.msk [vmem:[#allocation3 + $0xd4] sm:$0x1] %vm297_vm2, %v7081_v0  ;;  %v312_v41 = vsel %vm7815_vm4, 0, %v311_v29  ;;  %v877_v10 = vsel %vm7192_vm10, %v709_v32, %v876_v43  ;;  %v880_v55 = vld [vmem:[#allocation2 + $0xc8] sm:$0x1] }
  0xe3   : > { %10046 = vst [vmem:[#allocation5_spill] sm:$0xff] %v10045_v62  ;;  %313 = vst [vmem:[#allocation3 + $0x18] sm:$0x1] %v312_v41  ;;  %v1245_v1 = vsel %vm1065_vm11, %v1240_v48, %v1244_v50  ;;  %v1652_v35 = vsel %vm1642_vm13, %v1619_v59, %v7772_v51  ;;  %v1251_v8 = vrot.slane %v1249_v53, 1  ;;  %v291_v58 = vld [vmem:[#allocation2 + $0xd4] sm:$0x1] }
  0xe4   : > { %v7782_v54 = vpop.permute.xlu1 %1386  ;;  %1562 = vrot.lane.b32.xlu0 %v7709_v45, %s7089_s18  ;;  %878 = vst [vmem:[#allocation2 + $0xc0] sm:$0xf] %v877_v10  ;;  %v292_v43 = vsel %vm7154_vm6, 0, %v291_v58  ;;  %vm10053_vm6 = vsmask.f32 7938 }
  0xe5   : > { %v1687_v13 = vsel %vm1675_vm14, %v1654_v21, %v7782_v54  ;;  %293 = vst [vmem:[#allocation2 + $0xd4] sm:$0x1] %v292_v43  ;;  %v363_v43 = vld [vmem:[#allocation3 + $0x14] sm:$0x1] }
  0xe6   : > { %v7793_v22 = vpop.permute.xlu0 %1384  ;;  %1282 = vrot.lane.b32.xlu1 %v7709_v45, %s7085_s29  ;;  %v714_v45 = vrot.slane %v712_v26, 7  ;;  %v1254_v26 = vshll.u32 %v6952_v11, 16 }
  0xe7   : > { %v1685_v12 = vsel %vm1675_vm14, %v1652_v35, %v7793_v22 }
  0xe8   : > { %v7804_v31 = vpop.permute.xlu1 %1433  ;;  %1597 = vrot.lane.b32.xlu0 %v7722_v14, %s7087_s10  ;;  %v717_v16 = vor.u32 %v715_v3, %v714_v45  ;;  %v719_v44 = vrot.slane %v714_v45, 4  ;;  %v1252_v45 = vor.u32 %v1251_v8, %v1247_v38  ;;  %v1256_v54 = vrot.slane %v1254_v26, 1  ;;  %v305_v38 = vld [vmem:[#allocation3] sm:$0x1] }
  0xe9   : > { %v1720_v28 = vsel %vm1708_vm15, %v1687_v13, %v7804_v31  ;;  %v306_v26 = vsel %vm7815_vm4, 0, %v305_v38 }
  0xea   : > { %v1432_v40 = vpop.permute.xlu0 %1431  ;;  %1284 = vrot.lane.b32.xlu1 %v7764_v37, %s7085_s29  ;;  %v718_v0 = vsel %vm7186_vm9, %v710_v39, %v717_v16  ;;  %v881_v36 = vsel %vm7130_vm3, %v719_v44, %v880_v55  ;;  %vm10048_vm3 = vcmask 261120   ;;  %v7887_v16 = vsel %vm1065_vm11, %v1252_v45, %v1256_v54  ;;  %307 = vst [vmem:[#allocation3] sm:$0x1] %v306_v26 }
  0xeb   : > { %879 = vst.msk [vmem:[#allocation2 + $0xc4] sm:$0xf] %vm172_vm0, %v718_v0  ;;  %882 = vst [vmem:[#allocation2 + $0xc8] sm:$0x1] %v881_v36  ;;  %vm10047_vm0 = vcmask 228352   ;;  %v1337_v0 = vrot.slane %v6952_v11, 1 }
  0xec   : > { %v1469_v17 = vpop.permute.xlu1 %1468  ;;  %1599 = vrot.lane.b32.xlu0 %v7811_v34, %s7087_s10  ;;  %vm10050_vm10 = vmmov %vm10047_vm0 }
  0xed   : > { %v1753_v33 = vsel %vm1741_vm1, %v1720_v28, %v1469_v17  ;;  %v1336_v17 = vrot.slane %v7838_v49, 1 }
  0xee   : > { %v1467_v47 = vpop.permute.xlu0 %1466  ;;  %1365 = vrot.lane.b32.xlu1 %v7811_v34, %s7082_s24 }
  0xef   : > { %v7904_v50 = vsel %vm1290_vm8, %v1336_v17, %v1337_v0 }
  0xf0   : > { %v1506_v61 = vpop.permute.xlu1 %1505  ;;  %1363 = vrot.lane.b32.xlu0 %v7722_v14, %s7082_s24  ;;  %v1334_v14 = vrot.slane %v7797_v23, 1  ;;  %v1718_v23 = vsel %vm1708_vm15, %v1685_v12, %v1432_v40 }
  0xf1   : > { %v1751_v4 = vsel %vm1741_vm1, %v1718_v23, %v1467_v47 }
  0xf2   : > { %v1504_v2 = vpop.permute.xlu0 %1503  ;;  %1402 = vrot.lane.b32.xlu1 %v7776_v56, %s7083_s25  ;;  %v1335_v18 = vsel %vm1290_vm8, %v1333_v9, %v1334_v14  ;;  %v7894_v42 = vld [vmem:[#allocation2 + $0xc0] sm:$0xff]   ;;  %v6954_v10 = vld [vmem:[#allocation2 + $0xc8] ss:$0 sps:$4 sm:$0x11]  }
  0xf3   : > { %v1784_v22 = vsel %vm1774_vm7, %v1751_v4, %v1504_v2  ;;  %v1414_v47 = vshll.u32 %v7894_v42, 16  ;;  %v1412_v7 = vshrl.u32 %v7894_v42, 16  ;;  %v1419_v36 = vshll.u32 %v6954_v10, 16  ;;  %v7913_v2 = vld [vmem:[#allocation2 + $0xcc] sm:$0xff]  }
  0xf4   : > { %v1553_v6 = vpop.permute.xlu1 %1552  ;;  %1400 = vrot.lane.b32.xlu0 %v7688_v27, %s7083_s25  ;;  %v1456_v21 = vrot.slane %v6954_v10, 1  ;;  %v1531_v28 = vshrl.u32 %v7913_v2, 16 }
  0xf5   : > { %v1421_v63 = vrot.slane %v1419_v36, 1  ;;  %v1574_v36 = vrot.slane %v7913_v2, 1 }
  0xf6   : > { %v1551_v15 = vpop.permute.xlu0 %1550  ;;  %1449 = vrot.lane.b32.xlu1 %v1245_v1, %s7088_s16 }
  0xf7   : > { %v1817_v19 = vsel %vm10047_vm0, %v1784_v22, %v1551_v15  ;;  %vm10051_vm0 = vmmov %vm10048_vm3  ;;  %v7926_v15 = vld [vmem:[#allocation2 + $0xd4] ss:$0 sps:$4 sm:$0x11]  }
  0xf8   : > { %v1271_v51 = vpop.permute.xlu1 %1270  ;;  %1447 = vrot.lane.b32.xlu0 %v7764_v37, %s7088_s16  ;;  %v1786_v37 = vsel %vm1774_vm7, %v1753_v33, %v1506_v61  ;;  %v1416_v61 = vrot.slane %v1414_v47, 1  ;;  %v1538_v45 = vshll.u32 %v7926_v15, 16 }
  0xf9   : > { %v1819_v39 = vsel %vm10050_vm10, %v1786_v37, %v1553_v6  ;;  %v1455_v6 = vrot.slane %v7894_v42, 1 }
  0xfa   : > { %v1586_v3 = vpop.permute.xlu0 %1585  ;;  %1484 = vrot.lane.b32.xlu1 %v1335_v18, %s7086_s7  ;;  %v1417_v60 = vor.u32 %v1416_v61, %v1412_v7  ;;  %v1540_v0 = vrot.slane %v1538_v45, 1 }
  0xfb   : > { %v1850_v29 = vsel %vm10048_vm3, %v1817_v19, %v1586_v3  ;;  %vm10052_vm3 = vmmov %vm10049_vm5  ;;  %v1457_v22 = vsel %vm1290_vm8, %v1455_v6, %v1456_v21  ;;  %v360_v3 = vld [vmem:[#allocation3 + $0x8] sm:$0x1] }
  0xfc   : > { %6756 = vmatprep.mubr.msk.bf16.mxu0 %vm10049_vm5, %v1850_v29  ;;  %v1273_v32 = vpop.permute.xlu1 %1272  ;;  %1482 = vrot.lane.b32.xlu0 %v7811_v34, %s7086_s7  ;;  %v7924_v12 = vsel %vm1065_vm11, %v1417_v60, %v1421_v63  ;;  %vm7942_vm5 = vmand %vm297_vm2, %vm10053_vm6 }
  0xfd   : > { %v1625_v9 = vsel %vm1609_vm12, %v7528_v52, %v1273_v32  ;;  %v1533_v52 = vshll.u32 %v7913_v2, 16  ;;  %v361_v54 = vsel %vm7942_vm5, 0, %v360_v3  ;;  %vm10056_vm2 = vmmov %vm10050_vm10  ;;  %v364_v47 = vsel %vm7942_vm5, 0, %v363_v43 }
  0xfe   : > { %v1588_v40 = vpop.permute.xlu0 %1587  ;;  %1521 = vrot.lane.b32.xlu1 %v7838_v49, %s7084_s28  ;;  %362 = vst [vmem:[#allocation3 + $0x8] sm:$0x1] %v361_v54  ;;  %vm10057_vm10 = vmmov %vm10051_vm0 }
  0xff   : > { %v1852_v31 = vsel %vm10051_vm0, %v1819_v39, %v1588_v40  ;;  %v1535_v29 = vrot.slane %v1533_v52, 1  ;;  %v308_v39 = vld [vmem:[#allocation3 + $0xc] sm:$0x1]  ;;  %vm10058_vm0 = vmmov %vm10052_vm3  ;;  %365 = vst [vmem:[#allocation3 + $0x14] sm:$0x1] %v364_v47 }
 0x100   : > { %6757 = vmatmul.mubr.msk.bf16.gmra.mrb[8].mxu0 %vm10052_vm3, %v1852_v31  ;;  %v1354_v41 = vpop.permute.xlu1 %1353  ;;  %1519 = vrot.lane.b32.xlu0 %v7776_v56, %s7084_s28  ;;  %vm10059_vm3 = vmmov %vm10056_vm2 }
 0x101   : > { %v1658_v35 = vsel %vm1642_vm13, %v1625_v9, %v1354_v41  ;;  %v1536_v17 = vor.u32 %v1535_v29, %v1531_v28  ;;  %vm10060_vm6 = vmmov %vm10057_vm10 }
 0x102   : > { %v1352_v34 = vpop.permute.xlu0 %1351  ;;  %1568 = vrot.lane.b32.xlu1 %v7887_v16, %s7089_s18 }
 0x104   : > { %v1391_v24 = vpop.permute.xlu1 %1390  ;;  %1566 = vrot.lane.b32.xlu0 %v1245_v1, %s7089_s18 }
 0x105   : > { %v1691_v13 = vsel %vm1675_vm14, %v1658_v35, %v1391_v24  ;;  %v366_v24 = vld [vmem:[#allocation3 + $0x20] sm:$0x1]  ;;  %v6958_v60 = vld [vmem:[#allocation3 + $0x8] ss:$0 sps:$4 sm:$0x11]  }
 0x106   : > { %v1389_v44 = vpop.permute.xlu0 %1388  ;;  %1286 = vrot.lane.b32.xlu1 %v1245_v1, %s7085_s29  ;;  %v7051_v1 = vld [vmem:[#allocation2 + $0x48] sm:$0xff]  }
 0x107   : > { %v1623_v11 = vsel %vm1609_vm12, %v7051_v1, %v1271_v51 }
 0x108   : > { %v1438_v48 = vpop.permute.xlu1 %1437  ;;  %1601 = vrot.lane.b32.xlu0 %v1335_v18, %s7087_s10 }
 0x109   : > { %v1724_v40 = vsel %vm1708_vm15, %v1691_v13, %v1438_v48 }
 0x10a   : > { %v1436_v55 = vpop.permute.xlu0 %1435  ;;  %1288 = vrot.lane.b32.xlu1 %v7887_v16, %s7085_s29 }
 0x10c   : > { %v1473_v57 = vpop.permute.xlu1 %1472  ;;  %1603 = vrot.lane.b32.xlu0 %v7904_v50, %s7087_s10 }
 0x10e   : > { %v1471_v59 = vpop.permute.xlu0 %1470  ;;  %1369 = vrot.lane.b32.xlu1 %v7904_v50, %s7082_s24 }
 0x110   : > { %v1510_v14 = vpop.permute.xlu1 %1509  ;;  %1367 = vrot.lane.b32.xlu0 %v1335_v18, %s7082_s24  ;;  %v1656_v18 = vsel %vm1642_vm13, %v1623_v11, %v1352_v34  ;;  %v309_v34 = vsel %vm7815_vm4, 0, %v308_v39  ;;  %v2959_v11 = vshll.u32 %v6958_v60, 16 }
 0x111   : > { %v1689_v8 = vsel %vm1675_vm14, %v1656_v18, %v1389_v44  ;;  %310 = vst [vmem:[#allocation3 + $0xc] sm:$0x1] %v309_v34  ;;  %v1757_v44 = vsel %vm1741_vm1, %v1724_v40, %v1473_v57  ;;  %v1575_v57 = vrot.slane %v7926_v15, 1 }
 0x112   : > { %v1508_v53 = vpop.permute.xlu0 %1507  ;;  %1406 = vrot.lane.b32.xlu1 %v7894_v42, %s7083_s25  ;;  %v1722_v4 = vsel %vm1708_vm15, %v1689_v8, %v1436_v55  ;;  %v1790_v48 = vsel %vm1774_vm7, %v1757_v44, %v1510_v14  ;;  %v6957_v55 = vld [vmem:[#allocation3] sm:$0xff]   ;;  %v2961_v35 = vrot.slane %v2959_v11, 1 }
 0x113   : > { %v1755_v33 = vsel %vm1741_vm1, %v1722_v4, %v1471_v59  ;;  %v1541_v59 = vsel %vm1065_vm11, %v1536_v17, %v1540_v0  ;;  %v2954_v63 = vshll.u32 %v6957_v55, 16  ;;  %v2952_v14 = vshrl.u32 %v6957_v55, 16  ;;  %v372_v0 = vld [vmem:[#allocation3 + $0x38] sm:$0x1] }
 0x114   : > { %v1557_v23 = vpop.permute.xlu1 %1556  ;;  %1404 = vrot.lane.b32.xlu0 %v7838_v49, %s7083_s25  ;;  %v1788_v37 = vsel %vm1774_vm7, %v1755_v33, %v1508_v53  ;;  %v3175_v18 = vrot.slane %v6957_v55, 1  ;;  %v373_v44 = vsel %vm7942_vm5, 0, %v372_v0  ;;  %v329_v0 = vld [vmem:[#allocation3 + $0x60] sm:$0x1]  ;;  %s7092_s25 = smov 40  }
 0x115   : > { %v1823_v7 = vsel %vm10059_vm3, %v1790_v48, %v1557_v23  ;;  %v2956_v1 = vrot.slane %v2954_v63, 1  ;;  %v3176_v23 = vrot.slane %v6958_v60, 1  ;;  %374 = vst [vmem:[#allocation3 + $0x38] sm:$0x1] %v373_v44 }
 0x116   : > { %v1555_v51 = vpop.permute.xlu0 %1554  ;;  %1453 = vrot.lane.b32.xlu1 %v7924_v12, %s7088_s16 }
 0x117   : > { %v1821_v31 = vsel %vm10056_vm2, %v1788_v37, %v1555_v51  ;;  %vm10061_vm2 = vmmov %vm10058_vm0  ;;  %v2957_v21 = vor.u32 %v2956_v1, %v2952_v14  ;;  %v3177_v26 = vsel %vm1290_vm8, %v3175_v18, %v3176_v23  ;;  %v323_v14 = vld [vmem:[#allocation3 + $0x48] sm:$0x1] }
 0x118   : > { %v7951_v32 = vpop.permute.xlu1 %1274  ;;  %1451 = vrot.lane.b32.xlu0 %v7887_v16, %s7088_s16  ;;  %v367_v16 = vsel %vm7942_vm5, 0, %v366_v24  ;;  %v314_v24 = vld [vmem:[#allocation3 + $0x24] sm:$0x1]  ;;  %v324_v1 = vsel %vm7815_vm4, 0, %v323_v14 }
 0x119   : > { %368 = vst [vmem:[#allocation3 + $0x20] sm:$0x1] %v367_v16  ;;  %v315_v17 = vsel %vm7815_vm4, 0, %v314_v24  ;;  %325 = vst [vmem:[#allocation3 + $0x48] sm:$0x1] %v324_v1 }
 0x11a   : > { %v1590_v41 = vpop.permute.xlu0 %1589  ;;  %1488 = vrot.lane.b32.xlu1 %v1457_v22, %s7086_s7  ;;  %316 = vst [vmem:[#allocation3 + $0x24] sm:$0x1] %v315_v17 }
 0x11b   : > { %v1854_v58 = vsel %vm10057_vm10, %v1821_v31, %v1590_v41  ;;  %vm10062_vm10 = vmmov %vm10059_vm3 }
 0x11c   : > { %6760 = vmatprep.mubr.msk.bf16.mxu0 %vm10058_vm0, %v1854_v58  ;;  %v1277_v10 = vpop.permute.xlu1 %1276  ;;  %1486 = vrot.lane.b32.xlu0 %v7904_v50, %s7086_s7  ;;  %vm10063_vm0 = vmmov %vm10060_vm6 }
 0x11d   : > { %v1629_v28 = vsel %vm1609_vm12, %v7578_v46, %v1277_v10  ;;  %v369_v10 = vld [vmem:[#allocation3 + $0x2c] sm:$0x1]  ;;  %vm10064_vm3 = vmmov %vm10061_vm2 }
 0x11e   : > { %v1592_v61 = vpop.permute.xlu0 %1591  ;;  %1525 = vrot.lane.b32.xlu1 %v7913_v2, %s7084_s28  ;;  %v1576_v2 = vsel %vm1290_vm8, %v1574_v36, %v1575_v57  ;;  %v370_v55 = vsel %vm7942_vm5, 0, %v369_v10 }
 0x11f   : > { %v1856_v50 = vsel %vm10060_vm6, %v1823_v7, %v1592_v61  ;;  %371 = vst [vmem:[#allocation3 + $0x2c] sm:$0x1] %v370_v55  ;;  %vm10065_vm6 = vmmov %vm10062_vm10 }
 0x120   : > { %6761 = vmatmul.mubr.msk.bf16.gmra.mrb[12].mxu0 %vm10061_vm2, %v1856_v50  ;;  %v1358_v9 = vpop.permute.xlu1 %1357  ;;  %1523 = vrot.lane.b32.xlu0 %v7894_v42, %s7084_s28  ;;  %v2962_v42 = vsel %vm1065_vm11, %v2957_v21, %v2961_v35  ;;  %vm10066_vm2 = vmmov %vm10063_vm0 }
 0x121   : > { %v1662_v54 = vsel %vm1642_vm13, %v1629_v28, %v1358_v9 }
 0x122   : > { %v1356_v53 = vpop.permute.xlu0 %1355  ;;  %1572 = vrot.lane.b32.xlu1 %v1541_v59, %s7089_s18 }
 0x124   : > { %v1395_v6 = vpop.permute.xlu1 %1394  ;;  %1570 = vrot.lane.b32.xlu0 %v7924_v12, %s7089_s18  ;;  %v317_v12 = vld [vmem:[#allocation3 + $0x30] sm:$0x1] }
 0x125   : > { %v318_v4 = vsel %vm7815_vm4, 0, %v317_v12  ;;  %v1695_v31 = vsel %vm1675_vm14, %v1662_v54, %v1395_v6 }
 0x126   : > { %v1393_v15 = vpop.permute.xlu0 %1392  ;;  %1607 = vrot.lane.b32.xlu1 %v1576_v2, %s7087_s10  ;;  %319 = vst [vmem:[#allocation3 + $0x30] sm:$0x1] %v318_v4 }
 0x128   : > { %v1442_v52 = vpop.permute.xlu1 %1441  ;;  %1605 = vrot.lane.b32.xlu0 %v1457_v22, %s7087_s10  ;;  %v7052_v22 = vld [vmem:[#allocation2 + $0x60] sm:$0xff]  }
 0x129   : > { %v1627_v3 = vsel %vm1609_vm12, %v7052_v22, %v7951_v32  ;;  %v1728_v16 = vsel %vm1708_vm15, %v1695_v31, %v1442_v52 }
 0x12a   : > { %v1440_v38 = vpop.permute.xlu0 %1439  ;;  %v1660_v33 = vsel %vm1642_vm13, %v1627_v3, %v1356_v53  ;;  %v320_v3 = vld [vmem:[#allocation3 + $0x3c] sm:$0x1] }
 0x12b   : > { %v1693_v37 = vsel %vm1675_vm14, %v1660_v33, %v1393_v15 }
 0x12c   : > { %v1477_v8 = vpop.permute.xlu1 %1476  ;;  %3143 = vrot.lane.b32.xlu0 %v2962_v42, %s7082_s24  ;;  %v1726_v40 = vsel %vm1708_vm15, %v1693_v37, %v1440_v38  ;;  %v375_v37 = vld [vmem:[#allocation3 + $0x44] sm:$0x1] }
 0x12d   : > { %v1761_v47 = vsel %vm1741_vm1, %v1728_v16, %v1477_v8  ;;  %v376_v31 = vsel %vm7942_vm5, 0, %v375_v37  ;;  %v330_v16 = vsel %vm7815_vm4, 0, %v329_v0 }
 0x12e   : > { %v1475_v13 = vpop.permute.xlu0 %1474  ;;  %377 = vst [vmem:[#allocation3 + $0x44] sm:$0x1] %v376_v31  ;;  %331 = vst [vmem:[#allocation3 + $0x60] sm:$0x1] %v330_v16 }
 0x12f   : > { %v1759_v41 = vsel %vm1741_vm1, %v1726_v40, %v1475_v13 }
 0x130   : > { %v1514_v51 = vpop.permute.xlu1 %1513  ;;  %3223 = vrot.lane.b32.xlu0 %v3177_v26, %s7088_s16 }
 0x131   : > { %v1794_v7 = vsel %vm1774_vm7, %v1761_v47, %v1514_v51 }
 0x132   : > { %v1512_v29 = vpop.permute.xlu0 %1511 }
 0x133   : > { %v1792_v32 = vsel %vm1774_vm7, %v1759_v41, %v1512_v29  ;;  %v321_v29 = vsel %vm7815_vm4, 0, %v320_v3 }
 0x134   : > { %v1561_v45 = vpop.permute.xlu1 %1560  ;;  %322 = vst [vmem:[#allocation3 + $0x3c] sm:$0x1] %v321_v29 }
 0x135   : > { %v1827_v61 = vsel %vm10065_vm6, %v1794_v7, %v1561_v45  ;;  %v378_v45 = vld [vmem:[#allocation3 + $0x50] sm:$0x1] }
 0x136   : > { %v1559_v39 = vpop.permute.xlu0 %1558  ;;  %v379_v33 = vsel %vm7942_vm5, 0, %v378_v45 }
 0x137   : > { %v1825_v46 = vsel %vm10062_vm10, %v1792_v32, %v1559_v39  ;;  %vm10067_vm10 = vmmov %vm10064_vm3  ;;  %380 = vst [vmem:[#allocation3 + $0x50] sm:$0x1] %v379_v33 }
 0x138   : > { %v1279_v34 = vpop.permute.xlu1 %1278 }
 0x139   : > { %v1631_v63 = vsel %vm1609_vm12, %v7602_v5, %v1279_v34 }
 0x13a   : > { %v1594_v58 = vpop.permute.xlu0 %1593 }
 0x13b   : > { %v1858_v43 = vsel %vm10063_vm0, %v1825_v46, %v1594_v58  ;;  %vm10068_vm0 = vmmov %vm10065_vm6 }
 0x13c   : > { %6764 = vmatprep.mubr.msk.bf16.mxu1 %vm10064_vm3, %v1858_v43  ;;  %v1281_v48 = vpop.permute.xlu1 %1280  ;;  %vm10069_vm3 = vmmov %vm10066_vm2 }
 0x13d   : > { %v1633_v2 = vsel %vm1609_vm12, %v7617_v25, %v1281_v48  ;;  %vm10070_vm6 = vmmov %vm10068_vm0 }
 0x13e   : > { %v1596_v36 = vpop.permute.xlu0 %1595 }
 0x13f   : > { %v1860_v57 = vsel %vm10066_vm2, %v1827_v61, %v1596_v36  ;;  %vm10071_vm2 = vmmov %vm10067_vm10 }
 0x140   : > { %6765 = vmatmul.mubr.msk.bf16.vlgmr.msra.gmra.mrb[0].mxu1 %vm10067_vm10, %v1860_v57  ;;  %v1362_v50 = vpop.permute.xlu1 %1361  ;;  %vm10072_vm10 = vmmov %vm10069_vm3 }
 0x141   : > { %v1666_v15 = vsel %vm1642_vm13, %v1633_v2, %v1362_v50  ;;  %v326_v2 = vld [vmem:[#allocation3 + $0x54] sm:$0x1] }
 0x142   : > { %v1360_v59 = vpop.permute.xlu0 %1359 }
 0x143   : > { %v1664_v53 = vsel %vm1642_vm13, %v1631_v63, %v1360_v59 }
 0x144   : > { %v1399_v60 = vpop.permute.xlu1 %1398 }
 0x145   : > { %v1699_v42 = vsel %vm1675_vm14, %v1666_v15, %v1399_v60 }
 0x146   : > { %v1397_v9 = vpop.permute.xlu0 %1396 }
 0x147   : > { %v1697_v21 = vsel %vm1675_vm14, %v1664_v53, %v1397_v9 }
 0x148   : > { %v1446_v11 = vpop.permute.xlu1 %1445 }
 0x149   : > { %v1732_v8 = vsel %vm1708_vm15, %v1699_v42, %v1446_v11 }
 0x14a   : > { %v1444_v6 = vpop.permute.xlu0 %1443 }
 0x14b   : > { %v1730_v5 = vsel %vm1708_vm15, %v1697_v21, %v1444_v6  ;;  %v327_v21 = vsel %vm7815_vm4, 0, %v326_v2 }
 0x14c   : > { %v1481_v35 = vpop.permute.xlu1 %1480  ;;  %328 = vst [vmem:[#allocation3 + $0x54] sm:$0x1] %v327_v21  ;;  %v390_v21 = vld [vmem:[#allocation3 + $0x80] sm:$0x1] }
 0x14d   : > { %v1765_v13 = vsel %vm1741_vm1, %v1732_v8, %v1481_v35  ;;  %v384_v35 = vld [vmem:[#allocation3 + $0x68] sm:$0x1] }
 0x14e   : > { %v1479_v52 = vpop.permute.xlu0 %1478 }
 0x14f   : > { %v1763_v23 = vsel %vm1741_vm1, %v1730_v5, %v1479_v52  ;;  %v385_v52 = vsel %vm7942_vm5, 0, %v384_v35  ;;  %v381_v5 = vld [vmem:[#allocation3 + $0x5c] sm:$0x1] }
 0x150   : > { %v1518_v18 = vpop.permute.xlu1 %1517  ;;  %386 = vst [vmem:[#allocation3 + $0x68] sm:$0x1] %v385_v52 }
 0x151   : > { %v1798_v22 = vsel %vm1774_vm7, %v1765_v13, %v1518_v18 }
 0x152   : > { %v1516_v38 = vpop.permute.xlu0 %1515 }
 0x153   : > { %v1796_v25 = vsel %vm1774_vm7, %v1763_v23, %v1516_v38  ;;  %v382_v23 = vsel %vm7942_vm5, 0, %v381_v5  ;;  %v391_v5 = vsel %vm7942_vm5, 0, %v390_v21 }
 0x154   : > { %v1565_v26 = vpop.permute.xlu1 %1564  ;;  %383 = vst [vmem:[#allocation3 + $0x5c] sm:$0x1] %v382_v23  ;;  %392 = vst [vmem:[#allocation3 + $0x80] sm:$0x1] %v391_v5 }
 0x155   : > { %v1831_v39 = vsel %vm10070_vm6, %v1798_v22, %v1565_v26  ;;  %v335_v22 = vld [vmem:[#allocation3 + $0x78] sm:$0x1] }
 0x156   : > { %v1563_v12 = vpop.permute.xlu0 %1562  ;;  %v336_v3 = vsel %vm7815_vm4, 0, %v335_v22 }
 0x157   : > { %v1829_v4 = vsel %vm10068_vm0, %v1796_v25, %v1563_v12  ;;  %vm10073_vm0 = vmmov %vm10071_vm2  ;;  %337 = vst [vmem:[#allocation3 + $0x78] sm:$0x1] %v336_v3 }
 0x158   : > { %v1283_v51 = vpop.permute.xlu1 %1282 }
 0x159   : > { %v1635_v58 = vsel %vm1609_vm12, %v7665_v20, %v1283_v51 }
 0x15a   : > { %v1598_v28 = vpop.permute.xlu0 %1597 }
 0x15b   : > { %v1862_v54 = vsel %vm10069_vm3, %v1829_v4, %v1598_v28  ;;  %vm10074_vm3 = vmmov %vm10070_vm6 }
 0x15c   : > { %6768 = vmatprep.mubr.msk.bf16.mxu1 %vm10071_vm2, %v1862_v54  ;;  %v1285_v40 = vpop.permute.xlu1 %1284  ;;  %vm10075_vm6 = vmmov %vm10072_vm10 }
 0x15d   : > { %v1637_v10 = vsel %vm1609_vm12, %v7688_v27, %v1285_v40  ;;  %vm10076_vm2 = vmmov %vm10074_vm3 }
 0x15e   : > { %v1600_v41 = vpop.permute.xlu0 %1599 }
 0x15f   : > { %v1864_v34 = vsel %vm10072_vm10, %v1831_v39, %v1600_v41  ;;  %vm10077_vm10 = vmmov %vm10073_vm0  ;;  %v8090_v41 = vld [vmem:[%s9988_s2] ss:$0 sm:$0xff] }
 0x160   : > { %6769 = vmatmul.mubr.msk.bf16.gmra.mrb[4].mxu1 %vm10073_vm0, %v1864_v34  ;;  %v1366_v32 = vpop.permute.xlu1 %1365  ;;  %vm10078_vm0 = vmmov %vm10075_vm6 }
 0x161   : > { %v1670_v7 = vsel %vm1642_vm13, %v1637_v10, %v1366_v32 }
 0x162   : > { %v1364_v24 = vpop.permute.xlu0 %1363 }
 0x163   : > { %v1668_v44 = vsel %vm1642_vm13, %v1635_v58, %v1364_v24  ;;  %v8097_v58 = vld [vmem:[%s9988_s2 + $0x1] ss:$0 sm:$0xff] }
 0x164   : > { %v1403_v46 = vpop.permute.xlu1 %1402 }
 0x165   : > { %v1703_v36 = vsel %vm1675_vm14, %v1670_v7, %v1403_v46 }
 0x166   : > { %v1401_v17 = vpop.permute.xlu0 %1400 }
 0x167   : > { %v1701_v48 = vsel %vm1675_vm14, %v1668_v44, %v1401_v17 }
 0x168   : > { %v1450_v43 = vpop.permute.xlu1 %1449 }
 0x169   : > { %v1736_v60 = vsel %vm1708_vm15, %v1703_v36, %v1450_v43 }
 0x16a   : > { %v1448_v47 = vpop.permute.xlu0 %1447 }
 0x16b   : > { %v1734_v20 = vsel %vm1708_vm15, %v1701_v48, %v1448_v47 }
 0x16c   : > { %v1485_v55 = vpop.permute.xlu1 %1484 }
 0x16d   : > { %v1769_v9 = vsel %vm1741_vm1, %v1736_v60, %v1485_v55 }
 0x16e   : > { %v1483_v61 = vpop.permute.xlu0 %1482 }
 0x16f   : > { %v1767_v50 = vsel %vm1741_vm1, %v1734_v20, %v1483_v61 }
 0x170   : > { %v1522_v57 = vpop.permute.xlu1 %1521 }
 0x171   : > { %v1802_v53 = vsel %vm1774_vm7, %v1769_v9, %v1522_v57 }
 0x172   : > { %v1520_v59 = vpop.permute.xlu0 %1519 }
 0x173   : > { %v1800_v27 = vsel %vm1774_vm7, %v1767_v50, %v1520_v59 }
 0x174   : > { %v1569_v63 = vpop.permute.xlu1 %1568 }
 0x175   : > { %v1835_v42 = vsel %vm10076_vm2, %v1802_v53, %v1569_v63 }
 0x176   : > { %v1567_v14 = vpop.permute.xlu0 %1566 }
 0x177   : > { %v1833_v1 = vsel %vm10074_vm3, %v1800_v27, %v1567_v14  ;;  %vm10079_vm3 = vmmov %vm10077_vm10  ;;  %v332_v14 = vld [vmem:[#allocation3 + $0x6c] sm:$0x1] }
 0x178   : > { %v1287_v11 = vpop.permute.xlu1 %1286 }
 0x179   : > { %v1639_v4 = vsel %vm1609_vm12, %v7776_v56, %v1287_v11 }
 0x17a   : > { %v1602_v6 = vpop.permute.xlu0 %1601 }
 0x17b   : > { %v1866_v15 = vsel %vm10075_vm6, %v1833_v1, %v1602_v6  ;;  %v333_v6 = vsel %vm7815_vm4, 0, %v332_v14  ;;  %vm10087_vm6 = vmmov %vm10078_vm0 }
 0x17c   : > { %6772 = vmatprep.mubr.msk.bf16.mxu1 %vm10077_vm10, %v1866_v15  ;;  %v1289_v18 = vpop.permute.xlu1 %1288  ;;  %334 = vst [vmem:[#allocation3 + $0x6c] sm:$0x1] %v333_v6 }
 0x17d   : > { %v1641_v12 = vsel %vm1609_vm12, %v7838_v49, %v1289_v18  ;;  %vm10080_vm12 = vmmov %vm10076_vm2 }
 0x17e   : > { %v1604_v38 = vpop.permute.xlu0 %1603 }
 0x17f   : > { %v1868_v8 = vsel %vm10078_vm0, %v1835_v42, %v1604_v38  ;;  %v387_v42 = vld [vmem:[#allocation3 + $0x74] sm:$0x1] }
 0x180   : > { %6773 = vmatmul.mubr.msk.bf16.gmra.mrb[8].mxu1 %vm10079_vm3, %v1868_v8  ;;  %v1370_v26 = vpop.permute.xlu1 %1369  ;;  %v388_v38 = vsel %vm7942_vm5, 0, %v387_v42 }
 0x181   : > { %v1674_v28 = vsel %vm1642_vm13, %v1641_v12, %v1370_v26  ;;  %389 = vst [vmem:[#allocation3 + $0x74] sm:$0x1] %v388_v38 }
 0x182   : > { %v1368_v25 = vpop.permute.xlu0 %1367 }
 0x183   : > { %v1672_v45 = vsel %vm1642_vm13, %v1639_v4, %v1368_v25  ;;  %v10092_v4 = vmov 0 }
 0x184   : > { %v1407_v13 = vpop.permute.xlu1 %1406 }
 0x185   : > { %v1707_v33 = vsel %vm1675_vm14, %v1674_v28, %v1407_v13 }
 0x186   : > { %v1405_v51 = vpop.permute.xlu0 %1404 }
 0x187   : > { %v1705_v37 = vsel %vm1675_vm14, %v1672_v45, %v1405_v51  ;;  %vm10082_vm14 = vmmov %vm10076_vm2  ;;  %v2664_v51 = vld [vmem:[#allocation3 + $0x18] sm:$0xf]  ;;  %v2657_v45 = vld [vmem:[#allocation3 + $0xc] sm:$0xf] }
 0x188   : > { %v1454_v29 = vpop.permute.xlu1 %1453  ;;  %vm10088_vm2 = vmmov %vm10079_vm3  ;;  %vm10091_vm3 = vcmask 60416  }
 0x189   : > { %v1740_v39 = vsel %vm1708_vm15, %v1707_v33, %v1454_v29  ;;  %vm10089_vm10 = vmmov %vm10088_vm2 }
 0x18a   : > { %v1452_v54 = vpop.permute.xlu0 %1451 }
 0x18b   : > { %v1738_v40 = vsel %vm1708_vm15, %v1705_v37, %v1452_v54 }
 0x18c   : > { %v1489_v49 = vpop.permute.xlu1 %1488 }
 0x18d   : > { %v1773_v34 = vsel %vm1741_vm1, %v1740_v39, %v1489_v49  ;;  %v2668_v49 = vld [vmem:[#allocation3 + $0x20] sm:$0x1] }
 0x18e   : > { %v1487_v56 = vpop.permute.xlu0 %1486 }
 0x18f   : > { %v1771_v32 = vsel %vm1741_vm1, %v1738_v40, %v1487_v56  ;;  %vm10085_vm1 = vmmov %vm10078_vm0  ;;  %vm10090_vm0 = vsmask.f32 7938 }
 0x190   : > { %v1526_v31 = vpop.permute.xlu1 %1525 }
 0x191   : > { %v1806_v16 = vsel %vm1774_vm7, %v1773_v34, %v1526_v31 }
 0x192   : > { %v1524_v24 = vpop.permute.xlu0 %1523 }
 0x193   : > { %v6750_v46 = vpop.f32.mrb[0].mxu0  ;;  %v1804_v47 = vsel %vm1774_vm7, %v1771_v32, %v1524_v24  ;;  %v2661_v24 = vld [vmem:[#allocation3 + $0x14] sm:$0x1] }
 0x194   : > { %v2139_v17 = vmul.f32 %v6750_v46, %v8090_v41  ;;  %v2005_v0 = vpop.f32.mrb[1].mxu0  ;;  %v1573_v43 = vpop.permute.xlu1 %1572 }
 0x195   : > { %v2137_v44 = vmul.f32 %v8090_v41, %v2005_v0  ;;  %v6751_v10 = vpop.f32.mrb[2].mxu0  ;;  %v1839_v57 = vsel %vm10080_vm12, %v1806_v16, %v1573_v43  ;;  %vm8139_vm12 = vmand %vm10091_vm3, %vm10090_vm0 }
 0x196   : > { %v2176_v48 = vadd.f32 %v8097_v58, %v2139_v17  ;;  %v2140_v55 = vmul.f32 %v6751_v10, %v8090_v41  ;;  %v2008_v7 = vpop.f32.mrb[3].mxu0  ;;  %v1571_v61 = vpop.permute.xlu0 %1570  ;;  %v10093_v4 = vsel %vm8139_vm12, 4294967295, %v10092_v4 }
 0x197   : > { %v2174_v20 = vadd.f32 %v8097_v58, %v2137_v44  ;;  %v2138_v36 = vmul.f32 %v8090_v41, %v2008_v7  ;;  %v1837_v60 = vsel %vm10082_vm14, %v1804_v47, %v1571_v61  ;;  %10094 = vst [vmem:[#allocation10_spill] sm:$0xff] %v10093_v4  ;;  %vm10095_vm14 = vmmov %vm10091_vm3  ;;  %v341_v7 = vld [vmem:[#allocation3 + $0x90] sm:$0x1] }
 0x198   : > { %v8108_v50 = vmax.f32 %v2176_v48, 0.0  ;;  %v2177_v59 = vadd.f32 %v8097_v58, %v2140_v55  ;;  %v1608_v63 = vpop.permute.xlu1 %1607 }
 0x199   : > { %v8112_v27 = vmax.f32 %v2174_v20, 0.0  ;;  %v2175_v9 = vadd.f32 %v8097_v58, %v2138_v36  ;;  %v1872_v2 = vsel %vm10085_vm1, %v1839_v57, %v1608_v63  ;;  %vm10096_vm1 = vmmov %vm10091_vm3  ;;  %v342_v20 = vsel %vm7815_vm4, 0, %v341_v7 }
 0x19a   : > { %10081 = vst [vmem:[#allocation6_spill] sm:$0xff] %v8108_v50  ;;  %v6566_v1 = vpack.c.bf16 %v8108_v50, %v8108_v50  ;;  %v8117_v11 = vmax.f32 %v2177_v59, 0.0  ;;  %v1606_v53 = vpop.permute.xlu0 %1605  ;;  %343 = vst [vmem:[#allocation3 + $0x90] sm:$0x1] %v342_v20 }
 0x19b   : > { %10083 = vst [vmem:[#allocation7_spill] sm:$0xff] %v8112_v27  ;;  %v6564_v35 = vpack.c.bf16 %v8112_v27, %v8112_v27  ;;  %v8124_v15 = vmax.f32 %v2175_v9, 0.0  ;;  %v1870_v52 = vsel %vm10087_vm6, %v1837_v60, %v1606_v53  ;;  %vm10101_vm6 = vmmov %vm10096_vm1 }
 0x19c   : > { %10084 = vst [vmem:[#allocation8_spill] sm:$0xff] %v8117_v11  ;;  %v2352_v18 = vshrl.u32 %v6566_v1, 16  ;;  %v6567_v23 = vpack.c.bf16 %v8117_v11, %v8117_v11  ;;  %6776 = vmatprep.mubr.msk.bf16.mxu1 %vm10088_vm2, %v1870_v52  ;;  %v2355_v13 = vshll.u32 %v6566_v1, 16  ;;  %vm10102_vm2 = vmmov %vm10096_vm1 }
 0x19d   : > { %10086 = vst [vmem:[#allocation9_spill] sm:$0xff] %v8124_v15  ;;  %v2335_v8 = vshrl.u32 %v6564_v35, 16  ;;  %v6565_v26 = vpack.c.bf16 %v8124_v15, %v8124_v15  ;;  %6777 = vmatmul.mubr.msk.bf16.gmra.mrb[12].mxu1 %vm10089_vm10, %v1872_v2  ;;  %v2338_v3 = vshll.u32 %v6564_v35, 16  ;;  %vm10107_vm10 = vmmov %vm10096_vm1 }
 0x19e   : > { %v2354_v25 = vrot.slane %v2352_v18, 7  ;;  %v2360_v12 = vshrl.u32 %v6567_v23, 16  ;;  %v2363_v33 = vshll.u32 %v6567_v23, 16  ;;  %vm10108_vm0 = vmmov %vm10096_vm1 }
 0x19f   : > { %v2337_v22 = vrot.slane %v2335_v8, 7  ;;  %v2343_v28 = vshrl.u32 %v6565_v26, 16  ;;  %v2346_v56 = vshll.u32 %v6565_v26, 16  ;;  %v2678_v8 = vld [vmem:[#allocation3 + $0x30] sm:$0xf]  ;;  %vm10113_vm3 = vmmov %vm10108_vm0 }
 0x1a0   : > { %v2357_v29 = vor.u32 %v2355_v13, %v2354_v25  ;;  %v2362_v54 = vrot.slane %v2360_v12, 7  ;;  %v2358_v40 = vrot.slane %v2354_v25, 4 }
 0x1a1   : > { %v2340_v37 = vor.u32 %v2338_v3, %v2337_v22  ;;  %v2345_v39 = vrot.slane %v2343_v28, 7  ;;  %v2341_v46 = vrot.slane %v2337_v22, 4  ;;  %v2671_v22 = vld [vmem:[#allocation3 + $0x24] sm:$0xf] }
 0x1a2   : > { %v2665_v31 = vsel %vm8139_vm12, %v2357_v29, %v2664_v51  ;;  %v2365_v34 = vor.u32 %v2363_v33, %v2362_v54  ;;  %v2367_v32 = vrot.slane %v2362_v54, 4  ;;  %v338_v33 = vld [vmem:[#allocation3 + $0x84] sm:$0x1] }
 0x1a3   : > { %2666 = vst [vmem:[#allocation3 + $0x18] sm:$0xf] %v2665_v31  ;;  %v2658_v17 = vsel %vm8139_vm12, %v2340_v37, %v2657_v45  ;;  %v2348_v0 = vor.u32 %v2346_v56, %v2345_v39  ;;  %v2350_v16 = vrot.slane %v2345_v39, 4  ;;  %v2682_v56 = vld [vmem:[#allocation3 + $0x38] sm:$0x1] }
 0x1a4   : > { %2659 = vst [vmem:[#allocation3 + $0xc] sm:$0xf] %v2658_v17  ;;  %v2366_v43 = vsel %vm7186_vm9, %v2358_v40, %v2365_v34  ;;  %v2669_v44 = vsel %vm7815_vm4, %v2367_v32, %v2668_v49  ;;  %v339_v40 = vsel %vm7815_vm4, 0, %v338_v33 }
 0x1a5   : > { %2667 = vst.msk [vmem:[#allocation3 + $0x1c] sm:$0xf] %vm10095_vm14, %v2366_v43  ;;  %2670 = vst [vmem:[#allocation3 + $0x20] sm:$0x1] %v2669_v44  ;;  %v2349_v10 = vsel %vm7186_vm9, %v2341_v46, %v2348_v0  ;;  %v2662_v47 = vsel %vm7815_vm4, %v2350_v16, %v2661_v24  ;;  %v396_v24 = vld [vmem:[#allocation3 + $0x98] sm:$0x1] }
 0x1a6   : > { %2660 = vst.msk [vmem:[#allocation3 + $0x10] sm:$0xf] %vm10096_vm1, %v2349_v10  ;;  %2663 = vst [vmem:[#allocation3 + $0x14] sm:$0x1] %v2662_v47  ;;  %v393_v46 = vld [vmem:[#allocation3 + $0x8c] sm:$0x1] }
 0x1a7   : > { %340 = vst [vmem:[#allocation3 + $0x84] sm:$0x1] %v339_v40  ;;  %v2675_v43 = vld [vmem:[#allocation3 + $0x2c] sm:$0x1]  ;;  %v397_v44 = vsel %vm7942_vm5, 0, %v396_v24  ;;  %vm10114_vm14 = vmmov %vm10108_vm0 }
 0x1a8   : > { %398 = vst [vmem:[#allocation3 + $0x98] sm:$0x1] %v397_v44  ;;  %vm10119_vm1 = vmmov %vm10108_vm0 }
 0x1ac   : > { %v8157_v48 = vld [vmem:[#allocation3 + $0x18] sm:$0xff]  }
 0x1ad   : > { %3262 = vrot.lane.b32.xlu1 %v8157_v48, %s7084_s28  ;;  %3379 = vrot.lane.b32.xlu0 %v8157_v48, %s7090_s22  ;;  %v8163_v55 = vld [vmem:[#allocation3 + $0xc] sm:$0xff]  }
 0x1b1   : > { %3260 = vrot.lane.b32.xlu0 %v8163_v55, %s7084_s28 }
 0x1b3   : > { %v6754_v61 = vpop.f32.mrb[4].mxu0 }
 0x1b4   : > { %v2143_v36 = vmul.f32 %v6754_v61, %v8090_v41  ;;  %v2021_v57 = vpop.f32.mrb[5].mxu0  ;;  %v394_v61 = vsel %vm7942_vm5, 0, %v393_v46  ;;  %v2696_v46 = vld [vmem:[#allocation3 + $0x50] sm:$0x1] }
 0x1b5   : > { %v2141_v59 = vmul.f32 %v8090_v41, %v2021_v57  ;;  %v6755_v60 = vpop.f32.mrb[6].mxu0  ;;  %395 = vst [vmem:[#allocation3 + $0x8c] sm:$0x1] %v394_v61 }
 0x1b6   : > { %v2180_v63 = vadd.f32 %v8097_v58, %v2143_v36  ;;  %v2144_v9 = vmul.f32 %v6755_v60, %v8090_v41  ;;  %v2024_v14 = vpop.f32.mrb[7].mxu0 }
 0x1b7   : > { %v2178_v1 = vadd.f32 %v8097_v58, %v2141_v59  ;;  %v2142_v53 = vmul.f32 %v8090_v41, %v2024_v14 }
 0x1b8   : > { %v8175_v2 = vmax.f32 %v2180_v63, 0.0  ;;  %v2181_v6 = vadd.f32 %v8097_v58, %v2144_v9 }
 0x1b9   : > { %v8178_v21 = vmax.f32 %v2178_v1, 0.0  ;;  %v2179_v35 = vadd.f32 %v8097_v58, %v2142_v53 }
 0x1ba   : > { %10097 = vst [vmem:[#allocation11_spill] sm:$0xff] %v8175_v2  ;;  %v6570_v52 = vpack.c.bf16 %v8175_v2, %v8175_v2  ;;  %v8183_v5 = vmax.f32 %v2181_v6, 0.0 }
 0x1bb   : > { %10098 = vst [vmem:[#allocation12_spill] sm:$0xff] %v8178_v21  ;;  %v6568_v42 = vpack.c.bf16 %v8178_v21, %v8178_v21  ;;  %v8187_v18 = vmax.f32 %v2179_v35, 0.0 }
 0x1bc   : > { %10099 = vst [vmem:[#allocation13_spill] sm:$0xff] %v8183_v5  ;;  %v2386_v23 = vshrl.u32 %v6570_v52, 16  ;;  %v6571_v38 = vpack.c.bf16 %v8183_v5, %v8183_v5  ;;  %v2389_v12 = vshll.u32 %v6570_v52, 16 }
 0x1bd   : > { %10100 = vst [vmem:[#allocation14_spill] sm:$0xff] %v8187_v18  ;;  %v2369_v26 = vshrl.u32 %v6568_v42, 16  ;;  %v6569_v25 = vpack.c.bf16 %v8187_v18, %v8187_v18  ;;  %v2372_v51 = vshll.u32 %v6568_v42, 16 }
 0x1be   : > { %v2388_v13 = vrot.slane %v2386_v23, 7  ;;  %v2394_v3 = vshrl.u32 %v6571_v38, 16  ;;  %v2397_v29 = vshll.u32 %v6571_v38, 16 }
 0x1bf   : > { %v2371_v28 = vrot.slane %v2369_v26, 7  ;;  %v2377_v45 = vshrl.u32 %v6569_v25, 16  ;;  %v2380_v54 = vshll.u32 %v6569_v25, 16 }
 0x1c0   : > { %v2391_v37 = vor.u32 %v2389_v12, %v2388_v13  ;;  %v2392_v49 = vrot.slane %v2388_v13, 4  ;;  %v2396_v39 = vrot.slane %v2394_v3, 7 }
 0x1c1   : > { %v2374_v31 = vor.u32 %v2372_v51, %v2371_v28  ;;  %v2375_v34 = vrot.slane %v2371_v28, 4  ;;  %v2379_v32 = vrot.slane %v2377_v45, 7 }
 0x1c2   : > { %v2679_v17 = vsel %vm8139_vm12, %v2391_v37, %v2678_v8  ;;  %v2399_v0 = vor.u32 %v2397_v29, %v2396_v39  ;;  %v2401_v16 = vrot.slane %v2396_v39, 4  ;;  %v2692_v37 = vld [vmem:[#allocation3 + $0x48] sm:$0xf] }
 0x1c3   : > { %2680 = vst [vmem:[#allocation3 + $0x30] sm:$0xf] %v2679_v17  ;;  %v2672_v10 = vsel %vm8139_vm12, %v2374_v31, %v2671_v22  ;;  %v2382_v47 = vor.u32 %v2380_v54, %v2379_v32  ;;  %v2384_v7 = vrot.slane %v2379_v32, 4  ;;  %v2685_v31 = vld [vmem:[#allocation3 + $0x3c] sm:$0xf] }
 0x1c4   : > { %2673 = vst [vmem:[#allocation3 + $0x24] sm:$0xf] %v2672_v10  ;;  %v2400_v20 = vsel %vm7186_vm9, %v2392_v49, %v2399_v0  ;;  %v2683_v36 = vsel %vm7815_vm4, %v2401_v16, %v2682_v56 }
 0x1c5   : > { %2681 = vst.msk [vmem:[#allocation3 + $0x34] sm:$0xf] %vm10101_vm6, %v2400_v20  ;;  %2684 = vst [vmem:[#allocation3 + $0x38] sm:$0x1] %v2683_v36  ;;  %v2383_v57 = vsel %vm7186_vm9, %v2375_v34, %v2382_v47  ;;  %v2676_v59 = vsel %vm7815_vm4, %v2384_v7, %v2675_v43  ;;  %v2689_v47 = vld [vmem:[#allocation3 + $0x44] sm:$0x1] }
 0x1c6   : > { %2674 = vst.msk [vmem:[#allocation3 + $0x28] sm:$0xf] %vm10102_vm2, %v2383_v57  ;;  %2677 = vst [vmem:[#allocation3 + $0x2c] sm:$0x1] %v2676_v59 }
 0x1c7   : > { %vm10120_vm6 = vmmov %vm10108_vm0 }
 0x1c8   : > { %vm10125_vm2 = vmmov %vm10108_vm0 }
 0x1d3   : > { %v6758_v60 = vpop.f32.mrb[8].mxu0 }
 0x1d4   : > { %v2147_v63 = vmul.f32 %v6758_v60, %v8090_v41  ;;  %v2037_v9 = vpop.f32.mrb[9].mxu0 }
 0x1d5   : > { %v2145_v14 = vmul.f32 %v8090_v41, %v2037_v9  ;;  %v6759_v1 = vpop.f32.mrb[10].mxu0 }
 0x1d6   : > { %v2184_v53 = vadd.f32 %v8097_v58, %v2147_v63  ;;  %v2148_v6 = vmul.f32 %v6759_v1, %v8090_v41  ;;  %v2040_v35 = vpop.f32.mrb[11].mxu0 }
 0x1d7   : > { %v2182_v52 = vadd.f32 %v8097_v58, %v2145_v14  ;;  %v2146_v42 = vmul.f32 %v8090_v41, %v2040_v35 }
 0x1d8   : > { %v8219_v23 = vmax.f32 %v2184_v53, 0.0  ;;  %v2185_v38 = vadd.f32 %v8097_v58, %v2148_v6 }
 0x1d9   : > { %v8222_v8 = vmax.f32 %v2182_v52, 0.0  ;;  %v2183_v26 = vadd.f32 %v8097_v58, %v2146_v42 }
 0x1da   : > { %10103 = vst [vmem:[#allocation15_spill] sm:$0xff] %v8219_v23  ;;  %v6574_v25 = vpack.c.bf16 %v8219_v23, %v8219_v23  ;;  %v8227_v13 = vmax.f32 %v2185_v38, 0.0 }
 0x1db   : > { %10104 = vst [vmem:[#allocation16_spill] sm:$0xff] %v8222_v8  ;;  %v6572_v12 = vpack.c.bf16 %v8222_v8, %v8222_v8  ;;  %v8231_v51 = vmax.f32 %v2183_v26, 0.0 }
 0x1dc   : > { %10105 = vst [vmem:[#allocation17_spill] sm:$0xff] %v8227_v13  ;;  %v2420_v22 = vshrl.u32 %v6574_v25, 16  ;;  %v6575_v3 = vpack.c.bf16 %v8227_v13, %v8227_v13  ;;  %v2423_v54 = vshll.u32 %v6574_v25, 16 }
 0x1dd   : > { %10106 = vst [vmem:[#allocation18_spill] sm:$0xff] %v8231_v51  ;;  %v2403_v28 = vshrl.u32 %v6572_v12, 16  ;;  %v6573_v29 = vpack.c.bf16 %v8231_v51, %v8231_v51  ;;  %v2406_v39 = vshll.u32 %v6572_v12, 16 }
 0x1de   : > { %v2422_v45 = vrot.slane %v2420_v22, 7  ;;  %v2428_v33 = vshrl.u32 %v6575_v3, 16  ;;  %v2431_v32 = vshll.u32 %v6575_v3, 16 }
 0x1df   : > { %v2405_v49 = vrot.slane %v2403_v28, 7  ;;  %v2411_v56 = vshrl.u32 %v6573_v29, 16  ;;  %v2414_v0 = vshll.u32 %v6573_v29, 16 }
 0x1e0   : > { %v2425_v40 = vor.u32 %v2423_v54, %v2422_v45  ;;  %v2430_v34 = vrot.slane %v2428_v33, 7  ;;  %v2426_v16 = vrot.slane %v2422_v45, 4 }
 0x1e1   : > { %v2408_v24 = vor.u32 %v2406_v39, %v2405_v49  ;;  %v2413_v17 = vrot.slane %v2411_v56, 7  ;;  %v2409_v7 = vrot.slane %v2405_v49, 4 }
 0x1e2   : > { %v2693_v43 = vsel %vm8139_vm12, %v2425_v40, %v2692_v37  ;;  %v2433_v44 = vor.u32 %v2431_v32, %v2430_v34  ;;  %v2435_v10 = vrot.slane %v2430_v34, 4  ;;  %v2706_v34 = vld [vmem:[#allocation3 + $0x60] sm:$0xf] }
 0x1e3   : > { %2694 = vst [vmem:[#allocation3 + $0x48] sm:$0xf] %v2693_v43  ;;  %v2686_v61 = vsel %vm8139_vm12, %v2408_v24, %v2685_v31  ;;  %v2416_v20 = vor.u32 %v2414_v0, %v2413_v17  ;;  %v2418_v36 = vrot.slane %v2413_v17, 4  ;;  %v2699_v0 = vld [vmem:[#allocation3 + $0x54] sm:$0xf] }
 0x1e4   : > { %2687 = vst [vmem:[#allocation3 + $0x3c] sm:$0xf] %v2686_v61  ;;  %v2434_v57 = vsel %vm7186_vm9, %v2426_v16, %v2433_v44  ;;  %v2697_v59 = vsel %vm7815_vm4, %v2435_v10, %v2696_v46  ;;  %v2710_v10 = vld [vmem:[#allocation3 + $0x68] sm:$0x1] }
 0x1e5   : > { %2695 = vst.msk [vmem:[#allocation3 + $0x4c] sm:$0xf] %vm10107_vm10, %v2434_v57  ;;  %2698 = vst [vmem:[#allocation3 + $0x50] sm:$0x1] %v2697_v59  ;;  %v2417_v60 = vsel %vm7186_vm9, %v2409_v7, %v2416_v20  ;;  %v2690_v63 = vsel %vm7815_vm4, %v2418_v36, %v2689_v47  ;;  %v2703_v59 = vld [vmem:[#allocation3 + $0x5c] sm:$0x1] }
 0x1e6   : > { %2688 = vst.msk [vmem:[#allocation3 + $0x40] sm:$0xf] %vm10108_vm0, %v2417_v60  ;;  %2691 = vst [vmem:[#allocation3 + $0x44] sm:$0x1] %v2690_v63 }
 0x1e7   : > { %vm10126_vm10 = vmmov %vm10108_vm0 }
 0x1f3   : > { %v6762_v9 = vpop.f32.mrb[12].mxu0 }
 0x1f4   : > { %v2151_v14 = vmul.f32 %v6762_v9, %v8090_v41  ;;  %v2053_v1 = vpop.f32.mrb[13].mxu0 }
 0x1f5   : > { %v2149_v53 = vmul.f32 %v8090_v41, %v2053_v1  ;;  %v6763_v6 = vpop.f32.mrb[14].mxu0 }
 0x1f6   : > { %v2188_v35 = vadd.f32 %v8097_v58, %v2151_v14  ;;  %v2152_v52 = vmul.f32 %v6763_v6, %v8090_v41  ;;  %v2056_v42 = vpop.f32.mrb[15].mxu0 }
 0x1f7   : > { %v2186_v38 = vadd.f32 %v8097_v58, %v2149_v53  ;;  %v2150_v26 = vmul.f32 %v8090_v41, %v2056_v42 }
 0x1f8   : > { %v8257_v25 = vmax.f32 %v2188_v35, 0.0  ;;  %v2189_v12 = vadd.f32 %v8097_v58, %v2152_v52 }
 0x1f9   : > { %v8260_v22 = vmax.f32 %v2186_v38, 0.0  ;;  %v2187_v3 = vadd.f32 %v8097_v58, %v2150_v26 }
 0x1fa   : > { %10109 = vst [vmem:[#allocation19_spill] sm:$0xff] %v8257_v25  ;;  %v6578_v28 = vpack.c.bf16 %v8257_v25, %v8257_v25  ;;  %v8265_v29 = vmax.f32 %v2189_v12, 0.0 }
 0x1fb   : > { %10110 = vst [vmem:[#allocation20_spill] sm:$0xff] %v8260_v22  ;;  %v6576_v45 = vpack.c.bf16 %v8260_v22, %v8260_v22  ;;  %v8269_v54 = vmax.f32 %v2187_v3, 0.0 }
 0x1fc   : > { %10111 = vst [vmem:[#allocation21_spill] sm:$0xff] %v8265_v29  ;;  %v2454_v33 = vshrl.u32 %v6578_v28, 16  ;;  %v6579_v37 = vpack.c.bf16 %v8265_v29, %v8265_v29  ;;  %v2457_v40 = vshll.u32 %v6578_v28, 16 }
 0x1fd   : > { %10112 = vst [vmem:[#allocation22_spill] sm:$0xff] %v8269_v54  ;;  %v2437_v49 = vshrl.u32 %v6576_v45, 16  ;;  %v6577_v39 = vpack.c.bf16 %v8269_v54, %v8269_v54  ;;  %v2440_v24 = vshll.u32 %v6576_v45, 16  ;;  %v7055_v54 = vld [vmem:[#allocation3] sm:$0xff]  }
 0x1fe   : > { %v2456_v56 = vrot.slane %v2454_v33, 7  ;;  %v2462_v31 = vshrl.u32 %v6579_v37, 16  ;;  %v2465_v43 = vshll.u32 %v6579_v37, 16 }
 0x1ff   : > { %v2439_v32 = vrot.slane %v2437_v49, 7  ;;  %v2445_v46 = vshrl.u32 %v6577_v39, 16  ;;  %v2448_v7 = vshll.u32 %v6577_v39, 16 }
 0x200   : > { %v2459_v17 = vor.u32 %v2457_v40, %v2456_v56  ;;  %v2464_v16 = vrot.slane %v2462_v31, 7  ;;  %v2460_v61 = vrot.slane %v2456_v56, 4 }
 0x201   : > { %v2442_v44 = vor.u32 %v2440_v24, %v2439_v32  ;;  %v2447_v47 = vrot.slane %v2445_v46, 7  ;;  %v2443_v60 = vrot.slane %v2439_v32, 4 }
 0x202   : > { %v2707_v20 = vsel %vm8139_vm12, %v2459_v17, %v2706_v34  ;;  %v2467_v36 = vor.u32 %v2465_v43, %v2464_v16  ;;  %v2469_v57 = vrot.slane %v2464_v16, 4 }
 0x203   : > { %2708 = vst [vmem:[#allocation3 + $0x60] sm:$0xf] %v2707_v20  ;;  %v2700_v63 = vsel %vm8139_vm12, %v2442_v44, %v2699_v0  ;;  %v2450_v9 = vor.u32 %v2448_v7, %v2447_v47  ;;  %v2452_v14 = vrot.slane %v2447_v47, 4  ;;  %v2720_v47 = vld [vmem:[#allocation3 + $0x78] sm:$0xf] }
 0x204   : > { %2701 = vst [vmem:[#allocation3 + $0x54] sm:$0xf] %v2700_v63  ;;  %v2468_v1 = vsel %vm7186_vm9, %v2460_v61, %v2467_v36  ;;  %v2711_v53 = vsel %vm7815_vm4, %v2469_v57, %v2710_v10  ;;  %v2713_v57 = vld [vmem:[#allocation3 + $0x6c] sm:$0xf] }
 0x205   : > { %2709 = vst.msk [vmem:[#allocation3 + $0x64] sm:$0xf] %vm10113_vm3, %v2468_v1  ;;  %2712 = vst [vmem:[#allocation3 + $0x68] sm:$0x1] %v2711_v53  ;;  %v2451_v6 = vsel %vm7186_vm9, %v2443_v60, %v2450_v9  ;;  %v2704_v35 = vsel %vm7815_vm4, %v2452_v14, %v2703_v59  ;;  %v2724_v9 = vld [vmem:[#allocation3 + $0x80] sm:$0x1] }
 0x206   : > { %2702 = vst.msk [vmem:[#allocation3 + $0x58] sm:$0xf] %vm10114_vm14, %v2451_v6  ;;  %2705 = vst [vmem:[#allocation3 + $0x5c] sm:$0x1] %v2704_v35 }
 0x207   : > { %vm10131_vm3 = vmmov %vm10108_vm0 }
 0x208   : > { %vm10136_vm14 = vmmov %vm10108_vm0 }
 0x213   : > { %v6766_v52 = vpop.f32.mrb[0].mxu1 }
 0x214   : > { %v2155_v42 = vmul.f32 %v6766_v52, %v8090_v41  ;;  %v2069_v38 = vpop.f32.mrb[1].mxu1 }
 0x215   : > { %v2153_v26 = vmul.f32 %v8090_v41, %v2069_v38  ;;  %v6767_v12 = vpop.f32.mrb[2].mxu1 }
 0x216   : > { %v2192_v3 = vadd.f32 %v8097_v58, %v2155_v42  ;;  %v2156_v28 = vmul.f32 %v6767_v12, %v8090_v41  ;;  %v2072_v45 = vpop.f32.mrb[3].mxu1  ;;  %v2717_v42 = vld [vmem:[#allocation3 + $0x74] sm:$0x1] }
 0x217   : > { %v2190_v33 = vadd.f32 %v8097_v58, %v2153_v26  ;;  %v2154_v37 = vmul.f32 %v8090_v41, %v2072_v45 }
 0x218   : > { %v8295_v49 = vmax.f32 %v2192_v3, 0.0  ;;  %v2193_v39 = vadd.f32 %v8097_v58, %v2156_v28 }
 0x219   : > { %v8298_v56 = vmax.f32 %v2190_v33, 0.0  ;;  %v2191_v40 = vadd.f32 %v8097_v58, %v2154_v37 }
 0x21a   : > { %10115 = vst [vmem:[#allocation23_spill] sm:$0xff] %v8295_v49  ;;  %v6582_v31 = vpack.c.bf16 %v8295_v49, %v8295_v49  ;;  %v8303_v34 = vmax.f32 %v2193_v39, 0.0 }
 0x21b   : > { %10116 = vst [vmem:[#allocation24_spill] sm:$0xff] %v8298_v56  ;;  %v6580_v32 = vpack.c.bf16 %v8298_v56, %v8298_v56  ;;  %v8307_v24 = vmax.f32 %v2191_v40, 0.0  ;;  %v8329_v40 = vld [vmem:[#allocation3 + $0x20] ss:$0 sps:$4 sm:$0x11]  }
 0x21c   : > { %10117 = vst [vmem:[#allocation25_spill] sm:$0xff] %v8303_v34  ;;  %v2488_v46 = vshrl.u32 %v6582_v31, 16  ;;  %v6583_v17 = vpack.c.bf16 %v8303_v34, %v8303_v34  ;;  %v2491_v44 = vshll.u32 %v6582_v31, 16 }
 0x21d   : > { %10118 = vst [vmem:[#allocation26_spill] sm:$0xff] %v8307_v24  ;;  %v2471_v0 = vshrl.u32 %v6580_v32, 16  ;;  %v6581_v16 = vpack.c.bf16 %v8307_v24, %v8307_v24  ;;  %v2474_v61 = vshll.u32 %v6580_v32, 16  ;;  %v8337_v32 = vld [vmem:[#allocation3 + $0x14] ss:$0 sps:$4 sm:$0x11]  }
 0x21e   : > { %v2490_v43 = vrot.slane %v2488_v46, 7  ;;  %v2496_v10 = vshrl.u32 %v6583_v17, 16  ;;  %v2499_v60 = vshll.u32 %v6583_v17, 16  ;;  %v3181_v46 = vrot.slane %v8157_v48, 1 }
 0x21f   : > { %v2473_v7 = vrot.slane %v2471_v0, 7  ;;  %v2479_v20 = vshrl.u32 %v6581_v16, 16  ;;  %v2482_v1 = vshll.u32 %v6581_v16, 16  ;;  %v3182_v17 = vrot.slane %v8329_v40, 1 }
 0x220   : > { %v2493_v36 = vor.u32 %v2491_v44, %v2490_v43  ;;  %v2498_v59 = vrot.slane %v2496_v10, 7  ;;  %v2494_v53 = vrot.slane %v2490_v43, 4  ;;  %v3178_v44 = vrot.slane %v8163_v55, 1 }
 0x221   : > { %v2476_v63 = vor.u32 %v2474_v61, %v2473_v7  ;;  %v2481_v14 = vrot.slane %v2479_v20, 7  ;;  %v2477_v38 = vrot.slane %v2473_v7, 4  ;;  %v3179_v10 = vrot.slane %v8337_v32, 1 }
 0x222   : > { %v2721_v6 = vsel %vm8139_vm12, %v2493_v36, %v2720_v47  ;;  %v2501_v35 = vor.u32 %v2499_v60, %v2498_v59  ;;  %v2503_v52 = vrot.slane %v2498_v59, 4  ;;  %v3183_v47 = vsel %vm1290_vm8, %v3181_v46, %v3182_v17 }
 0x223   : > { %2722 = vst [vmem:[#allocation3 + $0x78] sm:$0xf] %v2721_v6  ;;  %v2714_v26 = vsel %vm8139_vm12, %v2476_v63, %v2713_v57  ;;  %v2484_v12 = vor.u32 %v2482_v1, %v2481_v14  ;;  %v2486_v3 = vrot.slane %v2481_v14, 4  ;;  %v2978_v60 = vshll.u32 %v8157_v48, 16 }
 0x224   : > { %2715 = vst [vmem:[#allocation3 + $0x6c] sm:$0xf] %v2714_v26  ;;  %v2502_v28 = vsel %vm7186_vm9, %v2494_v53, %v2501_v35  ;;  %v2725_v45 = vsel %vm7815_vm4, %v2503_v52, %v2724_v9  ;;  %v3180_v53 = vsel %vm1290_vm8, %v3178_v44, %v3179_v10  ;;  %v2976_v35 = vshrl.u32 %v8157_v48, 16  ;;  %v2734_v44 = vld [vmem:[#allocation3 + $0x90] sm:$0xf] }
 0x225   : > { %2723 = vst.msk [vmem:[#allocation3 + $0x7c] sm:$0xf] %vm10119_vm1, %v2502_v28  ;;  %2726 = vst [vmem:[#allocation3 + $0x80] sm:$0x1] %v2725_v45  ;;  %v2485_v33 = vsel %vm7186_vm9, %v2477_v38, %v2484_v12  ;;  %v2718_v37 = vsel %vm7815_vm4, %v2486_v3, %v2717_v42  ;;  %v2980_v28 = vrot.slane %v2978_v60, 1  ;;  %v2983_v48 = vshll.u32 %v8329_v40, 16 }
 0x226   : > { %2716 = vst.msk [vmem:[#allocation3 + $0x70] sm:$0xf] %vm10120_vm6, %v2485_v33  ;;  %2719 = vst [vmem:[#allocation3 + $0x74] sm:$0x1] %v2718_v37  ;;  %v2966_v46 = vshll.u32 %v8163_v55, 16  ;;  %vm3621_vm6 = vcmask 326656  }
 0x227   : > { %v347_v60 = vld [vmem:[#allocation3 + $0xa8] sm:$0x1]  ;;  %vm10137_vm1 = vmmov %vm10108_vm0 }
 0x22c   : > { %v8327_v39 = vld [vmem:[#allocation3 + $0x78] sm:$0xff]   ;;  %v8350_v20 = vld [vmem:[#allocation3 + $0x80] ss:$0 sps:$4 sm:$0x11]  }
 0x22d   : > { %3395 = vrot.lane.b32.xlu0 %v8327_v39, %s7090_s22  ;;  %3278 = vrot.lane.b32.xlu1 %v8327_v39, %s7084_s28  ;;  %v8335_v31 = vld [vmem:[#allocation3 + $0x6c] sm:$0xff]   ;;  %v8363_v6 = vld [vmem:[#allocation3 + $0x74] ss:$0 sps:$4 sm:$0x11]   ;;  %v3205_v38 = vrot.slane %v8327_v39, 1  ;;  %v3206_v26 = vrot.slane %v8350_v20, 1 }
 0x22e   : > { %v3202_v37 = vrot.slane %v8335_v31, 1 }
 0x231   : > { %3276 = vrot.lane.b32.xlu0 %v8335_v31, %s7084_s28  ;;  %3393 = vrot.lane.b32.xlu1 %v8335_v31, %s7090_s22 }
 0x233   : > { %v6770_v0 = vpop.f32.mrb[4].mxu1 }
 0x234   : > { %v2159_v16 = vmul.f32 %v6770_v0, %v8090_v41  ;;  %v2085_v43 = vpop.f32.mrb[5].mxu1 }
 0x235   : > { %v2157_v7 = vmul.f32 %v8090_v41, %v2085_v43  ;;  %v6771_v61 = vpop.f32.mrb[6].mxu1  ;;  %3461 = vrot.lane.b32.xlu0 %v3183_v47, %s7091_s23  ;;  %3344 = vrot.lane.b32.xlu1 %v3183_v47, %s7092_s25  ;;  %v3203_v43 = vrot.slane %v8363_v6, 1 }
 0x236   : > { %v2196_v36 = vadd.f32 %v8097_v58, %v2159_v16  ;;  %v2160_v57 = vmul.f32 %v6771_v61, %v8090_v41  ;;  %v2088_v59 = vpop.f32.mrb[7].mxu1 }
 0x237   : > { %v2194_v63 = vadd.f32 %v8097_v58, %v2157_v7  ;;  %v2158_v9 = vmul.f32 %v8090_v41, %v2088_v59  ;;  %v3207_v7 = vsel %vm1290_vm8, %v3205_v38, %v3206_v26  ;;  %v2981_v59 = vor.u32 %v2980_v28, %v2976_v35 }
 0x238   : > { %v8359_v14 = vmax.f32 %v2196_v36, 0.0  ;;  %v2197_v1 = vadd.f32 %v8097_v58, %v2160_v57  ;;  %v3204_v28 = vsel %vm1290_vm8, %v3202_v37, %v3203_v43  ;;  %v399_v37 = vld [vmem:[#allocation3 + $0xa4] sm:$0x1] }
 0x239   : > { %v8366_v52 = vmax.f32 %v2194_v63, 0.0  ;;  %v2195_v42 = vadd.f32 %v8097_v58, %v2158_v9  ;;  %3227 = vrot.lane.b32.xlu0 %v3183_v47, %s7088_s16  ;;  %3225 = vrot.lane.b32.xlu1 %v3180_v53, %s7088_s16 }
 0x23a   : > { %10121 = vst [vmem:[#allocation27_spill] sm:$0xff] %v8359_v14  ;;  %v6586_v12 = vpack.c.bf16 %v8359_v14, %v8359_v14  ;;  %v8373_v3 = vmax.f32 %v2197_v1, 0.0 }
 0x23b   : > { %10122 = vst [vmem:[#allocation28_spill] sm:$0xff] %v8366_v52  ;;  %v6584_v45 = vpack.c.bf16 %v8366_v52, %v8366_v52  ;;  %v8380_v33 = vmax.f32 %v2195_v42, 0.0  ;;  %v348_v42 = vsel %vm7815_vm4, 0, %v347_v60 }
 0x23c   : > { %10123 = vst [vmem:[#allocation29_spill] sm:$0xff] %v8373_v3  ;;  %v2522_v17 = vshrl.u32 %v6586_v12, 16  ;;  %v2525_v0 = vshll.u32 %v6586_v12, 16  ;;  %v6587_v16 = vpack.c.bf16 %v8373_v3, %v8373_v3  ;;  %v344_v12 = vld [vmem:[#allocation3 + $0x9c] sm:$0x1] }
 0x23d   : > { %10124 = vst [vmem:[#allocation30_spill] sm:$0xff] %v8380_v33  ;;  %v2505_v10 = vshrl.u32 %v6584_v45, 16  ;;  %v2508_v47 = vshll.u32 %v6584_v45, 16  ;;  %v6585_v40 = vpack.c.bf16 %v8380_v33, %v8380_v33  ;;  %3342 = vrot.lane.b32.xlu0 %v3180_v53, %s7092_s25  ;;  %3360 = vrot.lane.b32.xlu1 %v3207_v7, %s7092_s25  ;;  %v2727_v3 = vld [vmem:[#allocation3 + $0x84] sm:$0xf]  ;;  %v345_v26 = vsel %vm7815_vm4, 0, %v344_v12 }
 0x23e   : > { %v2524_v61 = vrot.slane %v2522_v17, 7  ;;  %v2530_v36 = vshrl.u32 %v6587_v16, 16  ;;  %v2533_v57 = vshll.u32 %v6587_v16, 16  ;;  %349 = vst [vmem:[#allocation3 + $0xa8] sm:$0x1] %v348_v42  ;;  %v400_v42 = vsel %vm7942_vm5, 0, %v399_v37 }
 0x23f   : > { %v2507_v63 = vrot.slane %v2505_v10, 7  ;;  %v2513_v9 = vshrl.u32 %v6585_v40, 16  ;;  %v2516_v1 = vshll.u32 %v6585_v40, 16  ;;  %v2738_v16 = vld [vmem:[#allocation3 + $0x98] sm:$0x1]  ;;  %v2964_v12 = vshrl.u32 %v8163_v55, 16 }
 0x240   : > { %v2527_v45 = vor.u32 %v2525_v0, %v2524_v61  ;;  %v2528_v33 = vrot.slane %v2524_v61, 4  ;;  %v2532_v38 = vrot.slane %v2530_v36, 7  ;;  %346 = vst [vmem:[#allocation3 + $0x9c] sm:$0x1] %v345_v26  ;;  %v2731_v0 = vld [vmem:[#allocation3 + $0x8c] sm:$0x1] }
 0x241   : > { %v2510_v53 = vor.u32 %v2508_v47, %v2507_v63  ;;  %v2511_v17 = vrot.slane %v2507_v63, 4  ;;  %v2515_v35 = vrot.slane %v2513_v9, 7  ;;  %3477 = vrot.lane.b32.xlu0 %v3207_v7, %s7091_s23  ;;  %3241 = vrot.lane.b32.xlu1 %v3204_v28, %s7088_s16  ;;  %v2985_v63 = vrot.slane %v2983_v48, 1  ;;  %v402_v9 = vld [vmem:[#allocation3 + $0xb0] sm:$0x1] }
 0x242   : > { %v2735_v10 = vsel %vm8139_vm12, %v2527_v45, %v2734_v44  ;;  %v2535_v40 = vor.u32 %v2533_v57, %v2532_v38  ;;  %v2537_v60 = vrot.slane %v2532_v38, 4  ;;  %v403_v57 = vsel %vm7942_vm5, 0, %v402_v9  ;;  %401 = vst [vmem:[#allocation3 + $0xa4] sm:$0x1] %v400_v42 }
 0x243   : > { %2736 = vst [vmem:[#allocation3 + $0x90] sm:$0xf] %v2735_v10  ;;  %v2728_v47 = vsel %vm8139_vm12, %v2510_v53, %v2727_v3  ;;  %v2518_v61 = vor.u32 %v2516_v1, %v2515_v35  ;;  %v2520_v36 = vrot.slane %v2515_v35, 4  ;;  %v2968_v1 = vrot.slane %v2966_v46, 1  ;;  %404 = vst [vmem:[#allocation3 + $0xb0] sm:$0x1] %v403_v57 }
 0x244   : > { %2729 = vst [vmem:[#allocation3 + $0x84] sm:$0xf] %v2728_v47  ;;  %v2536_v43 = vsel %vm7186_vm9, %v2528_v33, %v2535_v40  ;;  %v2739_v44 = vsel %vm7815_vm4, %v2537_v60, %v2738_v16  ;;  %v2986_v33 = vsel %vm1065_vm11, %v2981_v59, %v2985_v63  ;;  %v2971_v45 = vshll.u32 %v8337_v32, 16  ;;  %v8430_v32 = vld [vmem:[#allocation3 + $0x30] sm:$0xff]  }
 0x245   : > { %2737 = vst.msk [vmem:[#allocation3 + $0x94] sm:$0xf] %vm10125_vm2, %v2536_v43  ;;  %2740 = vst [vmem:[#allocation3 + $0x98] sm:$0x1] %v2739_v44  ;;  %v2519_v3 = vsel %vm7186_vm9, %v2511_v17, %v2518_v61  ;;  %v2732_v48 = vsel %vm7815_vm4, %v2520_v36, %v2731_v0  ;;  %3243 = vrot.lane.b32.xlu0 %v3207_v7, %s7088_s16  ;;  %3309 = vrot.lane.b32.xlu1 %v2986_v33, %s7087_s10  ;;  %v3074_v26 = vshll.u32 %v8327_v39, 16  ;;  %vm10138_vm2 = vcmask 261120  }
 0x246   : > { %2730 = vst.msk [vmem:[#allocation3 + $0x88] sm:$0xf] %vm10126_vm10, %v2519_v3  ;;  %2733 = vst [vmem:[#allocation3 + $0x8c] sm:$0x1] %v2732_v48  ;;  %v2969_v38 = vor.u32 %v2968_v1, %v2964_v12  ;;  %v2973_v46 = vrot.slane %v2971_v45, 1  ;;  %v3072_v7 = vshrl.u32 %v8327_v39, 16 }
 0x247   : > { %v3076_v53 = vrot.slane %v3074_v26, 1  ;;  %v3079_v55 = vshll.u32 %v8350_v20, 16  ;;  %v3062_v39 = vshll.u32 %v8335_v31, 16  ;;  %v3067_v9 = vshll.u32 %v8363_v6, 16  ;;  %v8467_v1 = vld [vmem:[#allocation3 + $0x24] sm:$0xff]  }
 0x248   : > { %v2974_v59 = vsel %vm1065_vm11, %v2969_v38, %v2973_v46  ;;  %v3060_v6 = vshrl.u32 %v8335_v31, 16  ;;  %vm3687_vm10 = vcmask 457728  }
 0x249   : > { %3147 = vrot.lane.b32.xlu1 %v2986_v33, %s7082_s24  ;;  %3475 = vrot.lane.b32.xlu0 %v3204_v28, %s7091_s23  ;;  %v3077_v17 = vor.u32 %v3076_v53, %v3072_v7  ;;  %v3081_v16 = vrot.slane %v3079_v55, 1  ;;  %v3064_v44 = vrot.slane %v3062_v39, 1  ;;  %v3069_v12 = vrot.slane %v3067_v9, 1 }
 0x24b   : > { %v3065_v46 = vor.u32 %v3064_v44, %v3060_v6  ;;  %v408_v6 = vld [vmem:[#allocation3 + $0xc8] sm:$0x1] }
 0x24d   : > { %3145 = vrot.lane.b32.xlu1 %v2974_v59, %s7082_s24  ;;  %3358 = vrot.lane.b32.xlu0 %v3204_v28, %s7092_s25  ;;  %v3082_v28 = vsel %vm1065_vm11, %v3077_v17, %v3081_v16  ;;  %v2741_v17 = vld [vmem:[#allocation3 + $0x9c] sm:$0xf] }
 0x251   : > { %3266 = vrot.lane.b32.xlu1 %v8430_v32, %s7084_s28  ;;  %3426 = vrot.lane.b32.xlu0 %v2986_v33, %s7093_s26 }
 0x253   : > { %v6774_v35 = vpop.f32.mrb[8].mxu1 }
 0x254   : > { %v2163_v10 = vmul.f32 %v6774_v35, %v8090_v41  ;;  %v2101_v40 = vpop.f32.mrb[9].mxu1 }
 0x255   : > { %v2161_v20 = vmul.f32 %v8090_v41, %v2101_v40  ;;  %v6775_v60 = vpop.f32.mrb[10].mxu1  ;;  %3325 = vrot.lane.b32.xlu1 %v3082_v28, %s7087_s10  ;;  %3307 = vrot.lane.b32.xlu0 %v2974_v59, %s7087_s10  ;;  %v2748_v59 = vld [vmem:[#allocation3 + $0xa8] sm:$0xf]  ;;  %v6986_v40 = vld [vmem:[%s9987_s1 + $0x48] sm:$0xff]  }
 0x256   : > { %v2200_v0 = vadd.f32 %v8097_v58, %v2163_v10  ;;  %v2164_v47 = vmul.f32 %v6775_v60, %v8090_v41  ;;  %v2104_v61 = vpop.f32.mrb[11].mxu1  ;;  %v353_v10 = vld [vmem:[#allocation3 + $0xc0] sm:$0x1] }
 0x257   : > { %v2198_v36 = vadd.f32 %v8097_v58, %v2161_v20  ;;  %v2162_v63 = vmul.f32 %v8090_v41, %v2104_v61 }
 0x258   : > { %v8446_v37 = vmax.f32 %v2200_v0, 0.0  ;;  %v2201_v43 = vadd.f32 %v8097_v58, %v2164_v47  ;;  %v354_v0 = vsel %vm7815_vm4, 0, %v353_v10  ;;  %v350_v47 = vld [vmem:[#allocation3 + $0xb4] sm:$0x1] }
 0x259   : > { %v8449_v57 = vmax.f32 %v2198_v36, 0.0  ;;  %v2199_v42 = vadd.f32 %v8097_v58, %v2162_v63  ;;  %3163 = vrot.lane.b32.xlu1 %v3082_v28, %s7082_s24  ;;  %3383 = vrot.lane.b32.xlu0 %v8430_v32, %s7090_s22  ;;  %v6983_v58 = vld [vmem:[%s9987_s1 + $0x40] sm:$0xff]   ;;  %v2752_v63 = vld [vmem:[#allocation3 + $0xb0] sm:$0x1]  ;;  %355 = vst [vmem:[#allocation3 + $0xc0] sm:$0x1] %v354_v0 }
 0x25a   : > { %10127 = vst [vmem:[#allocation31_spill] sm:$0xff] %v8446_v37  ;;  %v6590_v3 = vpack.c.bf16 %v8446_v37, %v8446_v37  ;;  %v8457_v41 = vmax.f32 %v2201_v43, 0.0  ;;  %6780 = vmatprep.subr.bf16.mxu1 %v6983_v58  ;;  %v351_v9 = vsel %vm7815_vm4, 0, %v350_v47  ;;  %v3070_v43 = vsel %vm1065_vm11, %v3065_v46, %v3069_v12  ;;  %v6987_v46 = vld [vmem:[%s9987_s1 + $0x50] sm:$0xff]   ;;  %v6989_v47 = vld [vmem:[%s9987_s1 + $0x60] sm:$0xff]  }
 0x25b   : > { %10128 = vst [vmem:[#allocation32_spill] sm:$0xff] %v8449_v57  ;;  %v6588_v48 = vpack.c.bf16 %v8449_v57, %v8449_v57  ;;  %v8462_v33 = vmax.f32 %v2199_v42, 0.0  ;;  %6781 = vmatpush3.bf16.msra.mxu1 %v6983_v58  ;;  %352 = vst [vmem:[#allocation3 + $0xb4] sm:$0x1] %v351_v9  ;;  %v409_v12 = vsel %vm7942_vm5, 0, %v408_v6 }
 0x25c   : > { %10129 = vst [vmem:[#allocation33_spill] sm:$0xff] %v8457_v41  ;;  %v2556_v45 = vshrl.u32 %v6590_v3, 16  ;;  %v2559_v38 = vshll.u32 %v6590_v3, 16  ;;  %v6591_v26 = vpack.c.bf16 %v8457_v41, %v8457_v41  ;;  %6782 = vmatprep.subr.bf16.mxu1 %v6986_v40  ;;  %410 = vst [vmem:[#allocation3 + $0xc8] sm:$0x1] %v409_v12 }
 0x25d   : > { %10130 = vst [vmem:[#allocation34_spill] sm:$0xff] %v8462_v33  ;;  %v2539_v31 = vshrl.u32 %v6588_v48, 16  ;;  %v2542_v53 = vshll.u32 %v6588_v48, 16  ;;  %v6589_v7 = vpack.c.bf16 %v8462_v33, %v8462_v33  ;;  %3381 = vrot.lane.b32.xlu1 %v8467_v1, %s7090_s22  ;;  %3442 = vrot.lane.b32.xlu0 %v3082_v28, %s7093_s26  ;;  %v405_v48 = vld [vmem:[#allocation3 + $0xbc] sm:$0x1] }
 0x25e   : > { %v2558_v55 = vrot.slane %v2556_v45, 7  ;;  %v2564_v16 = vshrl.u32 %v6591_v26, 16  ;;  %v2567_v35 = vshll.u32 %v6591_v26, 16  ;;  %v2745_v26 = vld [vmem:[#allocation3 + $0xa4] sm:$0x1] }
 0x25f   : > { %v2541_v39 = vrot.slane %v2539_v31, 7  ;;  %v2547_v20 = vshrl.u32 %v6589_v7, 16  ;;  %v2550_v60 = vshll.u32 %v6589_v7, 16  ;;  %6783 = vmatpush3.bf16.msra.mxu1 %v6986_v40  ;;  %v6988_v40 = vld [vmem:[%s9987_s1 + $0x58] sm:$0xff]  }
 0x260   : > { %v2561_v61 = vor.u32 %v2559_v38, %v2558_v55  ;;  %v2562_v36 = vrot.slane %v2558_v55, 4  ;;  %v2566_v28 = vrot.slane %v2564_v16, 7  ;;  %6784 = vmatprep.subr.bf16.mxu1 %v6987_v46 }
 0x261   : > { %v2544_v44 = vor.u32 %v2542_v53, %v2541_v39  ;;  %v2545_v42 = vrot.slane %v2541_v39, 4  ;;  %v2549_v3 = vrot.slane %v2547_v20, 7  ;;  %3264 = vrot.lane.b32.xlu0 %v8467_v1, %s7084_s28  ;;  %3440 = vrot.lane.b32.xlu1 %v3070_v43, %s7093_s26  ;;  %v8515_v39 = vld [vmem:[#allocation3 + $0x90] sm:$0xff]   ;;  %v8517_v20 = vld [vmem:[#allocation3 + $0x84] sm:$0xff]  }
 0x262   : > { %v2749_v58 = vsel %vm8139_vm12, %v2561_v61, %v2748_v59  ;;  %v2569_v45 = vor.u32 %v2567_v35, %v2566_v28  ;;  %v2571_v38 = vrot.slane %v2566_v28, 4  ;;  %v406_v59 = vsel %vm7942_vm5, 0, %v405_v48  ;;  %v8502_v35 = vld [vmem:[#allocation3 + $0x38] ss:$0 sps:$4 sm:$0x11]   ;;  %v6990_v28 = vld [vmem:[%s9987_s1 + $0x68] sm:$0xff]  }
 0x263   : > { %2750 = vst [vmem:[#allocation3 + $0xa8] sm:$0xf] %v2749_v58  ;;  %v2742_v31 = vsel %vm8139_vm12, %v2544_v44, %v2741_v17  ;;  %v2552_v53 = vor.u32 %v2550_v60, %v2549_v3  ;;  %v2554_v7 = vrot.slane %v2549_v3, 4  ;;  %407 = vst [vmem:[#allocation3 + $0xbc] sm:$0x1] %v406_v59  ;;  %6785 = vmatpush3.bf16.msra.mxu1 %v6987_v46  ;;  %v3187_v60 = vrot.slane %v8430_v32, 1 }
 0x264   : > { %2743 = vst [vmem:[#allocation3 + $0x9c] sm:$0xf] %v2742_v31  ;;  %v2570_v55 = vsel %vm7186_vm9, %v2562_v36, %v2569_v45  ;;  %v2753_v16 = vsel %vm7815_vm4, %v2571_v38, %v2752_v63  ;;  %6786 = vmatprep.subr.bf16.mxu1 %v6988_v40  ;;  %v3188_v0 = vrot.slane %v8502_v35, 1  ;;  %v8528_v61 = vld [vmem:[#allocation3 + $0x2c] ss:$0 sps:$4 sm:$0x11]  }
 0x265   : > { %2751 = vst.msk [vmem:[#allocation3 + $0xac] sm:$0xf] %vm10108_vm0, %v2570_v55  ;;  %2754 = vst [vmem:[#allocation3 + $0xb0] sm:$0x1] %v2753_v16  ;;  %v2553_v17 = vsel %vm7186_vm9, %v2545_v42, %v2552_v53  ;;  %v2746_v10 = vsel %vm7815_vm4, %v2554_v7, %v2745_v26  ;;  %3323 = vrot.lane.b32.xlu0 %v3070_v43, %s7087_s10  ;;  %3161 = vrot.lane.b32.xlu1 %v3070_v43, %s7082_s24  ;;  %v3184_v63 = vrot.slane %v8467_v1, 1  ;;  %v6992_v38 = vld [vmem:[%s9987_s1 + $0x70] sm:$0xff]  }
 0x266   : > { %2744 = vst.msk [vmem:[#allocation3 + $0xa0] sm:$0xf] %vm10131_vm3, %v2553_v17  ;;  %2747 = vst [vmem:[#allocation3 + $0xa4] sm:$0x1] %v2746_v10  ;;  %v3189_v36 = vsel %vm1290_vm8, %v3187_v60, %v3188_v0  ;;  %v3185_v9 = vrot.slane %v8528_v61, 1  ;;  %v3002_v43 = vshll.u32 %v8430_v32, 16 }
 0x267   : > { %6787 = vmatpush3.bf16.msra.mxu1 %v6988_v40  ;;  %v8540_v42 = vld [vmem:[#allocation3 + $0x8c] ss:$0 sps:$4 sm:$0x11]   ;;  %v7053_v3 = vld [vmem:[%s9988_s2] ss:$0 sm:$0xff]  ;;  %v3208_v16 = vrot.slane %v8517_v20, 1 }
 0x268   : > { %6788 = vmatprep.subr.bf16.mxu1 %v6989_v47  ;;  %v7054_v26 = vld [vmem:[%s9988_s2 + $0x1] ss:$0 sm:$0xff]  ;;  %v3186_v53 = vsel %vm1290_vm8, %v3184_v63, %v3185_v9  ;;  %v3004_v7 = vrot.slane %v3002_v43, 1  ;;  %v3209_v17 = vrot.slane %v8540_v42, 1  ;;  %v3000_v60 = vshrl.u32 %v8430_v32, 16 }
 0x269   : > { %3282 = vrot.lane.b32.xlu1 %v8515_v39, %s7084_s28  ;;  %3280 = vrot.lane.b32.xlu0 %v8517_v20, %s7084_s28  ;;  %vm3720_vm0 = vcmask 523264   ;;  %vm3753_vm3 = vcmask 588800  }
 0x26a   : > { %v3005_v43 = vor.u32 %v3004_v7, %v3000_v60 }
 0x26b   : > { %6789 = vmatpush3.bf16.msra.mxu1 %v6989_v47 }
 0x26c   : > { %6790 = vmatprep.subr.bf16.mxu1 %v6990_v28 }
 0x26d   : > { %3465 = vrot.lane.b32.xlu0 %v3189_v36, %s7091_s23  ;;  %3397 = vrot.lane.b32.xlu1 %v8517_v20, %s7090_s22 }
 0x26f   : > { %6791 = vmatpush3.bf16.msra.mxu1 %v6990_v28  ;;  %v3007_v28 = vshll.u32 %v8502_v35, 16 }
 0x270   : > { %v6778_v44 = vpop.f32.mrb[12].mxu1  ;;  %6792 = vmatprep.subr.bf16.mxu1 %v6992_v38 }
 0x271   : > { %v2167_v6 = vmul.f32 %v7053_v3, %v6778_v44  ;;  %v2117_v48 = vpop.f32.mrb[13].mxu1  ;;  %3231 = vrot.lane.b32.xlu0 %v3189_v36, %s7088_s16  ;;  %3348 = vrot.lane.b32.xlu1 %v3189_v36, %s7092_s25  ;;  %v6994_v36 = vld [vmem:[%s9987_s1 + $0x78] sm:$0xff]   ;;  %v2990_v44 = vshll.u32 %v8467_v1, 16 }
 0x272   : > { %v2165_v58 = vmul.f32 %v7053_v3, %v2117_v48  ;;  %v6779_v45 = vpop.f32.mrb[14].mxu1 }
 0x273   : > { %v2204_v12 = vadd.f32 %v7054_v26, %v2167_v6  ;;  %v2168_v46 = vmul.f32 %v7053_v3, %v6779_v45  ;;  %v2120_v31 = vpop.f32.mrb[15].mxu1  ;;  %6793 = vmatpush3.bf16.msra.mxu1 %v6992_v38  ;;  %v8577_v6 = vsel %vm1290_vm8, %v3208_v16, %v3209_v17 }
 0x274   : > { %v2202_v59 = vadd.f32 %v7054_v26, %v2165_v58  ;;  %v2166_v55 = vmul.f32 %v7053_v3, %v2120_v31  ;;  %6794 = vmatprep.subr.bf16.mxu1 %v6994_v36 }
 0x275   : > { %v8556_v10 = vmax.f32 %v2204_v12, 0.0  ;;  %v2205_v40 = vadd.f32 %v7054_v26, %v2168_v46  ;;  %3463 = vrot.lane.b32.xlu0 %v3186_v53, %s7091_s23  ;;  %3229 = vrot.lane.b32.xlu1 %v3186_v53, %s7088_s16  ;;  %v3009_v12 = vrot.slane %v3007_v28, 1  ;;  %v2988_v28 = vshrl.u32 %v8467_v1, 16 }
 0x276   : > { %v8561_v0 = vmax.f32 %v2202_v59, 0.0  ;;  %v2203_v47 = vadd.f32 %v7054_v26, %v2166_v55  ;;  %v2992_v59 = vrot.slane %v2990_v44, 1  ;;  %v2762_v55 = vld [vmem:[#allocation3 + $0xc0] sm:$0xf]  ;;  %v2766_v44 = vld [vmem:[#allocation3 + $0xc8] sm:$0x1] }
 0x277   : > { %10132 = vst [vmem:[#allocation35_spill] sm:$0xff] %v8556_v10  ;;  %v6594_v63 = vpack.c.bf16 %v8556_v10, %v8556_v10  ;;  %v8569_v9 = vmax.f32 %v2205_v40, 0.0  ;;  %6795 = vmatpush3.bf16.msra.mxu1 %v6994_v36 }
 0x278   : > { %10133 = vst [vmem:[#allocation36_spill] sm:$0xff] %v8561_v0  ;;  %v6592_v32 = vpack.c.bf16 %v8561_v0, %v8561_v0  ;;  %v8574_v3 = vmax.f32 %v2203_v47, 0.0 }
 0x279   : > { %10134 = vst [vmem:[#allocation37_spill] sm:$0xff] %v8569_v9  ;;  %v2590_v48 = vshrl.u32 %v6594_v63, 16  ;;  %v2593_v35 = vshll.u32 %v6594_v63, 16  ;;  %v6595_v58 = vpack.c.bf16 %v8569_v9, %v8569_v9  ;;  %3346 = vrot.lane.b32.xlu0 %v3186_v53, %s7092_s25  ;;  %3245 = vrot.lane.b32.xlu1 %v8577_v6, %s7088_s16  ;;  %v3010_v53 = vsel %vm1065_vm11, %v3005_v43, %v3009_v12  ;;  %v2755_v63 = vld [vmem:[#allocation3 + $0xb4] sm:$0xf] }
 0x27a   : > { %10135 = vst [vmem:[#allocation38_spill] sm:$0xff] %v8574_v3  ;;  %v2573_v45 = vshrl.u32 %v6592_v32, 16  ;;  %v2576_v38 = vshll.u32 %v6592_v32, 16  ;;  %v6593_v26 = vpack.c.bf16 %v8574_v3, %v8574_v3  ;;  %v2993_v3 = vor.u32 %v2992_v59, %v2988_v28 }
 0x27b   : > { %v2592_v46 = vrot.slane %v2590_v48, 7  ;;  %v2598_v31 = vshrl.u32 %v6595_v58, 16  ;;  %v2601_v7 = vshll.u32 %v6595_v58, 16  ;;  %v2995_v58 = vshll.u32 %v8528_v61, 16 }
 0x27c   : > { %v2575_v16 = vrot.slane %v2573_v45, 7  ;;  %v2581_v17 = vshrl.u32 %v6593_v26, 16  ;;  %v2584_v40 = vshll.u32 %v6593_v26, 16  ;;  %v2759_v26 = vld [vmem:[#allocation3 + $0xbc] sm:$0x1] }
 0x27d   : > { %v2595_v60 = vor.u32 %v2593_v35, %v2592_v46  ;;  %v2596_v47 = vrot.slane %v2592_v46, 4  ;;  %v2600_v9 = vrot.slane %v2598_v31, 7  ;;  %3313 = vrot.lane.b32.xlu1 %v3010_v53, %s7087_s10  ;;  %3479 = vrot.lane.b32.xlu0 %v8577_v6, %s7091_s23  ;;  %v2997_v59 = vrot.slane %v2995_v58, 1 }
 0x27e   : > { %v2578_v32 = vor.u32 %v2576_v38, %v2575_v16  ;;  %v2579_v36 = vrot.slane %v2575_v16, 4  ;;  %v2583_v48 = vrot.slane %v2581_v17, 7  ;;  %v8611_v16 = vld [vmem:[#allocation3 + $0x48] sm:$0xff]   ;;  %v6976_v17 = vld [vmem:[#allocation3 + $0x50] ss:$0 sps:$4 sm:$0x11]  }
 0x27f   : > { %v2763_v43 = vsel %vm8139_vm12, %v2595_v60, %v2762_v55  ;;  %v2603_v35 = vor.u32 %v2601_v7, %v2600_v9  ;;  %v2605_v45 = vrot.slane %v2600_v9, 4  ;;  %v2998_v55 = vsel %vm1065_vm11, %v2993_v3, %v2997_v59  ;;  %v8619_v60 = vld [vmem:[#allocation3 + $0x3c] sm:$0xff]  }
 0x280   : > { %2764 = vst [vmem:[#allocation3 + $0xc0] sm:$0xf] %v2763_v43  ;;  %v2756_v12 = vsel %vm8139_vm12, %v2578_v32, %v2755_v63  ;;  %v2586_v46 = vor.u32 %v2584_v40, %v2583_v48  ;;  %v2588_v31 = vrot.slane %v2583_v48, 4  ;;  %v3086_v40 = vshll.u32 %v8517_v20, 16 }
 0x281   : > { %2757 = vst [vmem:[#allocation3 + $0xb4] sm:$0xf] %v2756_v12  ;;  %v2604_v38 = vsel %vm7186_vm9, %v2596_v47, %v2603_v35  ;;  %v2767_v61 = vsel %vm7815_vm4, %v2605_v45, %v2766_v44  ;;  %3151 = vrot.lane.b32.xlu1 %v3010_v53, %s7082_s24  ;;  %3430 = vrot.lane.b32.xlu0 %v3010_v53, %s7093_s26  ;;  %v8614_v53 = vpop.permute.xlu0 %3143  ;;  %v3193_v3 = vrot.slane %v8611_v16, 1  ;;  %v3194_v47 = vrot.slane %v6976_v17, 1  ;;  %v411_v45 = vld [vmem:[#allocation3 + $0xd4] sm:$0x1] }
 0x282   : > { %2765 = vst.msk [vmem:[#allocation3 + $0xc4] sm:$0xf] %vm10136_vm14, %v2604_v38  ;;  %2768 = vst [vmem:[#allocation3 + $0xc8] sm:$0x1] %v2767_v61  ;;  %v2587_v9 = vsel %vm7186_vm9, %v2579_v36, %v2586_v46  ;;  %v2760_v7 = vsel %vm7815_vm4, %v2588_v31, %v2759_v26  ;;  %v3084_v63 = vshrl.u32 %v8517_v20, 16  ;;  %v3088_v28 = vrot.slane %v3086_v40, 1 }
 0x283   : > { %2758 = vst.msk [vmem:[#allocation3 + $0xb8] sm:$0xf] %vm10137_vm1, %v2587_v9  ;;  %2761 = vst [vmem:[#allocation3 + $0xbc] sm:$0x1] %v2760_v7  ;;  %v3091_v32 = vshll.u32 %v8540_v42, 16  ;;  %v3195_v44 = vsel %vm1290_vm8, %v3193_v3, %v3194_v47  ;;  %v3190_v35 = vrot.slane %v8619_v60, 1 }
 0x284   : > { %v3089_v48 = vor.u32 %v3088_v28, %v3084_v63  ;;  %v6977_v43 = vld [vmem:[#allocation3 + $0x44] ss:$0 sps:$4 sm:$0x11]   ;;  %v356_v20 = vld [vmem:[#allocation3 + $0xcc] sm:$0x1]  ;;  %v3026_v46 = vshll.u32 %v8611_v16, 16  ;;  %vm10139_vm14 = vmmov %vm10138_vm2 }
 0x285   : > { %3428 = vrot.lane.b32.xlu1 %v2998_v55, %s7093_s26  ;;  %3311 = vrot.lane.b32.xlu0 %v2998_v55, %s7087_s10  ;;  %v8628_v36 = vpop.permute.xlu0 %3223  ;;  %v3093_v58 = vrot.slane %v3091_v32, 1  ;;  %v357_v42 = vsel %vm7815_vm4, 0, %v356_v20  ;;  %v3191_v12 = vrot.slane %v6977_v43, 1  ;;  %v412_v31 = vsel %vm7942_vm5, 0, %v411_v45  ;;  %vm10140_vm1 = vmmov %vm10138_vm2 }
 0x286   : > { %358 = vst [vmem:[#allocation3 + $0xcc] sm:$0x1] %v357_v42  ;;  %413 = vst [vmem:[#allocation3 + $0xd4] sm:$0x1] %v412_v31  ;;  %v3028_v9 = vrot.slane %v3026_v46, 1  ;;  %v3014_v7 = vshll.u32 %v8619_v60, 16 }
 0x287   : > { %v8638_v26 = vsel %vm1065_vm11, %v3089_v48, %v3093_v58  ;;  %v3192_v61 = vsel %vm1290_vm8, %v3190_v35, %v3191_v12  ;;  %v3024_v19 = vshrl.u32 %v8611_v16, 16  ;;  %v3031_v59 = vshll.u32 %v6976_v17, 16  ;;  %v8679_v46 = vld [vmem:[#allocation3 + $0x60] sm:$0xff]   ;;  %v6980_v31 = vld [vmem:[#allocation3 + $0x68] ss:$0 sps:$4 sm:$0x11]  }
 0x288   : > { %v3016_v47 = vrot.slane %v3014_v7, 1  ;;  %v3012_v28 = vshrl.u32 %v8619_v60, 16  ;;  %v3019_v32 = vshll.u32 %v6977_v43, 16  ;;  %v8688_v7 = vld [vmem:[#allocation3 + $0x54] sm:$0xff]   ;;  %v3050_v0 = vshll.u32 %v8679_v46, 16 }
 0x289   : > { %3149 = vrot.lane.b32.xlu1 %v2998_v55, %s7082_s24  ;;  %3387 = vrot.lane.b32.xlu0 %v8611_v16, %s7090_s22  ;;  %v8643_v38 = vpop.permute.xlu0 %3379  ;;  %v8654_v55 = vpop.permute.xlu1 %3262  ;;  %v3029_v3 = vor.u32 %v3028_v9, %v3024_v19  ;;  %v3033_v63 = vrot.slane %v3031_v59, 1  ;;  %v3199_v19 = vrot.slane %v8679_v46, 1  ;;  %v3200_v59 = vrot.slane %v6980_v31, 1 }
 0x28a   : > { %v3017_v20 = vor.u32 %v3016_v47, %v3012_v28  ;;  %v3021_v42 = vrot.slane %v3019_v32, 1  ;;  %v6981_v28 = vld [vmem:[#allocation3 + $0x5c] ss:$0 sps:$4 sm:$0x11]   ;;  %v3052_v10 = vrot.slane %v3050_v0, 1  ;;  %v3038_v33 = vshll.u32 %v8688_v7, 16 }
 0x28b   : > { %v3034_v17 = vsel %vm1065_vm11, %v3029_v3, %v3033_v63  ;;  %v3201_v63 = vsel %vm1290_vm8, %v3199_v19, %v3200_v59  ;;  %v3048_v41 = vshrl.u32 %v8679_v46, 16  ;;  %v3055_v57 = vshll.u32 %v6980_v31, 16  ;;  %v8830_v21 = vld [vmem:[#allocation3 + $0xb4] sm:$0xff]  }
 0x28c   : > { %v3040_v24 = vrot.slane %v3038_v33, 1  ;;  %vm3654_vm5 = vcmask 392192   ;;  %v3132_v11 = vshrl.u32 %v8830_v21, 16 }
 0x28d   : > { %3270 = vrot.lane.b32.xlu1 %v8611_v16, %s7084_s28  ;;  %3268 = vrot.lane.b32.xlu0 %v8619_v60, %s7084_s28  ;;  %v8656_v40 = vpop.permute.xlu0 %3260  ;;  %v3053_v14 = vor.u32 %v3052_v10, %v3048_v41  ;;  %v3057_v0 = vrot.slane %v3055_v57, 1  ;;  %v3494_v41 = vsel %vm1642_vm13, %v7055_v54, %v8614_v53 }
 0x28f   : > { %v3058_v31 = vsel %vm1065_vm11, %v3053_v14, %v3057_v0 }
 0x291   : > { %3385 = vrot.lane.b32.xlu1 %v8619_v60, %s7090_s22  ;;  %3469 = vrot.lane.b32.xlu0 %v3195_v44, %s7091_s23 }
 0x295   : > { %3235 = vrot.lane.b32.xlu0 %v3195_v44, %s7088_s16  ;;  %3444 = vrot.lane.b32.xlu1 %v8638_v26, %s7093_s26 }
 0x299   : > { %3467 = vrot.lane.b32.xlu0 %v3192_v61, %s7091_s23  ;;  %3165 = vrot.lane.b32.xlu1 %v8638_v26, %s7082_s24 }
 0x29d   : > { %3350 = vrot.lane.b32.xlu0 %v3192_v61, %s7092_s25  ;;  %3352 = vrot.lane.b32.xlu1 %v3195_v44, %s7092_s25  ;;  %v3022_v44 = vsel %vm1065_vm11, %v3017_v20, %v3021_v42  ;;  %v3196_v20 = vrot.slane %v8688_v7, 1  ;;  %v3197_v42 = vrot.slane %v6981_v28, 1 }
 0x29f   : > { %v8661_v48 = vpop.permute.xlu1 %3278  ;;  %v8663_v58 = vpop.permute.xlu0 %3395 }
 0x2a1   : > { %3434 = vrot.lane.b32.xlu0 %v3034_v17, %s7093_s26  ;;  %3233 = vrot.lane.b32.xlu1 %v3192_v61, %s7088_s16 }
 0x2a3   : > { %v8668_v35 = vpop.permute.xlu1 %3393  ;;  %v8670_v45 = vpop.permute.xlu0 %3276 }
 0x2a5   : > { %3317 = vrot.lane.b32.xlu1 %v3034_v17, %s7087_s10  ;;  %3315 = vrot.lane.b32.xlu0 %v3022_v44, %s7087_s10 }
 0x2a7   : > { %v8675_v43 = vpop.permute.xlu1 %3344  ;;  %v8677_v12 = vpop.permute.xlu0 %3461 }
 0x2a9   : > { %3155 = vrot.lane.b32.xlu1 %v3034_v17, %s7082_s24  ;;  %3391 = vrot.lane.b32.xlu0 %v8679_v46, %s7090_s22 }
 0x2ab   : > { %v8684_v61 = vpop.permute.xlu1 %3225  ;;  %v8686_v9 = vpop.permute.xlu0 %3227 }
 0x2ad   : > { %3432 = vrot.lane.b32.xlu1 %v3022_v44, %s7093_s26  ;;  %3272 = vrot.lane.b32.xlu0 %v8688_v7, %s7084_s28 }
 0x2af   : > { %v8694_v3 = vpop.permute.xlu1 %3360  ;;  %v3343_v47 = vpop.permute.xlu0 %3342 }
 0x2b1   : > { %3153 = vrot.lane.b32.xlu1 %v3022_v44, %s7082_s24  ;;  %3473 = vrot.lane.b32.xlu0 %v3201_v63, %s7091_s23  ;;  %v3198_v44 = vsel %vm1290_vm8, %v3196_v20, %v3197_v42  ;;  %v3036_v20 = vshrl.u32 %v8688_v7, 16  ;;  %v3043_v42 = vshll.u32 %v6981_v28, 16 }
 0x2b3   : > { %v8699_v32 = vpop.permute.xlu1 %3241  ;;  %v8701_v17 = vpop.permute.xlu0 %3477  ;;  %v3041_v49 = vor.u32 %v3040_v24, %v3036_v20  ;;  %v3045_v33 = vrot.slane %v3043_v42, 1 }
 0x2b5   : > { %3274 = vrot.lane.b32.xlu1 %v8679_v46, %s7084_s28  ;;  %3239 = vrot.lane.b32.xlu0 %v3201_v63, %s7088_s16  ;;  %v3046_v28 = vsel %vm1065_vm11, %v3041_v49, %v3045_v33 }
 0x2b7   : > { %v8708_v19 = vpop.permute.xlu1 %3309  ;;  %v8710_v59 = vpop.permute.xlu0 %3243 }
 0x2b9   : > { %3389 = vrot.lane.b32.xlu1 %v8688_v7, %s7090_s22  ;;  %3471 = vrot.lane.b32.xlu0 %v3198_v44, %s7091_s23 }
 0x2bb   : > { %v8718_v37 = vpop.permute.xlu1 %3147  ;;  %v8720_v52 = vpop.permute.xlu0 %3475 }
 0x2bd   : > { %3356 = vrot.lane.b32.xlu1 %v3201_v63, %s7092_s25  ;;  %3354 = vrot.lane.b32.xlu0 %v3198_v44, %s7092_s25  ;;  %v3526_v63 = vsel %vm1708_vm15, %v3494_v41, %v8628_v36  ;;  %v3098_v36 = vshll.u32 %v8515_v39, 16 }
 0x2be   : > { %v3558_v54 = vsel %vm1774_vm7, %v3526_v63, %v8656_v40 }
 0x2bf   : > { %v8725_v34 = vpop.permute.xlu1 %3145  ;;  %v8727_v56 = vpop.permute.xlu0 %3358 }
 0x2c1   : > { %3237 = vrot.lane.b32.xlu1 %v3198_v44, %s7088_s16  ;;  %3438 = vrot.lane.b32.xlu0 %v3058_v31, %s7093_s26  ;;  %v6982_v44 = vld [vmem:[#allocation3 + $0x98] ss:$0 sps:$4 sm:$0x11]  }
 0x2c2   : > { %v3103_v33 = vshll.u32 %v6982_v44, 16 }
 0x2c3   : > { %v8734_v57 = vpop.permute.xlu1 %3266  ;;  %v3427_v10 = vpop.permute.xlu0 %3426 }
 0x2c5   : > { %3321 = vrot.lane.b32.xlu1 %v3058_v31, %s7087_s10  ;;  %3319 = vrot.lane.b32.xlu0 %v3046_v28, %s7087_s10 }
 0x2c7   : > { %v8743_v24 = vpop.permute.xlu1 %3325  ;;  %v3308_v14 = vpop.permute.xlu0 %3307 }
 0x2c8   : > { %v3590_v53 = vsel %vm10138_vm2, %v3558_v54, %v3308_v14  ;;  %v3105_v54 = vrot.slane %v3103_v33, 1  ;;  %vm10141_vm2 = vmmov %vm10140_vm1 }
 0x2c9   : > { %v3623_v49 = vsel %vm3621_vm6, %v3590_v53, %v3343_v47  ;;  %3159 = vrot.lane.b32.xlu1 %v3058_v31, %s7082_s24  ;;  %3327 = vrot.lane.b32.xlu0 %v8638_v26, %s7087_s10  ;;  %v3096_v47 = vshrl.u32 %v8515_v39, 16  ;;  %v3100_v31 = vrot.slane %v3098_v36, 1  ;;  %v8765_v26 = vld [vmem:[#allocation3 + $0x9c] sm:$0xff]  }
 0x2ca   : > { %v3656_v40 = vsel %vm3654_vm5, %v3623_v49, %v8643_v38  ;;  %v3110_v14 = vshll.u32 %v8765_v26, 16  ;;  %v3211_v49 = vrot.slane %v8515_v39, 1 }
 0x2cb   : > { %v8753_v0 = vpop.permute.xlu1 %3163  ;;  %v8755_v20 = vpop.permute.xlu0 %3383  ;;  %v3689_v42 = vsel %vm3687_vm10, %v3656_v40, %v3427_v10  ;;  %v3101_v63 = vor.u32 %v3100_v31, %v3096_v47  ;;  %v3212_v40 = vrot.slane %v6982_v44, 1 }
 0x2cc   : > { %v3722_v41 = vsel %vm3720_vm0, %v3689_v42, %v8677_v12  ;;  %v6985_v12 = vld [vmem:[#allocation3 + $0xa4] ss:$0 sps:$4 sm:$0x11]   ;;  %v3112_v47 = vrot.slane %v3110_v14, 1 }
 0x2cd   : > { %3436 = vrot.lane.b32.xlu1 %v3046_v28, %s7093_s26  ;;  %3362 = vrot.lane.b32.xlu0 %v8577_v6, %s7092_s25  ;;  %v3106_v36 = vsel %vm1065_vm11, %v3101_v63, %v3105_v54  ;;  %v3215_v42 = vrot.slane %v6985_v12, 1  ;;  %v3115_v31 = vshll.u32 %v6985_v12, 16  ;;  %v3213_v63 = vsel %vm1290_vm8, %v3211_v49, %v3212_v40  ;;  %v8807_v40 = vld [vmem:[#allocation3 + $0xa8] sm:$0xff]  }
 0x2ce   : > { %6796 = vmatprep.mubr.msk.bf16.mxu1 %vm3753_vm3, %v3722_v41  ;;  %v3108_v41 = vshrl.u32 %v8765_v26, 16  ;;  %v3120_v51 = vshrl.u32 %v8807_v40, 16 }
 0x2cf   : > { %v8767_v38 = vpop.permute.xlu1 %3381  ;;  %v8769_v10 = vpop.permute.xlu0 %3442  ;;  %v3117_v54 = vrot.slane %v3115_v31, 1 }
 0x2d0   : > { %v3113_v44 = vor.u32 %v3112_v47, %v3108_v41  ;;  %v6993_v41 = vld [vmem:[#allocation3 + $0xb0] ss:$0 sps:$4 sm:$0x11]   ;;  %v3122_v47 = vshll.u32 %v8807_v40, 16 }
 0x2d1   : > { %3157 = vrot.lane.b32.xlu1 %v3046_v28, %s7082_s24  ;;  %3399 = vrot.lane.b32.xlu0 %v8515_v39, %s7090_s22  ;;  %v3214_v28 = vrot.slane %v8765_v26, 1  ;;  %v3127_v13 = vshll.u32 %v6993_v41, 16 }
 0x2d2   : > { %v3118_v12 = vsel %vm1065_vm11, %v3113_v44, %v3117_v54 }
 0x2d3   : > { %v8775_v53 = vpop.permute.xlu1 %3440  ;;  %v8777_v6 = vpop.permute.xlu0 %3264  ;;  %v3216_v39 = vsel %vm1290_vm8, %v3214_v28, %v3215_v42 }
 0x2d5   : > { %3329 = vrot.lane.b32.xlu1 %v3106_v36, %s7087_s10  ;;  %3446 = vrot.lane.b32.xlu0 %v3106_v36, %s7093_s26 }
 0x2d7   : > { %v8785_v33 = vpop.permute.xlu1 %3161  ;;  %v8787_v29 = vpop.permute.xlu0 %3323 }
 0x2d9   : > { %3364 = vrot.lane.b32.xlu1 %v3213_v63, %s7092_s25  ;;  %3481 = vrot.lane.b32.xlu0 %v3213_v63, %s7091_s23 }
 0x2db   : > { %v8793_v22 = vpop.permute.xlu1 %3282  ;;  %v8795_v25 = vpop.permute.xlu0 %3280 }
 0x2dd   : > { %3401 = vrot.lane.b32.xlu1 %v8765_v26, %s7090_s22  ;;  %3483 = vrot.lane.b32.xlu0 %v3216_v39, %s7091_s23 }
 0x2df   : > { %v8801_v14 = vpop.permute.xlu1 %3397  ;;  %v8803_v49 = vpop.permute.xlu0 %3465 }
 0x2e1   : > { %3448 = vrot.lane.b32.xlu1 %v3118_v12, %s7093_s26  ;;  %3247 = vrot.lane.b32.xlu0 %v3213_v63, %s7088_s16  ;;  %v7056_v63 = vld [vmem:[#allocation3 + $0xc] sm:$0xff]  }
 0x2e2   : > { %v3496_v54 = vsel %vm1642_vm13, %v7056_v63, %v8725_v34  ;;  %v3134_v63 = vshll.u32 %v8830_v21, 16 }
 0x2e3   : > { %v8809_v28 = vpop.permute.xlu1 %3348  ;;  %v8811_v42 = vpop.permute.xlu0 %3231  ;;  %v3528_v18 = vsel %vm1708_vm15, %v3496_v54, %v8684_v61  ;;  %v3217_v61 = vrot.slane %v8807_v40, 1  ;;  %v7057_v54 = vld [vmem:[#allocation3 + $0x18] sm:$0xff]  }
 0x2e5   : > { %3167 = vrot.lane.b32.xlu1 %v3106_v36, %s7082_s24  ;;  %3284 = vrot.lane.b32.xlu0 %v8765_v26, %s7084_s28  ;;  %v3124_v36 = vrot.slane %v3122_v47, 1  ;;  %v3560_v47 = vsel %vm1774_vm7, %v3528_v18, %v8654_v55 }
 0x2e6   : > { %v3592_v18 = vsel %vm10139_vm14, %v3560_v47, %v8708_v19  ;;  %v3136_v47 = vrot.slane %v3134_v63, 1  ;;  %vm10142_vm14 = vmmov %vm10140_vm1 }
 0x2e7   : > { %v8817_v31 = vpop.permute.xlu1 %3229  ;;  %v3464_v44 = vpop.permute.xlu0 %3463  ;;  %v3125_v5 = vor.u32 %v3124_v36, %v3120_v51  ;;  %v6996_v51 = vld [vmem:[#allocation3 + $0xbc] ss:$0 sps:$4 sm:$0x11]   ;;  %v3498_v36 = vsel %vm1642_vm13, %v7057_v54, %v8718_v37  ;;  %v3625_v37 = vsel %vm3621_vm6, %v3592_v18, %v8675_v43 }
 0x2e8   : > { %v3530_v19 = vsel %vm1708_vm15, %v3498_v36, %v8686_v9  ;;  %v3139_v54 = vshll.u32 %v6996_v51, 16  ;;  %v3658_v27 = vsel %vm3654_vm5, %v3625_v37, %v8767_v38 }
 0x2e9   : > { %3169 = vrot.lane.b32.xlu1 %v3118_v12, %s7082_s24  ;;  %3331 = vrot.lane.b32.xlu0 %v3118_v12, %s7087_s10  ;;  %v3129_v12 = vrot.slane %v3127_v13, 1  ;;  %v3562_v50 = vsel %vm1774_vm7, %v3530_v19, %v8777_v6  ;;  %v3137_v6 = vor.u32 %v3136_v47, %v3132_v11 }
 0x2eb   : > { %v8824_v8 = vpop.permute.xlu1 %3245  ;;  %v3347_v23 = vpop.permute.xlu0 %3346  ;;  %v3130_v13 = vsel %vm1065_vm11, %v3125_v5, %v3129_v12  ;;  %v3220_v5 = vrot.slane %v8830_v21, 1  ;;  %v3221_v12 = vrot.slane %v6996_v51, 1  ;;  %v3141_v51 = vrot.slane %v3139_v54, 1  ;;  %v6999_v54 = vld [vmem:[#allocation3 + $0xcc] sm:$0xff]  }
 0x2ed   : > { %3249 = vrot.lane.b32.xlu1 %v3216_v39, %s7088_s16  ;;  %3366 = vrot.lane.b32.xlu0 %v3216_v39, %s7092_s25  ;;  %v3218_v39 = vrot.slane %v6993_v41, 1  ;;  %v3222_v38 = vsel %vm1290_vm8, %v3220_v5, %v3221_v12 }
 0x2ef   : > { %v8832_v2 = vpop.permute.xlu1 %3313  ;;  %v8834_v34 = vpop.permute.xlu0 %3479  ;;  %v3219_v41 = vsel %vm1290_vm8, %v3217_v61, %v3218_v39 }
 0x2f1   : > { %3286 = vrot.lane.b32.xlu1 %v8807_v40, %s7084_s28  ;;  %3403 = vrot.lane.b32.xlu0 %v8807_v40, %s7090_s22 }
 0x2f3   : > { %v8849_v55 = vpop.permute.xlu1 %3151  ;;  %v3431_v15 = vpop.permute.xlu0 %3430 }
 0x2f5   : > { %3333 = vrot.lane.b32.xlu1 %v3130_v13, %s7087_s10  ;;  %3450 = vrot.lane.b32.xlu0 %v3130_v13, %s7093_s26 }
 0x2f7   : > { %v3429_v61 = vpop.permute.xlu1 %3428  ;;  %v3312_v39 = vpop.permute.xlu0 %3311 }
 0x2f8   : > { %v3691_v62 = vsel %vm3687_vm10, %v3658_v27, %v3429_v61  ;;  %v3594_v30 = vsel %vm10140_vm1, %v3562_v50, %v3312_v39  ;;  %v3142_v50 = vsel %vm1065_vm11, %v3137_v6, %v3141_v51 }
 0x2f9   : > { %v3724_v4 = vsel %vm3720_vm0, %v3691_v62, %v3464_v44  ;;  %v3627_v43 = vsel %vm3621_vm6, %v3594_v30, %v3347_v23  ;;  %3368 = vrot.lane.b32.xlu1 %v3219_v41, %s7092_s25  ;;  %3485 = vrot.lane.b32.xlu0 %v3219_v41, %s7091_s23 }
 0x2fa   : > { %v3660_v9 = vsel %vm3654_vm5, %v3627_v43, %v8755_v20  ;;  %6797 = vmatmul.mubr.msk.bf16.vlgmr.msra.gmra.mrb[16].mxu1 %vm3753_vm3, %v3724_v4 }
 0x2fb   : > { %v3150_v27 = vpop.permute.xlu1 %3149  ;;  %v8874_v63 = vpop.permute.xlu0 %3387  ;;  %v3693_v62 = vsel %vm3687_vm10, %v3660_v9, %v3431_v15  ;;  %v6997_v15 = vld [vmem:[#allocation3 + $0xc0] sm:$0xff]  }
 0x2fc   : > { %v3726_v30 = vsel %vm3720_vm0, %v3693_v62, %v8803_v49  ;;  %v6998_v49 = vld [vmem:[#allocation3 + $0xc8] ss:$0 sps:$4 sm:$0x11]   ;;  %v3298_v44 = vshll.u32 %v6997_v15, 16  ;;  %v3339_v43 = vrot.slane %v6997_v15, 1  ;;  %v3500_v6 = vsel %vm1642_vm13, %v8467_v1, %v3150_v27 }
 0x2fd   : > { %3405 = vrot.lane.b32.xlu1 %v8830_v21, %s7090_s22  ;;  %3487 = vrot.lane.b32.xlu0 %v3222_v38, %s7091_s23  ;;  %v3303_v12 = vshll.u32 %v6998_v49, 16  ;;  %v3340_v9 = vrot.slane %v6998_v49, 1  ;;  %v7000_v62 = vld [vmem:[#allocation3 + $0xd4] ss:$0 sps:$4 sm:$0x11]   ;;  %v3415_v27 = vshrl.u32 %v6999_v54, 16 }
 0x2fe   : > { %6800 = vmatprep.mubr.msk.bf16.mxu1 %vm3753_vm3, %v3726_v30  ;;  %v3300_v5 = vrot.slane %v3298_v44, 1  ;;  %v3417_v30 = vshll.u32 %v6999_v54, 16 }
 0x2ff   : > { %v8884_v4 = vpop.permute.xlu1 %3270  ;;  %v3269_v11 = vpop.permute.xlu0 %3268  ;;  %v3305_v47 = vrot.slane %v3303_v12, 1  ;;  %v3422_v12 = vshll.u32 %v7000_v62, 16 }
 0x300   : > { %v3419_v49 = vrot.slane %v3417_v30, 1 }
 0x301   : > { %3452 = vrot.lane.b32.xlu1 %v3142_v50, %s7093_s26  ;;  %3251 = vrot.lane.b32.xlu0 %v3219_v41, %s7088_s16  ;;  %v3296_v41 = vshrl.u32 %v6997_v15, 16 }
 0x303   : > { %v3386_v23 = vpop.permute.xlu1 %3385  ;;  %v8888_v20 = vpop.permute.xlu0 %3469 }
 0x305   : > { %3171 = vrot.lane.b32.xlu1 %v3130_v13, %s7082_s24  ;;  %3288 = vrot.lane.b32.xlu0 %v8830_v21, %s7084_s28  ;;  %v3301_v13 = vor.u32 %v3300_v5, %v3296_v41  ;;  %v3532_v5 = vsel %vm1708_vm15, %v3500_v6, %v8817_v31 }
 0x307   : > { %v8893_v36 = vpop.permute.xlu1 %3444  ;;  %v8895_v18 = vpop.permute.xlu0 %3235  ;;  %v3306_v51 = vsel %vm1065_vm11, %v3301_v13, %v3305_v47 }
 0x309   : > { %3173 = vrot.lane.b32.xlu1 %v3142_v50, %s7082_s24  ;;  %3335 = vrot.lane.b32.xlu0 %v3142_v50, %s7087_s10 }
 0x30b   : > { %v8899_v37 = vpop.permute.xlu1 %3165  ;;  %v3468_v19 = vpop.permute.xlu0 %3467 }
 0x30d   : > { %3253 = vrot.lane.b32.xlu1 %v3222_v38, %s7088_s16  ;;  %3370 = vrot.lane.b32.xlu0 %v3222_v38, %s7092_s25  ;;  %v7058_v38 = vld [vmem:[#allocation3 + $0x30] sm:$0xff]  }
 0x30e   : > { %v3502_v50 = vsel %vm1642_vm13, %v7058_v38, %v8849_v55  ;;  %v3564_v38 = vsel %vm1774_vm7, %v3532_v5, %v8734_v57  ;;  %v3459_v5 = vrot.slane %v7000_v62, 1 }
 0x30f   : > { %v8903_v61 = vpop.permute.xlu1 %3352  ;;  %v3351_v39 = vpop.permute.xlu0 %3350  ;;  %v3534_v1 = vsel %vm1708_vm15, %v3502_v50, %v8811_v42  ;;  %v3424_v42 = vrot.slane %v3422_v12, 1  ;;  %v3458_v50 = vrot.slane %v6999_v54, 1 }
 0x310   : > { %v3566_v13 = vsel %vm1774_vm7, %v3534_v1, %v3269_v11 }
 0x311   : > { %3290 = vrot.lane.b32.xlu1 %v6997_v15, %s7084_s28  ;;  %3407 = vrot.lane.b32.xlu0 %v6997_v15, %s7090_s22  ;;  %v3341_v15 = vsel %vm1290_vm8, %v3339_v43, %v3340_v9  ;;  %v3420_v43 = vor.u32 %v3419_v49, %v3415_v27  ;;  %v3596_v9 = vsel %vm10142_vm14, %v3564_v38, %v8832_v2  ;;  %vm10144_vm14 = vmmov %vm10140_vm1 }
 0x312   : > { %v3629_v57 = vsel %vm3621_vm6, %v3596_v9, %v8809_v28 }
 0x313   : > { %v3234_v44 = vpop.permute.xlu1 %3233  ;;  %v3435_v41 = vpop.permute.xlu0 %3434 }
 0x315   : > { %3337 = vrot.lane.b32.xlu1 %v3306_v51, %s7087_s10  ;;  %3454 = vrot.lane.b32.xlu0 %v3306_v51, %s7093_s26 }
 0x317   : > { %v3318_v55 = vpop.permute.xlu1 %3317  ;;  %v3316_v47 = vpop.permute.xlu0 %3315 }
 0x318   : > { %v3598_v31 = vsel %vm10141_vm2, %v3566_v13, %v3316_v47  ;;  %vm10143_vm2 = vmmov %vm10140_vm1 }
 0x319   : > { %v3631_v6 = vsel %vm3621_vm6, %v3598_v31, %v3351_v39  ;;  %3372 = vrot.lane.b32.xlu1 %v3341_v15, %s7092_s25  ;;  %3489 = vrot.lane.b32.xlu0 %v3341_v15, %s7091_s23  ;;  %v3425_v39 = vsel %vm1065_vm11, %v3420_v43, %v3424_v42  ;;  %v3662_v15 = vsel %vm3654_vm5, %v3629_v57, %v3386_v23 }
 0x31a   : > { %v3664_v30 = vsel %vm3654_vm5, %v3631_v6, %v8874_v63 }
 0x31b   : > { %v3156_v51 = vpop.permute.xlu1 %3155  ;;  %v3392_v11 = vpop.permute.xlu0 %3391  ;;  %v3697_v2 = vsel %vm3687_vm10, %v3664_v30, %v3435_v41 }
 0x31c   : > { %v3730_v28 = vsel %vm3720_vm0, %v3697_v2, %v8888_v20  ;;  %v3506_v20 = vsel %vm1642_vm13, %v8611_v16, %v3156_v51 }
 0x31d   : > { %3409 = vrot.lane.b32.xlu1 %v6999_v54, %s7090_s22  ;;  %v3460_v54 = vsel %vm1290_vm8, %v3458_v50, %v3459_v5  ;;  %v3538_v9 = vsel %vm1708_vm15, %v3506_v20, %v8895_v18 }
 0x31f   : > { %v3433_v1 = vpop.permute.xlu1 %3432  ;;  %v3273_v27 = vpop.permute.xlu0 %3272 }
 0x320   : > { %v3695_v49 = vsel %vm3687_vm10, %v3662_v15, %v3433_v1  ;;  %v3570_v30 = vsel %vm1774_vm7, %v3538_v9, %v3273_v27 }
 0x321   : > { %3456 = vrot.lane.b32.xlu1 %v3425_v39, %s7093_s26  ;;  %v3728_v63 = vsel %vm3720_vm0, %v3695_v49, %v3468_v19 }
 0x322   : > { %6801 = vmatmul.mubr.msk.bf16.gmra.mrb[20].mxu1 %vm3753_vm3, %v3728_v63 }
 0x323   : > { %v3154_v62 = vpop.permute.xlu1 %3153  ;;  %6804 = vmatprep.mubr.msk.bf16.mxu1 %vm3753_vm3, %v3730_v28  ;;  %v3474_v23 = vpop.permute.xlu0 %3473 }
 0x324   : > { %v3504_v19 = vsel %vm1642_vm13, %v8619_v60, %v3154_v62 }
 0x325   : > { %3491 = vrot.lane.b32.xlu1 %v3460_v54, %s7091_s23  ;;  %v3536_v42 = vsel %vm1708_vm15, %v3504_v19, %v3234_v44  ;;  %v7059_v54 = vld [vmem:[#allocation3 + $0x6c] sm:$0xff]  }
 0x326   : > { %v3568_v50 = vsel %vm1774_vm7, %v3536_v42, %v8884_v4 }
 0x327   : > { %v3275_v41 = vpop.permute.xlu1 %3274  ;;  %v3240_v12 = vpop.permute.xlu0 %3239  ;;  %v3600_v16 = vsel %vm10143_vm2, %v3568_v50, %v3318_v55  ;;  %vm10145_vm2 = vmmov %vm10140_vm1 }
 0x328   : > { %v3633_v27 = vsel %vm3621_vm6, %v3600_v16, %v8903_v61  ;;  %v3512_v61 = vsel %vm1642_vm13, %v7059_v54, %v8785_v33 }
 0x32b   : > { %v3390_v13 = vpop.permute.xlu1 %3389  ;;  %v3472_v47 = vpop.permute.xlu0 %3471 }
 0x32c   : > { %v3666_v2 = vsel %vm3654_vm5, %v3633_v27, %v3390_v13 }
 0x32f   : > { %v3357_v38 = vpop.permute.xlu1 %3356  ;;  %v3355_v31 = vpop.permute.xlu0 %3354 }
 0x333   : > { %v3238_v6 = vpop.permute.xlu1 %3237  ;;  %v3439_v43 = vpop.permute.xlu0 %3438 }
 0x337   : > { %v3322_v57 = vpop.permute.xlu1 %3321  ;;  %v3320_v39 = vpop.permute.xlu0 %3319 }
 0x338   : > { %v3602_v5 = vsel %vm10140_vm1, %v3570_v30, %v3320_v39 }
 0x339   : > { %v3635_v60 = vsel %vm3621_vm6, %v3602_v5, %v3355_v31 }
 0x33a   : > { %v3668_v44 = vsel %vm3654_vm5, %v3635_v60, %v3392_v11 }
 0x33b   : > { %v3160_v51 = vpop.permute.xlu1 %3159  ;;  %v3328_v15 = vpop.permute.xlu0 %3327  ;;  %v3701_v55 = vsel %vm3687_vm10, %v3668_v44, %v3439_v43 }
 0x33c   : > { %v3510_v18 = vsel %vm1642_vm13, %v8679_v46, %v3160_v51 }
 0x33d   : > { %v3542_v1 = vsel %vm1708_vm15, %v3510_v18, %v3240_v12 }
 0x33e   : > { %v3574_v4 = vsel %vm1774_vm7, %v3542_v1, %v8670_v45  ;;  %v3734_v45 = vsel %vm3720_vm0, %v3701_v55, %v3474_v23 }
 0x33f   : > { %v3437_v49 = vpop.permute.xlu1 %3436  ;;  %v3363_v63 = vpop.permute.xlu0 %3362  ;;  %v3606_v11 = vsel %vm10144_vm14, %v3574_v4, %v8787_v29  ;;  %vm10146_vm14 = vmmov %vm10140_vm1 }
 0x340   : > { %v3699_v28 = vsel %vm3687_vm10, %v3666_v2, %v3437_v49  ;;  %v3639_v13 = vsel %vm3621_vm6, %v3606_v11, %v8727_v56  ;;  %v7002_v49 = vld [vmem:[#allocation3 + $0x8] ss:$0 sps:$4 sm:$0x11]  }
 0x341   : > { %v3732_v46 = vsel %vm3720_vm0, %v3699_v28, %v3472_v47  ;;  %v3544_v47 = vsel %vm1708_vm15, %v3512_v61, %v8699_v32  ;;  %v3672_v23 = vsel %vm3654_vm5, %v3639_v13, %v8663_v58  ;;  %v4836_v28 = vshll.u32 %v7002_v49, 16  ;;  %v7003_v13 = vld [vmem:[#allocation3 + $0xcc] sm:$0xff]  }
 0x342   : > { %6805 = vmatmul.mubr.msk.bf16.gmra.mrb[24].mxu1 %vm3753_vm3, %v3732_v46  ;;  %v3576_v56 = vsel %vm1774_vm7, %v3544_v47, %v8661_v48  ;;  %v3705_v32 = vsel %vm3687_vm10, %v3672_v23, %v8769_v10  ;;  %v7062_v46 = vld [vmem:[#allocation3 + $0x90] sm:$0xff]   ;;  %v5053_v47 = vrot.slane %v7002_v49, 1  ;;  %5286 = vrot.lane.b32.xlu1 %v7003_v13, %s7090_s22 }
 0x343   : > { %v3158_v62 = vpop.permute.xlu1 %3157  ;;  %6808 = vmatprep.mubr.msk.bf16.mxu1 %vm3753_vm3, %v3734_v45  ;;  %v3400_v12 = vpop.permute.xlu0 %3399  ;;  %v3608_v9 = vsel %vm10145_vm2, %v3576_v56, %v8743_v24  ;;  %vm10147_vm2 = vmmov %vm10140_vm1 }
 0x344   : > { %v3508_v29 = vsel %vm1642_vm13, %v8688_v7, %v3158_v62 }
 0x345   : > { %v3540_v31 = vsel %vm1708_vm15, %v3508_v29, %v3238_v6  ;;  %v7060_v6 = vld [vmem:[#allocation3 + $0x78] sm:$0xff]  }
 0x346   : > { %v3572_v33 = vsel %vm1774_vm7, %v3540_v31, %v3275_v41  ;;  %v3514_v58 = vsel %vm1642_vm13, %v7060_v6, %v8753_v0  ;;  %v3641_v0 = vsel %vm3621_vm6, %v3608_v9, %v8694_v3 }
 0x347   : > { %v3604_v19 = vsel %vm10140_vm1, %v3572_v33, %v3322_v57  ;;  %v3330_v20 = vpop.permute.xlu1 %3329  ;;  %v3447_v43 = vpop.permute.xlu0 %3446  ;;  %v3546_v10 = vsel %vm1708_vm15, %v3514_v58, %v8710_v59  ;;  %v3674_v57 = vsel %vm3654_vm5, %v3641_v0, %v8801_v14 }
 0x348   : > { %v3637_v42 = vsel %vm3621_vm6, %v3604_v19, %v3357_v38  ;;  %v3707_v50 = vsel %vm3687_vm10, %v3674_v57, %v8893_v36 }
 0x349   : > { %v3670_v7 = vsel %vm3654_vm5, %v3637_v42, %v8668_v35  ;;  %v3738_v35 = vsel %vm3720_vm0, %v3705_v32, %v8701_v17  ;;  %v3740_v14 = vsel %vm3720_vm0, %v3707_v50, %v8834_v34  ;;  %v7001_v34 = vld [vmem:[#allocation3] sm:$0xff]  }
 0x34a   : > { %v3703_v41 = vsel %vm3687_vm10, %v3670_v7, %v8775_v53  ;;  %v7061_v53 = vld [vmem:[#allocation3 + $0x84] sm:$0xff]   ;;  %v4829_v55 = vshrl.u32 %v7001_v34, 16  ;;  %v5052_v29 = vrot.slane %v7001_v34, 1 }
 0x34b   : > { %v3365_v30 = vpop.permute.xlu1 %3364  ;;  %v3482_v48 = vpop.permute.xlu0 %3481  ;;  %v3736_v38 = vsel %vm3720_vm0, %v3703_v41, %v8720_v52  ;;  %v3516_v24 = vsel %vm1642_vm13, %v7061_v53, %v8899_v37  ;;  %v3578_v52 = vsel %vm1774_vm7, %v3546_v10, %v8795_v25 }
 0x34c   : > { %6809 = vmatmul.mubr.msk.bf16.gmra.mrb[28].mxu1 %vm3753_vm3, %v3736_v38  ;;  %v3610_v59 = vsel %vm10146_vm14, %v3578_v52, %v3328_v15  ;;  %v3548_v3 = vsel %vm1708_vm15, %v3516_v24, %v8824_v8  ;;  %vm10148_vm14 = vmmov %vm10140_vm1 }
 0x34d   : > { %6812 = vmatprep.mubr.msk.bf16.mxu1 %vm3753_vm3, %v3738_v35  ;;  %v3643_v5 = vsel %vm3621_vm6, %v3610_v59, %v3363_v63  ;;  %v3580_v51 = vsel %vm1774_vm7, %v3548_v3, %v8793_v22  ;;  %v4831_v63 = vshll.u32 %v7001_v34, 16 }
 0x34e   : > { %v3676_v37 = vsel %vm3654_vm5, %v3643_v5, %v3400_v12  ;;  %v3612_v8 = vsel %vm10140_vm1, %v3580_v51, %v3330_v20  ;;  %v4838_v12 = vrot.slane %v4836_v28, 1  ;;  %v5054_v20 = vsel %vm1290_vm8, %v5052_v29, %v5053_v47 }
 0x34f   : > { %v3402_v39 = vpop.permute.xlu1 %3401  ;;  %v3484_v17 = vpop.permute.xlu0 %3483  ;;  %v3709_v60 = vsel %vm3687_vm10, %v3676_v37, %v3447_v43  ;;  %v3645_v15 = vsel %vm3621_vm6, %v3612_v8, %v3365_v30  ;;  %v4833_v11 = vrot.slane %v4831_v63, 1 }
 0x350   : > { %v3742_v36 = vsel %vm3720_vm0, %v3709_v60, %v3482_v48  ;;  %v3678_v44 = vsel %vm3654_vm5, %v3645_v15, %v3402_v39 }
 0x351   : > { %v4834_v62 = vor.u32 %v4833_v11, %v4829_v55 }
 0x353   : > { %v3449_v25 = vpop.permute.xlu1 %3448  ;;  %v3248_v16 = vpop.permute.xlu0 %3247  ;;  %v4839_v33 = vsel %vm1065_vm11, %v4834_v62, %v4838_v12  ;;  %v9090_v12 = vld [vmem:[%s9988_s2 + $0x3] ss:$0 sm:$0xff] }
 0x354   : > { %6813 = vmatmul.mubr.msk.bf16.gmra.mrb[32].mxu1 %vm3753_vm3, %v3740_v14  ;;  %v3711_v27 = vsel %vm3687_vm10, %v3678_v44, %v3449_v25  ;;  %5020 = vrot.lane.b32.xlu0 %v4839_v33, %s7082_s24 }
 0x355   : > { %6816 = vmatprep.mubr.msk.bf16.mxu1 %vm3753_vm3, %v3742_v36  ;;  %v3744_v22 = vsel %vm3720_vm0, %v3711_v27, %v3484_v17 }
 0x357   : > { %v3168_v18 = vpop.permute.xlu1 %3167  ;;  %v3285_v1 = vpop.permute.xlu0 %3284 }
 0x358   : > { %v3518_v54 = vsel %vm1642_vm13, %v7062_v46, %v3168_v18  ;;  %5100 = vrot.lane.b32.xlu0 %v5054_v20, %s7088_s16 }
 0x359   : > { %v3550_v31 = vsel %vm1708_vm15, %v3518_v54, %v3248_v16 }
 0x35a   : > { %v3582_v43 = vsel %vm1774_vm7, %v3550_v31, %v3285_v1 }
 0x35b   : > { %v3170_v4 = vpop.permute.xlu1 %3169  ;;  %v3332_v2 = vpop.permute.xlu0 %3331 }
 0x35c   : > { %6817 = vmatmul.mubr.msk.bf16.gmra.mrb[36].mxu1 %vm3753_vm3, %v3744_v22  ;;  %v3614_v7 = vsel %vm10147_vm2, %v3582_v43, %v3332_v2  ;;  %v3520_v48 = vsel %vm1642_vm13, %v8765_v26, %v3170_v4  ;;  %vm10149_vm2 = vmmov %vm10140_vm1 }
 0x35f   : > { %v3250_v61 = vpop.permute.xlu1 %3249  ;;  %v3367_v45 = vpop.permute.xlu0 %3366 }
 0x360   : > { %v3647_v32 = vsel %vm3621_vm6, %v3614_v7, %v3367_v45  ;;  %v3552_v38 = vsel %vm1708_vm15, %v3520_v48, %v3250_v61 }
 0x363   : > { %v3287_v23 = vpop.permute.xlu1 %3286  ;;  %v3404_v19 = vpop.permute.xlu0 %3403 }
 0x364   : > { %v3680_v41 = vsel %vm3654_vm5, %v3647_v32, %v3404_v19  ;;  %v3584_v0 = vsel %vm1774_vm7, %v3552_v38, %v3287_v23 }
 0x367   : > { %v3334_v56 = vpop.permute.xlu1 %3333  ;;  %v3451_v42 = vpop.permute.xlu0 %3450 }
 0x368   : > { %v3713_v6 = vsel %vm3687_vm10, %v3680_v41, %v3451_v42  ;;  %v3616_v53 = vsel %vm10148_vm14, %v3584_v0, %v3334_v56  ;;  %vm10153_vm14 = vcmask 60416  }
 0x36b   : > { %v3369_v58 = vpop.permute.xlu1 %3368  ;;  %v3486_v9 = vpop.permute.xlu0 %3485 }
 0x36c   : > { %v3746_v30 = vsel %vm3720_vm0, %v3713_v6, %v3486_v9  ;;  %v3649_v24 = vsel %vm3621_vm6, %v3616_v53, %v3369_v58 }
 0x36d   : > { %6820 = vmatprep.mubr.msk.bf16.mxu1 %vm3753_vm3, %v3746_v30 }
 0x36f   : > { %v3406_v35 = vpop.permute.xlu1 %3405  ;;  %v3488_v10 = vpop.permute.xlu0 %3487 }
 0x370   : > { %v3682_v52 = vsel %vm3654_vm5, %v3649_v24, %v3406_v35 }
 0x373   : > { %v3453_v57 = vpop.permute.xlu1 %3452  ;;  %v3252_v39 = vpop.permute.xlu0 %3251 }
 0x374   : > { %v3715_v17 = vsel %vm3687_vm10, %v3682_v52, %v3453_v57 }
 0x375   : > { %v3748_v50 = vsel %vm3720_vm0, %v3715_v17, %v3488_v10 }
 0x376   : > { %6821 = vmatmul.mubr.msk.bf16.gmra.mrb[40].mxu1 %vm3753_vm3, %v3748_v50 }
 0x377   : > { %v3172_v26 = vpop.permute.xlu1 %3171  ;;  %v3289_v59 = vpop.permute.xlu0 %3288 }
 0x378   : > { %v3522_v37 = vsel %vm1642_vm13, %v8807_v40, %v3172_v26  ;;  %v4541_v26 = vld [vmem:[#allocation3 + $0x18] sm:$0xf] }
 0x379   : > { %v3554_v16 = vsel %vm1708_vm15, %v3522_v37, %v3252_v39 }
 0x37a   : > { %v3586_v36 = vsel %vm1774_vm7, %v3554_v16, %v3289_v59  ;;  %v4534_v16 = vld [vmem:[#allocation3 + $0xc] sm:$0xf] }
 0x37b   : > { %v3174_v3 = vpop.permute.xlu1 %3173  ;;  %v3336_v5 = vpop.permute.xlu0 %3335 }
 0x37c   : > { %v3618_v44 = vsel %vm10140_vm1, %v3586_v36, %v3336_v5  ;;  %v3524_v22 = vsel %vm1642_vm13, %v8830_v21, %v3174_v3  ;;  %v9085_v21 = vld [vmem:[%s9988_s2 + $0x2] ss:$0 sm:$0xff]  ;;  %vm10154_vm1 = vmmov %vm10153_vm14 }
 0x37f   : > { %v3254_v60 = vpop.permute.xlu1 %3253  ;;  %v3371_v25 = vpop.permute.xlu0 %3370 }
 0x380   : > { %v3651_v18 = vsel %vm3621_vm6, %v3618_v44, %v3371_v25  ;;  %v3556_v49 = vsel %vm1708_vm15, %v3524_v22, %v3254_v60 }
 0x383   : > { %v3291_v14 = vpop.permute.xlu1 %3290  ;;  %v3408_v51 = vpop.permute.xlu0 %3407 }
 0x384   : > { %v3684_v1 = vsel %vm3654_vm5, %v3651_v18, %v3408_v51  ;;  %v3588_v63 = vsel %vm1774_vm7, %v3556_v49, %v3291_v14 }
 0x387   : > { %v3338_v8 = vpop.permute.xlu1 %3337  ;;  %v3455_v15 = vpop.permute.xlu0 %3454 }
 0x388   : > { %v3717_v27 = vsel %vm3687_vm10, %v3684_v1, %v3455_v15  ;;  %v3620_v11 = vsel %vm10149_vm2, %v3588_v63, %v3338_v8  ;;  %v4545_v15 = vld [vmem:[#allocation3 + $0x20] sm:$0x1]  ;;  %vm10155_vm2 = vmmov %vm10154_vm1 }
 0x38b   : > { %v3373_v34 = vpop.permute.xlu1 %3372  ;;  %v3490_v40 = vpop.permute.xlu0 %3489 }
 0x38c   : > { %v3750_v4 = vsel %vm3720_vm0, %v3717_v27, %v3490_v40  ;;  %v3653_v28 = vsel %vm3621_vm6, %v3620_v11, %v3373_v34 }
 0x38d   : > { %6824 = vmatprep.mubr.msk.bf16.mxu1 %vm3753_vm3, %v3750_v4  ;;  %v4538_v4 = vld [vmem:[#allocation3 + $0x14] sm:$0x1] }
 0x38f   : > { %v3410_v2 = vpop.permute.xlu1 %3409 }
 0x390   : > { %v3686_v46 = vsel %vm3654_vm5, %v3653_v28, %v3410_v2 }
 0x393   : > { %v3457_v55 = vpop.permute.xlu1 %3456 }
 0x394   : > { %v3719_v54 = vsel %vm3687_vm10, %v3686_v46, %v3457_v55 }
 0x397   : > { %v3492_v61 = vpop.permute.xlu1 %3491 }
 0x398   : > { %v3752_v45 = vsel %vm3720_vm0, %v3719_v54, %v3492_v61 }
 0x399   : > { %6825 = vmatmul.mubr.msk.bf16.gmra.mrb[44].mxu1 %vm3753_vm3, %v3752_v45 }
 0x3cd   : > { %v6798_v62 = vpop.f32.mrb[16].mxu1 }
 0x3ce   : > { %v4019_v13 = vmul.f32 %v6798_v62, %v9085_v21  ;;  %v3885_v29 = vpop.f32.mrb[17].mxu1 }
 0x3cf   : > { %v4017_v47 = vmul.f32 %v9085_v21, %v3885_v29  ;;  %v6799_v31 = vpop.f32.mrb[18].mxu1 }
 0x3d0   : > { %v4056_v33 = vadd.f32 %v9090_v12, %v4019_v13  ;;  %v4020_v23 = vmul.f32 %v6799_v31, %v9085_v21  ;;  %v3888_v19 = vpop.f32.mrb[19].mxu1 }
 0x3d1   : > { %v4054_v20 = vadd.f32 %v9090_v12, %v4017_v47  ;;  %v4018_v43 = vmul.f32 %v9085_v21, %v3888_v19 }
 0x3d2   : > { %v4088_v56 = vmax.f32 %v4056_v33, 0.0  ;;  %v4057_v42 = vadd.f32 %v9090_v12, %v4020_v23 }
 0x3d3   : > { %v4086_v7 = vmax.f32 %v4054_v20, 0.0  ;;  %v4055_v32 = vadd.f32 %v9090_v12, %v4018_v43 }
 0x3d4   : > { %v6598_v41 = vpack.c.bf16 %v4088_v56, %v4088_v56  ;;  %v4089_v6 = vmax.f32 %v4057_v42, 0.0 }
 0x3d5   : > { %v6596_v58 = vpack.c.bf16 %v4086_v7, %v4086_v7  ;;  %v4087_v9 = vmax.f32 %v4055_v32, 0.0 }
 0x3d6   : > { %v4232_v30 = vshrl.u32 %v6598_v41, 16  ;;  %v6599_v48 = vpack.c.bf16 %v4089_v6, %v4089_v6  ;;  %v4235_v0 = vshll.u32 %v6598_v41, 16 }
 0x3d7   : > { %v4215_v38 = vshrl.u32 %v6596_v58, 16  ;;  %v6597_v35 = vpack.c.bf16 %v4087_v9, %v4087_v9  ;;  %v4218_v52 = vshll.u32 %v6596_v58, 16 }
 0x3d8   : > { %v4234_v10 = vrot.slane %v4232_v30, 7  ;;  %v4240_v53 = vshrl.u32 %v6599_v48, 16  ;;  %v4243_v50 = vshll.u32 %v6599_v48, 16 }
 0x3d9   : > { %v4217_v24 = vrot.slane %v4215_v38, 7  ;;  %v4223_v57 = vshrl.u32 %v6597_v35, 16  ;;  %v4226_v5 = vshll.u32 %v6597_v35, 16 }
 0x3da   : > { %v4237_v39 = vor.u32 %v4235_v0, %v4234_v10  ;;  %v4242_v17 = vrot.slane %v4240_v53, 7  ;;  %v4238_v37 = vrot.slane %v4234_v10, 4 }
 0x3db   : > { %v4220_v59 = vor.u32 %v4218_v52, %v4217_v24  ;;  %v4225_v3 = vrot.slane %v4223_v57, 7  ;;  %v4221_v36 = vrot.slane %v4217_v24, 4 }
 0x3dc   : > { %v4542_v25 = vsel %vm8139_vm12, %v4237_v39, %v4541_v26  ;;  %v4245_v14 = vor.u32 %v4243_v50, %v4242_v17  ;;  %v4247_v51 = vrot.slane %v4242_v17, 4 }
 0x3dd   : > { %4543 = vst [vmem:[#allocation3 + $0x18] sm:$0xf] %v4542_v25  ;;  %v4535_v8 = vsel %vm8139_vm12, %v4220_v59, %v4534_v16  ;;  %v4228_v44 = vor.u32 %v4226_v5, %v4225_v3  ;;  %v4230_v18 = vrot.slane %v4225_v3, 4 }
 0x3de   : > { %4536 = vst [vmem:[#allocation3 + $0xc] sm:$0xf] %v4535_v8  ;;  %v4246_v27 = vsel %vm7186_vm9, %v4238_v37, %v4245_v14  ;;  %v4546_v40 = vsel %vm7815_vm4, %v4247_v51, %v4545_v15 }
 0x3df   : > { %4544 = vst.msk [vmem:[#allocation3 + $0x1c] sm:$0xf] %vm10153_vm14, %v4246_v27  ;;  %4547 = vst [vmem:[#allocation3 + $0x20] sm:$0x1] %v4546_v40  ;;  %v4229_v2 = vsel %vm7186_vm9, %v4221_v36, %v4228_v44  ;;  %v4539_v22 = vsel %vm7815_vm4, %v4230_v18, %v4538_v4  ;;  %v4555_v40 = vld [vmem:[#allocation3 + $0x30] sm:$0xf] }
 0x3e0   : > { %4537 = vst.msk [vmem:[#allocation3 + $0x10] sm:$0xf] %vm10154_vm1, %v4229_v2  ;;  %4540 = vst [vmem:[#allocation3 + $0x14] sm:$0x1] %v4539_v22 }
 0x3e1   : > { %vm10156_vm14 = vmmov %vm10154_vm1 }
 0x3e6   : > { %v7004_v49 = vld [vmem:[#allocation3 + $0x18] sm:$0xff]   ;;  %v7005_v63 = vld [vmem:[#allocation3 + $0x20] ss:$0 sps:$4 sm:$0x11]  }
 0x3e7   : > { %v7006_v55 = vld [vmem:[#allocation3 + $0xc] sm:$0xff]   ;;  %5256 = vrot.lane.b32.xlu0 %v7004_v49, %s7090_s22  ;;  %5139 = vrot.lane.b32.xlu1 %v7004_v49, %s7084_s28  ;;  %v5058_v11 = vrot.slane %v7004_v49, 1  ;;  %v7007_v28 = vld [vmem:[#allocation3 + $0x14] ss:$0 sps:$4 sm:$0x11]   ;;  %v5059_v46 = vrot.slane %v7005_v63, 1 }
 0x3e8   : > { %v4855_v54 = vshll.u32 %v7004_v49, 16  ;;  %v5055_v45 = vrot.slane %v7006_v55, 1  ;;  %v5056_v62 = vrot.slane %v7007_v28, 1  ;;  %v4853_v29 = vshrl.u32 %v7004_v49, 16 }
 0x3e9   : > { %v5060_v61 = vsel %vm1290_vm8, %v5058_v11, %v5059_v46  ;;  %v4860_v47 = vshll.u32 %v7005_v63, 16  ;;  %v4843_v23 = vshll.u32 %v7006_v55, 16  ;;  %v4841_v42 = vshrl.u32 %v7006_v55, 16 }
 0x3ea   : > { %v4857_v13 = vrot.slane %v4855_v54, 1  ;;  %v5057_v31 = vsel %vm1290_vm8, %v5055_v45, %v5056_v62  ;;  %v4848_v7 = vshll.u32 %v7007_v28, 16 }
 0x3eb   : > { %5221 = vrot.lane.b32.xlu1 %v5060_v61, %s7092_s25  ;;  %5137 = vrot.lane.b32.xlu0 %v7006_v55, %s7084_s28  ;;  %v4862_v19 = vrot.slane %v4860_v47, 1  ;;  %v4845_v43 = vrot.slane %v4843_v23, 1  ;;  %v4548_v55 = vld [vmem:[#allocation3 + $0x24] sm:$0xf]  ;;  %v4552_v47 = vld [vmem:[#allocation3 + $0x2c] sm:$0x1] }
 0x3ec   : > { %v4858_v33 = vor.u32 %v4857_v13, %v4853_v29  ;;  %v4850_v0 = vrot.slane %v4848_v7, 1  ;;  %v7024_v23 = vld [vmem:[%s9987_s1 + $0x80] sm:$0xff]  }
 0x3ed   : > { %v4846_v9 = vor.u32 %v4845_v43, %v4841_v42  ;;  %6828 = vmatprep.subr.bf16.mxu0 %v7024_v23  ;;  %v7026_v42 = vld [vmem:[%s9987_s1 + $0x90] sm:$0xff]  }
 0x3ee   : > { %v4863_v20 = vsel %vm1065_vm11, %v4858_v33, %v4862_v19  ;;  %6829 = vmatpush3.bf16.msra.mxu0 %v7024_v23  ;;  %v7025_v19 = vld [vmem:[%s9987_s1 + $0x88] sm:$0xff]  }
 0x3ef   : > { %5338 = vrot.lane.b32.xlu0 %v5060_v61, %s7091_s23  ;;  %5102 = vrot.lane.b32.xlu1 %v5057_v31, %s7088_s16  ;;  %v4851_v39 = vsel %vm1065_vm11, %v4846_v9, %v4850_v0  ;;  %v7027_v9 = vld [vmem:[%s9987_s1 + $0x98] sm:$0xff]  }
 0x3f0   : > { %6830 = vmatprep.subr.bf16.mxu0 %v7025_v19 }
 0x3f2   : > { %6831 = vmatpush3.bf16.msra.mxu0 %v7025_v19  ;;  %v7032_v19 = vld [vmem:[%s9987_s1 + $0xb0] sm:$0xff]  }
 0x3f3   : > { %5104 = vrot.lane.b32.xlu0 %v5060_v61, %s7088_s16  ;;  %5186 = vrot.lane.b32.xlu1 %v4863_v20, %s7087_s10  ;;  %v4559_v61 = vld [vmem:[#allocation3 + $0x38] sm:$0x1] }
 0x3f4   : > { %6832 = vmatprep.subr.bf16.mxu0 %v7026_v42 }
 0x3f5   : > { %v6802_v56 = vpop.f32.mrb[20].mxu1 }
 0x3f6   : > { %v4023_v32 = vmul.f32 %v6802_v56, %v9085_v21  ;;  %v3901_v41 = vpop.f32.mrb[21].mxu1  ;;  %6833 = vmatpush3.bf16.msra.mxu0 %v7026_v42 }
 0x3f7   : > { %v4021_v6 = vmul.f32 %v9085_v21, %v3901_v41  ;;  %v6803_v58 = vpop.f32.mrb[22].mxu1  ;;  %5219 = vrot.lane.b32.xlu0 %v5057_v31, %s7092_s25  ;;  %5024 = vrot.lane.b32.xlu1 %v4863_v20, %s7082_s24 }
 0x3f8   : > { %v4060_v30 = vadd.f32 %v9090_v12, %v4023_v32  ;;  %v4024_v48 = vmul.f32 %v6803_v58, %v9085_v21  ;;  %v3904_v38 = vpop.f32.mrb[23].mxu1  ;;  %6834 = vmatprep.subr.bf16.mxu0 %v7027_v9 }
 0x3f9   : > { %v4058_v35 = vadd.f32 %v9090_v12, %v4021_v6  ;;  %v4022_v10 = vmul.f32 %v9085_v21, %v3904_v38 }
 0x3fa   : > { %v4092_v53 = vmax.f32 %v4060_v30, 0.0  ;;  %v4061_v24 = vadd.f32 %v9090_v12, %v4024_v48  ;;  %6835 = vmatpush3.bf16.msra.mxu0 %v7027_v9 }
 0x3fb   : > { %v4090_v52 = vmax.f32 %v4058_v35, 0.0  ;;  %v4059_v57 = vadd.f32 %v9090_v12, %v4022_v10  ;;  %5303 = vrot.lane.b32.xlu0 %v4863_v20, %s7093_s26  ;;  %5022 = vrot.lane.b32.xlu1 %v4851_v39, %s7082_s24 }
 0x3fc   : > { %v6602_v17 = vpack.c.bf16 %v4092_v53, %v4092_v53  ;;  %v4093_v50 = vmax.f32 %v4061_v24, 0.0 }
 0x3fd   : > { %v6600_v26 = vpack.c.bf16 %v4090_v52, %v4090_v52  ;;  %v4091_v59 = vmax.f32 %v4059_v57, 0.0 }
 0x3fe   : > { %v4266_v3 = vshrl.u32 %v6602_v17, 16  ;;  %v6603_v5 = vpack.c.bf16 %v4093_v50, %v4093_v50  ;;  %v4269_v14 = vshll.u32 %v6602_v17, 16 }
 0x3ff   : > { %v4249_v37 = vshrl.u32 %v6600_v26, 16  ;;  %v6601_v25 = vpack.c.bf16 %v4091_v59, %v4091_v59  ;;  %5184 = vrot.lane.b32.xlu0 %v4851_v39, %s7087_s10  ;;  %v4252_v8 = vshll.u32 %v6600_v26, 16 }
 0x400   : > { %v4268_v16 = vrot.slane %v4266_v3, 7  ;;  %v4274_v51 = vshrl.u32 %v6603_v5, 16  ;;  %v4277_v27 = vshll.u32 %v6603_v5, 16 }
 0x401   : > { %v4251_v36 = vrot.slane %v4249_v37, 7  ;;  %v4257_v15 = vshrl.u32 %v6601_v25, 16  ;;  %v4260_v22 = vshll.u32 %v6601_v25, 16  ;;  %v7028_v37 = vld [vmem:[%s9987_s1 + $0xa0] sm:$0xff]  }
 0x402   : > { %v4271_v44 = vor.u32 %v4269_v14, %v4268_v16  ;;  %v4276_v18 = vrot.slane %v4274_v51, 7  ;;  %v4272_v49 = vrot.slane %v4268_v16, 4  ;;  %6836 = vmatprep.subr.bf16.mxu0 %v7028_v37 }
 0x403   : > { %v4254_v4 = vor.u32 %v4252_v8, %v4251_v36  ;;  %v4259_v2 = vrot.slane %v4257_v15, 7  ;;  %v4255_v46 = vrot.slane %v4251_v36, 4  ;;  %6837 = vmatpush3.bf16.msra.mxu0 %v7028_v37 }
 0x404   : > { %v4556_v63 = vsel %vm8139_vm12, %v4271_v44, %v4555_v40  ;;  %v4279_v11 = vor.u32 %v4277_v27, %v4276_v18  ;;  %v4281_v28 = vrot.slane %v4276_v18, 4 }
 0x405   : > { %4557 = vst [vmem:[#allocation3 + $0x30] sm:$0xf] %v4556_v63  ;;  %v4549_v54 = vsel %vm8139_vm12, %v4254_v4, %v4548_v55  ;;  %v4262_v45 = vor.u32 %v4260_v22, %v4259_v2  ;;  %v4264_v62 = vrot.slane %v4259_v2, 4  ;;  %v7030_v22 = vld [vmem:[%s9987_s1 + $0xa8] sm:$0xff]  }
 0x406   : > { %4550 = vst [vmem:[#allocation3 + $0x24] sm:$0xf] %v4549_v54  ;;  %v4280_v13 = vsel %vm7186_vm9, %v4272_v49, %v4279_v11  ;;  %v4560_v29 = vsel %vm7815_vm4, %v4281_v28, %v4559_v61  ;;  %6838 = vmatprep.subr.bf16.mxu0 %v7030_v22 }
 0x407   : > { %4558 = vst.msk [vmem:[#allocation3 + $0x34] sm:$0xf] %vm10155_vm2, %v4280_v13  ;;  %4561 = vst [vmem:[#allocation3 + $0x38] sm:$0x1] %v4560_v29  ;;  %v4263_v31 = vsel %vm7186_vm9, %v4255_v46, %v4262_v45  ;;  %v4553_v33 = vsel %vm7815_vm4, %v4264_v62, %v4552_v47  ;;  %6839 = vmatpush3.bf16.msra.mxu0 %v7030_v22 }
 0x408   : > { %4551 = vst.msk [vmem:[#allocation3 + $0x28] sm:$0xf] %vm10156_vm14, %v4263_v31  ;;  %4554 = vst [vmem:[#allocation3 + $0x2c] sm:$0x1] %v4553_v33  ;;  %6840 = vmatprep.subr.bf16.mxu0 %v7032_v19 }
 0x409   : > { %vm10157_vm2 = vmmov %vm10154_vm1 }
 0x40a   : > { %vm10158_vm14 = vmmov %vm10154_vm1 }
 0x40b   : > { %6841 = vmatpush3.bf16.msra.mxu0 %v7032_v19  ;;  %v4583_v19 = vld [vmem:[#allocation3 + $0x60] sm:$0xf] }
 0x40e   : > { %v7008_v20 = vld [vmem:[#allocation3 + $0x30] sm:$0xff]   ;;  %v7010_v56 = vld [vmem:[#allocation3 + $0x38] ss:$0 sps:$4 sm:$0x11]  }
 0x40f   : > { %v7009_v43 = vld [vmem:[#allocation3 + $0x24] sm:$0xff]   ;;  %5260 = vrot.lane.b32.xlu0 %v7008_v20, %s7090_s22  ;;  %5143 = vrot.lane.b32.xlu1 %v7008_v20, %s7084_s28  ;;  %v4879_v7 = vshll.u32 %v7008_v20, 16  ;;  %v5064_v41 = vrot.slane %v7008_v20, 1  ;;  %v5065_v6 = vrot.slane %v7010_v56, 1  ;;  %v4877_v10 = vshrl.u32 %v7008_v20, 16 }
 0x410   : > { %v4867_v32 = vshll.u32 %v7009_v43, 16  ;;  %v7011_v58 = vld [vmem:[#allocation3 + $0x2c] ss:$0 sps:$4 sm:$0x11]   ;;  %v5061_v48 = vrot.slane %v7009_v43, 1  ;;  %v4884_v17 = vshll.u32 %v7010_v56, 16 }
 0x411   : > { %v4881_v0 = vrot.slane %v4879_v7, 1  ;;  %v5066_v57 = vsel %vm1290_vm8, %v5064_v41, %v5065_v6  ;;  %v5062_v39 = vrot.slane %v7011_v58, 1  ;;  %v4865_v3 = vshrl.u32 %v7009_v43, 16 }
 0x412   : > { %v4869_v53 = vrot.slane %v4867_v32, 1  ;;  %v4872_v5 = vshll.u32 %v7011_v58, 16  ;;  %v4886_v4 = vrot.slane %v4884_v17, 1 }
 0x413   : > { %5141 = vrot.lane.b32.xlu0 %v7009_v43, %s7084_s28  ;;  %5258 = vrot.lane.b32.xlu1 %v7009_v43, %s7090_s22  ;;  %v4882_v36 = vor.u32 %v4881_v0, %v4877_v10  ;;  %v5063_v18 = vsel %vm1290_vm8, %v5061_v48, %v5062_v39  ;;  %v7034_v39 = vld [vmem:[%s9987_s1 + $0xb8] sm:$0xff]  }
 0x414   : > { %v4870_v8 = vor.u32 %v4869_v53, %v4865_v3  ;;  %v4874_v2 = vrot.slane %v4872_v5, 1  ;;  %v4562_v53 = vld [vmem:[#allocation3 + $0x3c] sm:$0xf]  ;;  %6842 = vmatprep.subr.bf16.mxu0 %v7034_v39 }
 0x415   : > { %v6806_v30 = vpop.f32.mrb[24].mxu1  ;;  %v9190_v28 = vsel %vm1065_vm11, %v4882_v36, %v4886_v4  ;;  %6843 = vmatpush3.bf16.msra.mxu0 %v7034_v39 }
 0x416   : > { %v4027_v38 = vmul.f32 %v6806_v30, %v9085_v21  ;;  %v3917_v35 = vpop.f32.mrb[25].mxu1  ;;  %v9193_v46 = vsel %vm1065_vm11, %v4870_v8, %v4874_v2  ;;  %v4569_v30 = vld [vmem:[#allocation3 + $0x48] sm:$0xf] }
 0x417   : > { %v4025_v24 = vmul.f32 %v9085_v21, %v3917_v35  ;;  %v6807_v52 = vpop.f32.mrb[26].mxu1  ;;  %5342 = vrot.lane.b32.xlu0 %v5066_v57, %s7091_s23  ;;  %5225 = vrot.lane.b32.xlu1 %v5066_v57, %s7092_s25 }
 0x418   : > { %v4064_v50 = vadd.f32 %v9090_v12, %v4027_v38  ;;  %v4028_v26 = vmul.f32 %v6807_v52, %v9085_v21  ;;  %v3920_v59 = vpop.f32.mrb[27].mxu1 }
 0x419   : > { %v4062_v25 = vadd.f32 %v9090_v12, %v4025_v24  ;;  %v4026_v16 = vmul.f32 %v9085_v21, %v3920_v59 }
 0x41a   : > { %v4096_v14 = vmax.f32 %v4064_v50, 0.0  ;;  %v4065_v51 = vadd.f32 %v9090_v12, %v4028_v26  ;;  %v4573_v50 = vld [vmem:[#allocation3 + $0x50] sm:$0x1] }
 0x41b   : > { %v4094_v15 = vmax.f32 %v4062_v25, 0.0  ;;  %v4063_v44 = vadd.f32 %v9090_v12, %v4026_v16  ;;  %5108 = vrot.lane.b32.xlu0 %v5066_v57, %s7088_s16  ;;  %5106 = vrot.lane.b32.xlu1 %v5063_v18, %s7088_s16  ;;  %v4566_v25 = vld [vmem:[#allocation3 + $0x44] sm:$0x1] }
 0x41c   : > { %v6606_v27 = vpack.c.bf16 %v4096_v14, %v4096_v14  ;;  %v4097_v40 = vmax.f32 %v4065_v51, 0.0 }
 0x41d   : > { %v6604_v49 = vpack.c.bf16 %v4094_v15, %v4094_v15  ;;  %v4095_v63 = vmax.f32 %v4063_v44, 0.0 }
 0x41e   : > { %v4300_v55 = vshrl.u32 %v6606_v27, 16  ;;  %v6607_v11 = vpack.c.bf16 %v4097_v40, %v4097_v40  ;;  %v4303_v54 = vshll.u32 %v6606_v27, 16 }
 0x41f   : > { %v4283_v61 = vshrl.u32 %v6604_v49, 16  ;;  %v4286_v45 = vshll.u32 %v6604_v49, 16  ;;  %v6605_v62 = vpack.c.bf16 %v4095_v63, %v4095_v63  ;;  %v6810_v13 = vpop.f32.mrb[28].mxu1  ;;  %5190 = vrot.lane.b32.xlu1 %v9190_v28, %s7087_s10  ;;  %5340 = vrot.lane.b32.xlu0 %v5063_v18, %s7091_s23 }
 0x420   : > { %v4302_v29 = vrot.slane %v4300_v55, 7  ;;  %v4308_v47 = vshrl.u32 %v6607_v11, 16  ;;  %v4311_v31 = vshll.u32 %v6607_v11, 16  ;;  %v4031_v33 = vmul.f32 %v6810_v13, %v9085_v21  ;;  %v3933_v23 = vpop.f32.mrb[29].mxu1 }
 0x421   : > { %v4285_v20 = vrot.slane %v4283_v61, 7  ;;  %v4291_v43 = vshrl.u32 %v6605_v62, 16  ;;  %v4294_v56 = vshll.u32 %v6605_v62, 16  ;;  %v4029_v42 = vmul.f32 %v9085_v21, %v3933_v23  ;;  %v6811_v7 = vpop.f32.mrb[30].mxu1 }
 0x422   : > { %v4305_v32 = vor.u32 %v4303_v54, %v4302_v29  ;;  %v4306_v41 = vrot.slane %v4302_v29, 4  ;;  %v4310_v6 = vrot.slane %v4308_v47, 7  ;;  %v4068_v58 = vadd.f32 %v9090_v12, %v4031_v33  ;;  %v3936_v9 = vpop.f32.mrb[31].mxu1 }
 0x423   : > { %v4288_v48 = vor.u32 %v4286_v45, %v4285_v20  ;;  %v4289_v38 = vrot.slane %v4285_v20, 4  ;;  %v4293_v35 = vrot.slane %v4291_v43, 7  ;;  %v4066_v10 = vadd.f32 %v9090_v12, %v4029_v42  ;;  %5028 = vrot.lane.b32.xlu1 %v9190_v28, %s7082_s24  ;;  %5223 = vrot.lane.b32.xlu0 %v5063_v18, %s7092_s25 }
 0x424   : > { %v4570_v0 = vsel %vm8139_vm12, %v4305_v32, %v4569_v30  ;;  %v4313_v24 = vor.u32 %v4311_v31, %v4310_v6  ;;  %v4315_v52 = vrot.slane %v4310_v6, 4  ;;  %v4100_v57 = vmax.f32 %v4068_v58, 0.0 }
 0x425   : > { %4571 = vst [vmem:[#allocation3 + $0x48] sm:$0xf] %v4570_v0  ;;  %v4563_v17 = vsel %vm8139_vm12, %v4288_v48, %v4562_v53  ;;  %v4296_v26 = vor.u32 %v4294_v56, %v4293_v35  ;;  %v4298_v59 = vrot.slane %v4293_v35, 4  ;;  %v4098_v3 = vmax.f32 %v4066_v10, 0.0 }
 0x426   : > { %4564 = vst [vmem:[#allocation3 + $0x3c] sm:$0xf] %v4563_v17  ;;  %v4314_v5 = vsel %vm7186_vm9, %v4306_v41, %v4313_v24  ;;  %v4574_v37 = vsel %vm7815_vm4, %v4315_v52, %v4573_v50  ;;  %v6610_v16 = vpack.c.bf16 %v4100_v57, %v4100_v57  ;;  %v4032_v14 = vmul.f32 %v6811_v7, %v9085_v21  ;;  %v4576_v7 = vld [vmem:[#allocation3 + $0x54] sm:$0xf] }
 0x427   : > { %4572 = vst.msk [vmem:[#allocation3 + $0x4c] sm:$0xf] %vm10154_vm1, %v4314_v5  ;;  %4575 = vst [vmem:[#allocation3 + $0x50] sm:$0x1] %v4574_v37  ;;  %v4297_v51 = vsel %vm7186_vm9, %v4289_v38, %v4296_v26  ;;  %v4567_v36 = vsel %vm7815_vm4, %v4298_v59, %v4566_v25  ;;  %v6608_v8 = vpack.c.bf16 %v4098_v3, %v4098_v3  ;;  %v6814_v44 = vpop.f32.mrb[32].mxu1  ;;  %5307 = vrot.lane.b32.xlu0 %v9190_v28, %s7093_s26 }
 0x428   : > { %v4030_v15 = vmul.f32 %v9085_v21, %v3936_v9  ;;  %4565 = vst.msk [vmem:[#allocation3 + $0x40] sm:$0xf] %vm10157_vm2, %v4297_v51  ;;  %4568 = vst [vmem:[#allocation3 + $0x44] sm:$0x1] %v4567_v36  ;;  %v4334_v18 = vshrl.u32 %v6610_v16, 16  ;;  %v4337_v27 = vshll.u32 %v6610_v16, 16  ;;  %v4069_v40 = vadd.f32 %v9090_v12, %v4032_v14  ;;  %5305 = vrot.lane.b32.xlu1 %v9193_v46, %s7093_s26 }
 0x429   : > { %v4035_v4 = vmul.f32 %v6814_v44, %v9085_v21  ;;  %v3949_v2 = vpop.f32.mrb[33].mxu1  ;;  %v4317_v22 = vshrl.u32 %v6608_v8, 16  ;;  %v4320_v49 = vshll.u32 %v6608_v8, 16  ;;  %v4587_v36 = vld [vmem:[#allocation3 + $0x68] sm:$0x1]  ;;  %vm10159_vm2 = vmmov %vm10154_vm1 }
 0x42a   : > { %v4067_v63 = vadd.f32 %v9090_v12, %v4030_v15  ;;  %v4033_v55 = vmul.f32 %v9085_v21, %v3949_v2  ;;  %v6815_v11 = vpop.f32.mrb[34].mxu1  ;;  %v4336_v54 = vrot.slane %v4334_v18, 7  ;;  %v4101_v61 = vmax.f32 %v4069_v40, 0.0 }
 0x42b   : > { %v4072_v45 = vadd.f32 %v9090_v12, %v4035_v4  ;;  %v4036_v62 = vmul.f32 %v6815_v11, %v9085_v21  ;;  %v3952_v13 = vpop.f32.mrb[35].mxu1  ;;  %v4319_v29 = vrot.slane %v4317_v22, 7  ;;  %5188 = vrot.lane.b32.xlu0 %v9193_v46, %s7087_s10  ;;  %v4580_v4 = vld [vmem:[#allocation3 + $0x5c] sm:$0x1] }
 0x42c   : > { %v4099_v28 = vmax.f32 %v4067_v63, 0.0  ;;  %v4070_v47 = vadd.f32 %v9090_v12, %v4033_v55  ;;  %v4034_v31 = vmul.f32 %v9085_v21, %v3952_v13  ;;  %v4339_v33 = vor.u32 %v4337_v27, %v4336_v54  ;;  %5026 = vrot.lane.b32.xlu1 %v9193_v46, %s7082_s24  ;;  %v4597_v55 = vld [vmem:[#allocation3 + $0x78] sm:$0xf] }
 0x42d   : > { %v4340_v23 = vrot.slane %v4336_v54, 4  ;;  %v6611_v20 = vpack.c.bf16 %v4101_v61, %v4101_v61  ;;  %v4104_v43 = vmax.f32 %v4072_v45, 0.0  ;;  %v4322_v56 = vor.u32 %v4320_v49, %v4319_v29  ;;  %v4590_v61 = vld [vmem:[#allocation3 + $0x6c] sm:$0xf] }
 0x42e   : > { %v4323_v42 = vrot.slane %v4319_v29, 4  ;;  %v6609_v32 = vpack.c.bf16 %v4099_v28, %v4099_v28  ;;  %v4102_v41 = vmax.f32 %v4070_v47, 0.0  ;;  %v4584_v6 = vsel %vm8139_vm12, %v4339_v33, %v4583_v19  ;;  %v9245_v48 = vld [vmem:[#allocation3 + $0x48] sm:$0xff]   ;;  %v9278_v28 = vld [vmem:[#allocation3 + $0x50] ss:$0 sps:$4 sm:$0x11]  }
 0x42f   : > { %v4342_v58 = vshrl.u32 %v6611_v20, 16  ;;  %v4345_v9 = vshll.u32 %v6611_v20, 16  ;;  %v6614_v30 = vpack.c.bf16 %v4104_v43, %v4104_v43  ;;  %4585 = vst [vmem:[#allocation3 + $0x60] sm:$0xf] %v4584_v6  ;;  %v4577_v38 = vsel %vm8139_vm12, %v4322_v56, %v4576_v7  ;;  %v6818_v0 = vpop.f32.mrb[36].mxu1  ;;  %5264 = vrot.lane.b32.xlu0 %v9245_v48, %s7090_s22  ;;  %v9257_v51 = vld [vmem:[#allocation3 + $0x3c] sm:$0xff]  }
 0x430   : > { %v4325_v35 = vshrl.u32 %v6609_v32, 16  ;;  %v4328_v10 = vshll.u32 %v6609_v32, 16  ;;  %v6612_v46 = vpack.c.bf16 %v4102_v41, %v4102_v41  ;;  %4578 = vst [vmem:[#allocation3 + $0x54] sm:$0xf] %v4577_v38  ;;  %v4073_v57 = vadd.f32 %v9090_v12, %v4036_v62  ;;  %v3965_v39 = vpop.f32.mrb[37].mxu1  ;;  %5147 = vrot.lane.b32.xlu1 %v9245_v48, %s7084_s28 }
 0x431   : > { %v4344_v53 = vrot.slane %v4342_v58, 7  ;;  %v4368_v24 = vshrl.u32 %v6614_v30, 16  ;;  %v4371_v52 = vshll.u32 %v6614_v30, 16  ;;  %v4071_v59 = vadd.f32 %v9090_v12, %v4034_v31  ;;  %v6819_v3 = vpop.f32.mrb[38].mxu1 }
 0x432   : > { %v4327_v17 = vrot.slane %v4325_v35, 7  ;;  %v4351_v50 = vshrl.u32 %v6612_v46, 16  ;;  %v4354_v26 = vshll.u32 %v6612_v46, 16  ;;  %v4105_v16 = vmax.f32 %v4073_v57, 0.0  ;;  %v3968_v14 = vpop.f32.mrb[39].mxu1 }
 0x433   : > { %v4347_v5 = vor.u32 %v4345_v9, %v4344_v53  ;;  %v4349_v37 = vrot.slane %v4344_v53, 4  ;;  %v9255_v25 = vrot.slane %v4368_v24, 7  ;;  %v4103_v18 = vmax.f32 %v4071_v59, 0.0  ;;  %5145 = vrot.lane.b32.xlu0 %v9257_v51, %s7084_s28  ;;  %v4601_v24 = vld [vmem:[#allocation3 + $0x80] sm:$0x1] }
 0x434   : > { %v4330_v8 = vor.u32 %v4328_v10, %v4327_v17  ;;  %v4332_v15 = vrot.slane %v4327_v17, 4  ;;  %v4353_v44 = vrot.slane %v4351_v50, 7  ;;  %5262 = vrot.lane.b32.xlu1 %v9257_v51, %s7090_s22  ;;  %v6615_v62 = vpack.c.bf16 %v4105_v16, %v4105_v16  ;;  %v9299_v16 = vld [vmem:[#allocation3 + $0x44] ss:$0 sps:$4 sm:$0x11]  }
 0x435   : > { %v4348_v27 = vsel %vm7186_vm9, %v4340_v23, %v4347_v5  ;;  %v4588_v40 = vsel %vm7815_vm4, %v4349_v37, %v4587_v36  ;;  %v4373_v2 = vor.u32 %v4371_v52, %v9255_v25  ;;  %v4374_v22 = vrot.slane %v9255_v25, 4 }
 0x436   : > { %4586 = vst.msk [vmem:[#allocation3 + $0x64] sm:$0xf] %vm10158_vm14, %v4348_v27  ;;  %4589 = vst [vmem:[#allocation3 + $0x68] sm:$0x1] %v4588_v40  ;;  %v4331_v49 = vsel %vm7186_vm9, %v4323_v42, %v4330_v8  ;;  %v4581_v63 = vsel %vm7815_vm4, %v4332_v15, %v4580_v4  ;;  %v4356_v11 = vor.u32 %v4354_v26, %v4353_v44  ;;  %v4357_v54 = vrot.slane %v4353_v44, 4 }
 0x437   : > { %4579 = vst.msk [vmem:[#allocation3 + $0x58] sm:$0xf] %vm10154_vm1, %v4331_v49  ;;  %4582 = vst [vmem:[#allocation3 + $0x5c] sm:$0x1] %v4581_v63  ;;  %v4598_v45 = vsel %vm8139_vm12, %v4373_v2, %v4597_v55  ;;  %v6613_v13 = vpack.c.bf16 %v4103_v18, %v4103_v18  ;;  %v4039_v29 = vmul.f32 %v6818_v0, %v9085_v21  ;;  %v4376_v19 = vshrl.u32 %v6615_v62, 16 }
 0x438   : > { %4599 = vst [vmem:[#allocation3 + $0x78] sm:$0xf] %v4598_v45  ;;  %v4591_v47 = vsel %vm8139_vm12, %v4356_v11, %v4590_v61  ;;  %v4037_v31 = vmul.f32 %v9085_v21, %v3965_v39  ;;  %v4040_v33 = vmul.f32 %v6819_v3, %v9085_v21  ;;  %v4038_v23 = vmul.f32 %v9085_v21, %v3968_v14  ;;  %v4594_v39 = vld [vmem:[#allocation3 + $0x74] sm:$0x1]  ;;  %vm10160_vm14 = vmmov %vm10154_vm1 }
 0x439   : > { %4592 = vst [vmem:[#allocation3 + $0x6c] sm:$0xf] %v4591_v47  ;;  %v4379_v20 = vshll.u32 %v6615_v62, 16  ;;  %v4359_v43 = vshrl.u32 %v6613_v13, 16  ;;  %v4362_v56 = vshll.u32 %v6613_v13, 16  ;;  %v4076_v42 = vadd.f32 %v9090_v12, %v4039_v29 }
 0x43a   : > { %v4074_v7 = vadd.f32 %v9090_v12, %v4037_v31  ;;  %v4077_v32 = vadd.f32 %v9090_v12, %v4040_v33  ;;  %v4075_v41 = vadd.f32 %v9090_v12, %v4038_v23  ;;  %v4378_v6 = vrot.slane %v4376_v19, 7  ;;  %v4611_v13 = vld [vmem:[#allocation3 + $0x90] sm:$0xf]  ;;  %v4604_v29 = vld [vmem:[#allocation3 + $0x84] sm:$0xf] }
 0x43b   : > { %v4361_v58 = vrot.slane %v4359_v43, 7  ;;  %v5070_v9 = vrot.slane %v9245_v48, 1  ;;  %v5071_v30 = vrot.slane %v9278_v28, 1  ;;  %v4108_v38 = vmax.f32 %v4076_v42, 0.0  ;;  %v4615_v43 = vld [vmem:[#allocation3 + $0x98] sm:$0x1] }
 0x43c   : > { %v4106_v35 = vmax.f32 %v4074_v7, 0.0  ;;  %v4109_v10 = vmax.f32 %v4077_v32, 0.0  ;;  %v4107_v46 = vmax.f32 %v4075_v41, 0.0  ;;  %v4381_v0 = vor.u32 %v4379_v20, %v4378_v6 }
 0x43d   : > { %v4383_v53 = vrot.slane %v4378_v6, 4  ;;  %v4364_v52 = vor.u32 %v4362_v56, %v4361_v58  ;;  %v4366_v57 = vrot.slane %v4361_v58, 4  ;;  %v6618_v17 = vpack.c.bf16 %v4108_v38, %v4108_v38  ;;  %v4608_v56 = vld [vmem:[#allocation3 + $0x8c] sm:$0x1] }
 0x43e   : > { %v6616_v50 = vpack.c.bf16 %v4106_v35, %v4106_v35  ;;  %v6619_v26 = vpack.c.bf16 %v4109_v10, %v4109_v10  ;;  %v6617_v59 = vpack.c.bf16 %v4107_v46, %v4107_v46  ;;  %v4382_v3 = vsel %vm7186_vm9, %v4374_v22, %v4381_v0 }
 0x43f   : > { %v4602_v5 = vsel %vm7815_vm4, %v4383_v53, %v4601_v24  ;;  %v4365_v37 = vsel %vm7186_vm9, %v4357_v54, %v4364_v52  ;;  %v4595_v25 = vsel %vm7815_vm4, %v4366_v57, %v4594_v39  ;;  %4600 = vst.msk [vmem:[#allocation3 + $0x7c] sm:$0xf] %vm10159_vm2, %v4382_v3  ;;  %v4402_v14 = vshrl.u32 %v6618_v17, 16  ;;  %vm10161_vm2 = vmmov %vm10154_vm1 }
 0x440   : > { %4603 = vst [vmem:[#allocation3 + $0x80] sm:$0x1] %v4602_v5  ;;  %4593 = vst.msk [vmem:[#allocation3 + $0x70] sm:$0xf] %vm10160_vm14, %v4365_v37  ;;  %v4405_v36 = vshll.u32 %v6618_v17, 16  ;;  %v4385_v8 = vshrl.u32 %v6616_v50, 16  ;;  %v5072_v2 = vsel %vm1290_vm8, %v5070_v9, %v5071_v30 }
 0x441   : > { %4596 = vst [vmem:[#allocation3 + $0x74] sm:$0x1] %v4595_v25  ;;  %v4388_v15 = vshll.u32 %v6616_v50, 16  ;;  %v4410_v44 = vshrl.u32 %v6619_v26, 16  ;;  %v4413_v18 = vshll.u32 %v6619_v26, 16  ;;  %v4393_v27 = vshrl.u32 %v6617_v59, 16  ;;  %5346 = vrot.lane.b32.xlu0 %v5072_v2, %s7091_s23  ;;  %5229 = vrot.lane.b32.xlu1 %v5072_v2, %s7092_s25  ;;  %vm10162_vm14 = vmmov %vm10154_vm1 }
 0x442   : > { %v4404_v40 = vrot.slane %v4402_v14, 7  ;;  %v4387_v4 = vrot.slane %v4385_v8, 7  ;;  %v5067_v22 = vrot.slane %v9257_v51, 1  ;;  %v4396_v55 = vshll.u32 %v6617_v59, 16  ;;  %v9344_v25 = vld [vmem:[%s9988_s2 + $0x3] ss:$0 sm:$0xff] }
 0x443   : > { %v4412_v49 = vrot.slane %v4410_v44, 7  ;;  %v4395_v63 = vrot.slane %v4393_v27, 7  ;;  %v5068_v11 = vrot.slane %v9299_v16, 1  ;;  %v4903_v7 = vshll.u32 %v9245_v48, 16 }
 0x444   : > { %v4407_v54 = vor.u32 %v4405_v36, %v4404_v40  ;;  %v4408_v61 = vrot.slane %v4404_v40, 4  ;;  %v4390_v45 = vor.u32 %v4388_v15, %v4387_v4  ;;  %v4391_v62 = vrot.slane %v4387_v4, 4  ;;  %v9347_v36 = vpop.permute.xlu0 %5020 }
 0x445   : > { %v4415_v47 = vor.u32 %v4413_v18, %v4412_v49  ;;  %v4417_v31 = vrot.slane %v4412_v49, 4  ;;  %v4398_v33 = vor.u32 %v4396_v55, %v4395_v63  ;;  %v4400_v23 = vrot.slane %v4395_v63, 4  ;;  %5112 = vrot.lane.b32.xlu0 %v5072_v2, %s7088_s16 }
 0x446   : > { %v4612_v19 = vsel %vm8139_vm12, %v4407_v54, %v4611_v13  ;;  %v4605_v20 = vsel %vm8139_vm12, %v4390_v45, %v4604_v29  ;;  %v5069_v42 = vsel %vm1290_vm8, %v5067_v22, %v5068_v11  ;;  %v4901_v9 = vshrl.u32 %v9245_v48, 16 }
 0x447   : > { %4613 = vst [vmem:[#allocation3 + $0x90] sm:$0xf] %v4612_v19  ;;  %4606 = vst [vmem:[#allocation3 + $0x84] sm:$0xf] %v4605_v20  ;;  %v4416_v32 = vsel %vm7186_vm9, %v4408_v61, %v4415_v47  ;;  %v4616_v41 = vsel %vm7815_vm4, %v4417_v31, %v4615_v43  ;;  %v4399_v6 = vsel %vm7186_vm9, %v4391_v62, %v4398_v33  ;;  %5110 = vrot.lane.b32.xlu1 %v5069_v42, %s7088_s16  ;;  %v4625_v47 = vld [vmem:[#allocation3 + $0xa8] sm:$0xf] }
 0x448   : > { %v4609_v58 = vsel %vm7815_vm4, %v4400_v23, %v4608_v56  ;;  %4614 = vst.msk [vmem:[#allocation3 + $0x94] sm:$0xf] %vm10154_vm1, %v4416_v32  ;;  %4617 = vst [vmem:[#allocation3 + $0x98] sm:$0x1] %v4616_v41  ;;  %v4905_v30 = vrot.slane %v4903_v7, 1  ;;  %v4908_v38 = vshll.u32 %v9278_v28, 16  ;;  %v9354_v11 = vpop.permute.xlu0 %5100 }
 0x449   : > { %4607 = vst.msk [vmem:[#allocation3 + $0x88] sm:$0xf] %vm10161_vm2, %v4399_v6  ;;  %4610 = vst [vmem:[#allocation3 + $0x8c] sm:$0x1] %v4609_v58  ;;  %v4891_v35 = vshll.u32 %v9257_v51, 16  ;;  %v6822_v0 = vpop.f32.mrb[40].mxu1  ;;  %5344 = vrot.lane.b32.xlu0 %v5069_v42, %s7091_s23 }
 0x44a   : > { %v4906_v10 = vor.u32 %v4905_v30, %v4901_v9  ;;  %v4910_v46 = vrot.slane %v4908_v38, 1  ;;  %v4043_v53 = vmul.f32 %v6822_v0, %v9085_v21  ;;  %v3981_v24 = vpop.f32.mrb[41].mxu1  ;;  %v4889_v26 = vshrl.u32 %v9257_v51, 16  ;;  %v4618_v33 = vld [vmem:[#allocation3 + $0x9c] sm:$0xf]  ;;  %v9360_v32 = vld [vmem:[#allocation3 + $0x60] sm:$0xff]  }
 0x44b   : > { %v4893_v57 = vrot.slane %v4891_v35, 1  ;;  %v4041_v39 = vmul.f32 %v9085_v21, %v3981_v24  ;;  %v6823_v17 = vpop.f32.mrb[42].mxu1  ;;  %v4896_v59 = vshll.u32 %v9299_v16, 16  ;;  %v4629_v7 = vld [vmem:[#allocation3 + $0xb0] sm:$0x1]  ;;  %vm10163_vm2 = vcmask 261120  }
 0x44c   : > { %v4911_v52 = vsel %vm1065_vm11, %v4906_v10, %v4910_v46  ;;  %v4080_v48 = vadd.f32 %v9090_v12, %v4043_v53  ;;  %v4044_v28 = vmul.f32 %v6823_v17, %v9085_v21  ;;  %v3984_v50 = vpop.f32.mrb[43].mxu1  ;;  %v7018_v30 = vld [vmem:[#allocation3 + $0x68] ss:$0 sps:$4 sm:$0x11]   ;;  %v4622_v10 = vld [vmem:[#allocation3 + $0xa4] sm:$0x1]  ;;  %v9370_v46 = vpop.permute.xlu1 %5286 }
 0x44d   : > { %5194 = vrot.lane.b32.xlu1 %v4911_v52, %s7087_s10  ;;  %v4078_v3 = vadd.f32 %v9090_v12, %v4041_v39  ;;  %v4042_v5 = vmul.f32 %v9085_v21, %v3984_v50  ;;  %5227 = vrot.lane.b32.xlu0 %v5069_v42, %s7092_s25  ;;  %v4894_v8 = vor.u32 %v4893_v57, %v4889_v26  ;;  %v4898_v15 = vrot.slane %v4896_v59, 1 }
 0x44e   : > { %v4112_v37 = vmax.f32 %v4080_v48, 0.0  ;;  %v4081_v14 = vadd.f32 %v9344_v25, %v4044_v28  ;;  %v5076_v57 = vrot.slane %v9360_v32, 1  ;;  %v5077_v39 = vrot.slane %v7018_v30, 1  ;;  %v7019_v48 = vld [vmem:[#allocation3 + $0x5c] ss:$0 sps:$4 sm:$0x11]  }
 0x44f   : > { %v4110_v51 = vmax.f32 %v4078_v3, 0.0  ;;  %v4079_v16 = vadd.f32 %v9344_v25, %v4042_v5  ;;  %v4899_v4 = vsel %vm1065_vm11, %v4894_v8, %v4898_v15  ;;  %v4927_v28 = vshll.u32 %v9360_v32, 16 }
 0x450   : > { %v6622_v12 = vpack.c.bf16 %v4112_v37, %v4112_v37  ;;  %v4113_v21 = vmax.f32 %v4081_v14, 0.0  ;;  %v5078_v26 = vsel %vm1290_vm8, %v5076_v57, %v5077_v39  ;;  %v5074_v5 = vrot.slane %v7019_v48, 1 }
 0x451   : > { %5032 = vrot.lane.b32.xlu1 %v4911_v52, %s7082_s24  ;;  %v6620_v44 = vpack.c.bf16 %v4110_v51, %v4110_v51  ;;  %v4111_v18 = vmax.f32 %v4079_v16, 0.0  ;;  %5311 = vrot.lane.b32.xlu0 %v4911_v52, %s7093_s26  ;;  %v9382_v52 = vld [vmem:[#allocation3 + $0x54] sm:$0xff]   ;;  %v4929_v37 = vrot.slane %v4927_v28, 1  ;;  %v4925_v14 = vshrl.u32 %v9360_v32, 16 }
 0x452   : > { %v4436_v27 = vshrl.u32 %v6622_v12, 16  ;;  %v6623_v40 = vpack.c.bf16 %v4113_v21, %v4113_v21  ;;  %v4439_v63 = vshll.u32 %v6622_v12, 16  ;;  %v5073_v3 = vrot.slane %v9382_v52, 1 }
 0x453   : > { %v4419_v2 = vshrl.u32 %v6620_v44, 16  ;;  %v6621_v22 = vpack.c.bf16 %v4111_v18, %v4111_v18  ;;  %v4422_v61 = vshll.u32 %v6620_v44, 16  ;;  %v4932_v8 = vshll.u32 %v7018_v30, 16 }
 0x454   : > { %v4438_v49 = vrot.slane %v4436_v27, 7  ;;  %v4444_v55 = vshrl.u32 %v6623_v40, 16  ;;  %v4447_v29 = vshll.u32 %v6623_v40, 16  ;;  %v5075_v12 = vsel %vm1290_vm8, %v5073_v3, %v5074_v5 }
 0x455   : > { %5309 = vrot.lane.b32.xlu1 %v4899_v4, %s7093_s26  ;;  %v4421_v54 = vrot.slane %v4419_v2, 7  ;;  %v4427_v45 = vshrl.u32 %v6621_v22, 16  ;;  %5192 = vrot.lane.b32.xlu0 %v4899_v4, %s7087_s10  ;;  %v4430_v19 = vshll.u32 %v6621_v22, 16  ;;  %v4930_v21 = vor.u32 %v4929_v37, %v4925_v14  ;;  %v7064_v22 = vld [vmem:[#allocation3] sm:$0xff]  }
 0x456   : > { %v4441_v62 = vor.u32 %v4439_v63, %v4438_v49  ;;  %v4446_v13 = vrot.slane %v4444_v55, 7  ;;  %v4442_v20 = vrot.slane %v4438_v49, 4  ;;  %v4915_v15 = vshll.u32 %v9382_v52, 16 }
 0x457   : > { %v4424_v31 = vor.u32 %v4422_v61, %v4421_v54  ;;  %v4429_v23 = vrot.slane %v4427_v45, 7  ;;  %v4425_v41 = vrot.slane %v4421_v54, 4  ;;  %v4934_v44 = vrot.slane %v4932_v8, 1  ;;  %v7065_v54 = vld [vmem:[%s9988_s2 + $0x2] ss:$0 sm:$0xff] }
 0x458   : > { %v4626_v43 = vsel %vm8139_vm12, %v4441_v62, %v4625_v47  ;;  %v4449_v56 = vor.u32 %v4447_v29, %v4446_v13  ;;  %v4451_v42 = vrot.slane %v4446_v13, 4  ;;  %v4917_v40 = vrot.slane %v4915_v15, 1 }
 0x459   : > { %5030 = vrot.lane.b32.xlu1 %v4899_v4, %s7082_s24  ;;  %4627 = vst [vmem:[#allocation3 + $0xa8] sm:$0xf] %v4626_v43  ;;  %v4619_v6 = vsel %vm8139_vm12, %v4424_v31, %v4618_v33  ;;  %v4432_v58 = vor.u32 %v4430_v19, %v4429_v23  ;;  %v4434_v9 = vrot.slane %v4429_v23, 4  ;;  %5268 = vrot.lane.b32.xlu0 %v9360_v32, %s7090_s22  ;;  %v9372_v0 = vpop.permute.xlu0 %5256  ;;  %v9390_v50 = vpop.permute.xlu1 %5139  ;;  %v4913_v63 = vshrl.u32 %v9382_v52, 16 }
 0x45a   : > { %4620 = vst [vmem:[#allocation3 + $0x9c] sm:$0xf] %v4619_v6  ;;  %v4450_v38 = vsel %vm7186_vm9, %v4442_v20, %v4449_v56  ;;  %v4630_v35 = vsel %vm7815_vm4, %v4451_v42, %v4629_v7  ;;  %v4935_v27 = vsel %vm1065_vm11, %v4930_v21, %v4934_v44  ;;  %v5371_v49 = vsel %vm1642_vm13, %v7064_v22, %v9347_v36  ;;  %v9441_v21 = vld [vmem:[#allocation3 + $0x78] sm:$0xff]  }
 0x45b   : > { %4628 = vst.msk [vmem:[#allocation3 + $0xac] sm:$0xf] %vm10162_vm14, %v4450_v38  ;;  %4631 = vst [vmem:[#allocation3 + $0xb0] sm:$0x1] %v4630_v35  ;;  %v4433_v53 = vsel %vm7186_vm9, %v4425_v41, %v4432_v58  ;;  %v4623_v24 = vsel %vm7815_vm4, %v4434_v9, %v4622_v10  ;;  %v4920_v55 = vshll.u32 %v7019_v48, 16  ;;  %v4918_v29 = vor.u32 %v4917_v40, %v4913_v63 }
 0x45c   : > { %4621 = vst.msk [vmem:[#allocation3 + $0xa0] sm:$0xf] %vm10154_vm1, %v4433_v53  ;;  %4624 = vst [vmem:[#allocation3 + $0xa4] sm:$0x1] %v4623_v24  ;;  %v5403_v36 = vsel %vm1708_vm15, %v5371_v49, %v9354_v11  ;;  %v4639_v40 = vld [vmem:[#allocation3 + $0xc0] sm:$0xf] }
 0x45d   : > { %5151 = vrot.lane.b32.xlu1 %v9360_v32, %s7084_s28  ;;  %5149 = vrot.lane.b32.xlu0 %v9382_v52, %s7084_s28  ;;  %v5138_v17 = vpop.permute.xlu0 %5137  ;;  %v9400_v51 = vpop.permute.xlu1 %5221  ;;  %v4922_v43 = vrot.slane %v4920_v55, 1  ;;  %vm10165_vm14 = vmmov %vm10154_vm1 }
 0x45e   : > { %v5435_v58 = vsel %vm1774_vm7, %v5403_v36, %v5138_v17  ;;  %v4636_v36 = vld [vmem:[#allocation3 + $0xbc] sm:$0x1] }
 0x45f   : > { %v4923_v11 = vsel %vm1065_vm11, %v4918_v29, %v4922_v43 }
 0x461   : > { %5266 = vrot.lane.b32.xlu1 %v9382_v52, %s7090_s22  ;;  %5350 = vrot.lane.b32.xlu0 %v5078_v26, %s7091_s23  ;;  %v9394_v59 = vpop.permute.xlu0 %5338  ;;  %v9410_v4 = vpop.permute.xlu1 %5102 }
 0x465   : > { %5233 = vrot.lane.b32.xlu1 %v5078_v26, %s7092_s25  ;;  %5116 = vrot.lane.b32.xlu0 %v5078_v26, %s7088_s16  ;;  %v9402_v16 = vpop.permute.xlu0 %5104  ;;  %v9425_v7 = vpop.permute.xlu1 %5186 }
 0x469   : > { %5114 = vrot.lane.b32.xlu1 %v5075_v12, %s7088_s16  ;;  %5348 = vrot.lane.b32.xlu0 %v5075_v12, %s7091_s23  ;;  %v5220_v18 = vpop.permute.xlu0 %5219  ;;  %v9438_v37 = vpop.permute.xlu1 %5024 }
 0x46c   : > { %v6826_v2 = vpop.f32.mrb[44].mxu1 }
 0x46d   : > { %5198 = vrot.lane.b32.xlu1 %v4935_v27, %s7087_s10  ;;  %v4047_v61 = vmul.f32 %v7065_v54, %v6826_v2  ;;  %v3997_v45 = vpop.f32.mrb[45].mxu1  ;;  %5231 = vrot.lane.b32.xlu0 %v5075_v12, %s7092_s25  ;;  %v5304_v23 = vpop.permute.xlu0 %5303 }
 0x46e   : > { %v4045_v62 = vmul.f32 %v7065_v54, %v3997_v45  ;;  %v6827_v13 = vpop.f32.mrb[46].mxu1 }
 0x46f   : > { %v4084_v47 = vadd.f32 %v9344_v25, %v4047_v61  ;;  %v4048_v31 = vmul.f32 %v7065_v54, %v6827_v13  ;;  %v4000_v33 = vpop.f32.mrb[47].mxu1  ;;  %v4643_v13 = vld [vmem:[#allocation3 + $0xc8] sm:$0x1] }
 0x470   : > { %v4082_v19 = vadd.f32 %v9344_v25, %v4045_v62  ;;  %v4046_v20 = vmul.f32 %v7065_v54, %v4000_v33  ;;  %v4632_v54 = vld [vmem:[#allocation3 + $0xb4] sm:$0xf] }
 0x471   : > { %5036 = vrot.lane.b32.xlu1 %v4935_v27, %s7082_s24  ;;  %v4116_v56 = vmax.f32 %v4084_v47, 0.0  ;;  %v4085_v42 = vadd.f32 %v9344_v25, %v4048_v31  ;;  %5315 = vrot.lane.b32.xlu0 %v4935_v27, %s7093_s26  ;;  %v5185_v38 = vpop.permute.xlu0 %5184  ;;  %v7022_v27 = vld [vmem:[#allocation3 + $0x80] ss:$0 sps:$4 sm:$0x11]   ;;  %v9454_v31 = vld [vmem:[#allocation3 + $0x6c] sm:$0xff]  }
 0x472   : > { %v4114_v41 = vmax.f32 %v4082_v19, 0.0  ;;  %v4083_v6 = vadd.f32 %v9344_v25, %v4046_v20  ;;  %v5467_v53 = vsel %vm10163_vm2, %v5435_v58, %v5185_v38  ;;  %v5082_v19 = vrot.slane %v9441_v21, 1  ;;  %v5023_v20 = vpop.permute.xlu1 %5022 }
 0x473   : > { %v6626_v9 = vpack.c.bf16 %v4116_v56, %v4116_v56  ;;  %v4117_v30 = vmax.f32 %v4085_v42, 0.0  ;;  %v5499_v39 = vsel %vm3621_vm6, %v5467_v53, %v5220_v18  ;;  %v5083_v60 = vrot.slane %v7022_v27, 1  ;;  %v7023_v42 = vld [vmem:[#allocation3 + $0x74] ss:$0 sps:$4 sm:$0x11]  }
 0x474   : > { %v6624_v35 = vpack.c.bf16 %v4114_v41, %v4114_v41  ;;  %v4115_v10 = vmax.f32 %v4083_v6, 0.0  ;;  %v5531_v17 = vsel %vm3654_vm5, %v5499_v39, %v9372_v0  ;;  %v4951_v41 = vshll.u32 %v9441_v21, 16 }
 0x475   : > { %5313 = vrot.lane.b32.xlu1 %v4923_v11, %s7093_s26  ;;  %v4470_v24 = vshrl.u32 %v6626_v9, 16  ;;  %v6627_v57 = vpack.c.bf16 %v4117_v30, %v4117_v30  ;;  %5196 = vrot.lane.b32.xlu0 %v4923_v11, %s7087_s10  ;;  %v4473_v26 = vshll.u32 %v6626_v9, 16  ;;  %v5563_v5 = vsel %vm3687_vm10, %v5531_v17, %v5304_v23 }
 0x476   : > { %v4453_v25 = vshrl.u32 %v6624_v35, 16  ;;  %v6625_v48 = vpack.c.bf16 %v4115_v10, %v4115_v10  ;;  %v4456_v8 = vshll.u32 %v6624_v35, 16  ;;  %v5595_v15 = vsel %vm3720_vm0, %v5563_v5, %v9394_v59 }
 0x477   : > { %v4472_v28 = vrot.slane %v4470_v24, 7  ;;  %v4478_v3 = vshrl.u32 %v6627_v57, 16  ;;  %v4481_v0 = vshll.u32 %v6627_v57, 16  ;;  %6844 = vmatprep.mubr.msk.bf16.mxu0 %vm3753_vm3, %v5595_v15  ;;  %v5084_v6 = vsel %vm1290_vm8, %v5082_v19, %v5083_v60 }
 0x478   : > { %v4455_v14 = vrot.slane %v4453_v25, 7  ;;  %v4461_v12 = vshrl.u32 %v6625_v48, 16  ;;  %v4464_v49 = vshll.u32 %v6625_v48, 16  ;;  %v5079_v58 = vrot.slane %v9454_v31, 1 }
 0x479   : > { %5034 = vrot.lane.b32.xlu1 %v4923_v11, %s7082_s24  ;;  %v4475_v44 = vor.u32 %v4473_v26, %v4472_v28  ;;  %v4480_v18 = vrot.slane %v4478_v3, 7  ;;  %5272 = vrot.lane.b32.xlu0 %v9441_v21, %s7090_s22  ;;  %v4476_v63 = vrot.slane %v4472_v28, 4  ;;  %v5080_v11 = vrot.slane %v7023_v42, 1  ;;  %v7066_v26 = vld [vmem:[#allocation3 + $0xc] sm:$0xff]  }
 0x47a   : > { %v4458_v2 = vor.u32 %v4456_v8, %v4455_v14  ;;  %v4463_v22 = vrot.slane %v4461_v12, 7  ;;  %v4459_v45 = vrot.slane %v4455_v14, 4  ;;  %v4953_v9 = vrot.slane %v4951_v41, 1 }
 0x47b   : > { %v4640_v55 = vsel %vm8139_vm12, %v4475_v44, %v4639_v40  ;;  %v4483_v61 = vor.u32 %v4481_v0, %v4480_v18  ;;  %v4485_v59 = vrot.slane %v4480_v18, 4  ;;  %v4949_v30 = vshrl.u32 %v9441_v21, 16 }
 0x47c   : > { %4641 = vst [vmem:[#allocation3 + $0xc0] sm:$0xf] %v4640_v55  ;;  %v4633_v62 = vsel %vm8139_vm12, %v4458_v2, %v4632_v54  ;;  %v4466_v29 = vor.u32 %v4464_v49, %v4463_v22  ;;  %v4468_v47 = vrot.slane %v4463_v22, 4  ;;  %vm10164_vm12 = vmmov %vm10154_vm1  ;;  %v4956_v38 = vshll.u32 %v7022_v27, 16  ;;  %v7067_v54 = vld [vmem:[#allocation3 + $0x18] sm:$0xff]  }
 0x47d   : > { %5155 = vrot.lane.b32.xlu1 %v9441_v21, %s7084_s28  ;;  %4634 = vst [vmem:[#allocation3 + $0xb4] sm:$0xf] %v4633_v62  ;;  %v4484_v33 = vsel %vm7186_vm9, %v4476_v63, %v4483_v61  ;;  %v4644_v23 = vsel %vm7815_vm4, %v4485_v59, %v4643_v13  ;;  %5153 = vrot.lane.b32.xlu0 %v9454_v31, %s7084_s28  ;;  %v4939_v57 = vshll.u32 %v9454_v31, 16  ;;  %v4937_v5 = vshrl.u32 %v9454_v31, 16  ;;  %v9513_v63 = vld [vmem:[#allocation3 + $0x90] sm:$0xff]   ;;  %v9525_v13 = vld [vmem:[#allocation3 + $0x84] sm:$0xff]   ;;  %vm10168_vm1 = vmmov %vm10163_vm2 }
 0x47e   : > { %4642 = vst.msk [vmem:[#allocation3 + $0xc4] sm:$0xf] %vm10164_vm12, %v4484_v33  ;;  %4645 = vst [vmem:[#allocation3 + $0xc8] sm:$0x1] %v4644_v23  ;;  %v4467_v43 = vsel %vm7186_vm9, %v4459_v45, %v4466_v29  ;;  %v4637_v56 = vsel %vm7815_vm4, %v4468_v47, %v4636_v36  ;;  %v5081_v53 = vsel %vm1290_vm8, %v5079_v58, %v5080_v11  ;;  %v4958_v39 = vrot.slane %v4956_v38, 1 }
 0x47f   : > { %4635 = vst.msk [vmem:[#allocation3 + $0xb8] sm:$0xf] %vm10165_vm14, %v4467_v43  ;;  %4638 = vst [vmem:[#allocation3 + $0xbc] sm:$0x1] %v4637_v56  ;;  %v4954_v24 = vor.u32 %v4953_v9, %v4949_v30  ;;  %v4941_v28 = vrot.slane %v4939_v57, 1  ;;  %v5373_v3 = vsel %vm1642_vm13, %v7066_v26, %v5023_v20  ;;  %v4944_v14 = vshll.u32 %v7023_v42, 16 }
 0x480   : > { %v5405_v44 = vsel %vm1708_vm15, %v5373_v3, %v9410_v4  ;;  %vm10166_vm4 = vmmov %vm10163_vm2  ;;  %v5375_v61 = vsel %vm1642_vm13, %v7067_v54, %v9438_v37  ;;  %v5088_v37 = vrot.slane %v9513_v63, 1  ;;  %v7035_v36 = vld [vmem:[#allocation3 + $0x8c] ss:$0 sps:$4 sm:$0x11]   ;;  %v4975_v60 = vshll.u32 %v9513_v63, 16  ;;  %v9584_v54 = vld [vmem:[#allocation3 + $0x9c] sm:$0xff]  }
 0x481   : > { %5270 = vrot.lane.b32.xlu1 %v9454_v31, %s7090_s22  ;;  %5354 = vrot.lane.b32.xlu0 %v5084_v6, %s7091_s23  ;;  %v9474_v1 = vpop.permute.xlu1 %5143  ;;  %v9476_v34 = vpop.permute.xlu0 %5260  ;;  %v4959_v17 = vsel %vm1065_vm11, %v4954_v24, %v4958_v39  ;;  %v4942_v15 = vor.u32 %v4941_v28, %v4937_v5  ;;  %v4946_v18 = vrot.slane %v4944_v14, 1  ;;  %v5437_v40 = vsel %vm1774_vm7, %v5405_v44, %v9390_v50  ;;  %v7033_v50 = vld [vmem:[#allocation3 + $0x98] ss:$0 sps:$4 sm:$0x11]   ;;  %vm10167_vm9 = vmmov %vm10163_vm2 }
 0x482   : > { %v5469_v22 = vsel %vm10166_vm4, %v5437_v40, %v9425_v7  ;;  %v5407_v29 = vsel %vm1708_vm15, %v5375_v61, %v9402_v16  ;;  %v5089_v47 = vrot.slane %v7033_v50, 1  ;;  %v5085_v41 = vrot.slane %v9525_v13, 1  ;;  %v7068_v40 = vld [vmem:[#allocation3 + $0x24] sm:$0xff]   ;;  %vm10169_vm2 = vmmov %vm10168_vm1 }
 0x483   : > { %v4947_v2 = vsel %vm1065_vm11, %v4942_v15, %v4946_v18  ;;  %v5501_v55 = vsel %vm3621_vm6, %v5469_v22, %v9400_v51  ;;  %v4977_v58 = vrot.slane %v4975_v60, 1  ;;  %v4973_v9 = vshrl.u32 %v9513_v63, 16  ;;  %vm10170_vm12 = vmmov %vm10168_vm1 }
 0x484   : > { %v5090_v20 = vsel %vm1290_vm8, %v5088_v37, %v5089_v47  ;;  %v4980_v30 = vshll.u32 %v7033_v50, 16  ;;  %vm10171_vm14 = vmmov %vm10168_vm1 }
 0x485   : > { %5237 = vrot.lane.b32.xlu1 %v5084_v6, %s7092_s25  ;;  %5120 = vrot.lane.b32.xlu0 %v5084_v6, %s7088_s16  ;;  %v5259_v35 = vpop.permute.xlu1 %5258  ;;  %v5142_v10 = vpop.permute.xlu0 %5141  ;;  %v5086_v6 = vrot.slane %v7035_v36, 1  ;;  %v4978_v38 = vor.u32 %v4977_v58, %v4973_v9  ;;  %vm10174_vm4 = vmmov %vm10168_vm1 }
 0x486   : > { %v5533_v59 = vsel %vm3654_vm5, %v5501_v55, %v5259_v35  ;;  %v5439_v33 = vsel %vm1774_vm7, %v5407_v29, %v5142_v10  ;;  %v4963_v35 = vshll.u32 %v9525_v13, 16  ;;  %v4982_v24 = vrot.slane %v4980_v30, 1 }
 0x488   : > { %v4983_v57 = vsel %vm1065_vm11, %v4978_v38, %v4982_v24  ;;  %v4965_v39 = vrot.slane %v4963_v35, 1 }
 0x489   : > { %5118 = vrot.lane.b32.xlu1 %v5081_v53, %s7088_s16  ;;  %5352 = vrot.lane.b32.xlu0 %v5081_v53, %s7091_s23  ;;  %v9486_v25 = vpop.permute.xlu1 %5225  ;;  %v5343_v48 = vpop.permute.xlu0 %5342 }
 0x48d   : > { %5202 = vrot.lane.b32.xlu1 %v4959_v17, %s7087_s10  ;;  %5235 = vrot.lane.b32.xlu0 %v5081_v53, %s7092_s25  ;;  %v9493_v8 = vpop.permute.xlu1 %5106  ;;  %v9495_v12 = vpop.permute.xlu0 %5108 }
 0x491   : > { %5040 = vrot.lane.b32.xlu1 %v4959_v17, %s7082_s24  ;;  %5319 = vrot.lane.b32.xlu0 %v4959_v17, %s7093_s26  ;;  %v9501_v0 = vpop.permute.xlu1 %5190  ;;  %v5341_v27 = vpop.permute.xlu0 %5340  ;;  %v4968_v17 = vshll.u32 %v7035_v36, 16  ;;  %v7069_v36 = vld [vmem:[#allocation3 + $0x30] sm:$0xff]  }
 0x493   : > { %v4970_v5 = vrot.slane %v4968_v17, 1 }
 0x495   : > { %5317 = vrot.lane.b32.xlu1 %v4947_v2, %s7093_s26  ;;  %5200 = vrot.lane.b32.xlu0 %v4947_v2, %s7087_s10  ;;  %v9510_v4 = vpop.permute.xlu1 %5028  ;;  %v5224_v49 = vpop.permute.xlu0 %5223 }
 0x499   : > { %5038 = vrot.lane.b32.xlu1 %v4947_v2, %s7082_s24  ;;  %5276 = vrot.lane.b32.xlu0 %v9513_v63, %s7090_s22  ;;  %v5308_v45 = vpop.permute.xlu0 %5307 }
 0x49a   : > { %v5306_v7 = vpop.permute.xlu1 %5305 }
 0x49b   : > { %v5565_v62 = vsel %vm3687_vm10, %v5533_v59, %v5306_v7 }
 0x49c   : > { %v5597_v51 = vsel %vm3720_vm0, %v5565_v62, %v5341_v27  ;;  %v9573_v27 = vld [vmem:[#allocation3 + $0xa8] sm:$0xff]   ;;  %v7039_v62 = vld [vmem:[#allocation3 + $0xa4] ss:$0 sps:$4 sm:$0x11]  }
 0x49d   : > { %5159 = vrot.lane.b32.xlu1 %v9513_v63, %s7084_s28  ;;  %6845 = vmatmul.mubr.msk.bf16.vlgmr.msra.gmra.mrb[16].mxu0 %vm3753_vm3, %v5597_v51  ;;  %v5189_v23 = vpop.permute.xlu0 %5188  ;;  %v5094_v61 = vrot.slane %v9573_v27, 1 }
 0x49e   : > { %5157 = vrot.lane.b32.xlu0 %v9525_v13, %s7084_s28  ;;  %v5471_v19 = vsel %vm10167_vm9, %v5439_v33, %v5189_v23  ;;  %v5027_v56 = vpop.permute.xlu1 %5026  ;;  %v5091_v33 = vrot.slane %v9584_v54, 1  ;;  %v5092_v23 = vrot.slane %v7039_v62, 1  ;;  %vm10175_vm9 = vmmov %vm10168_vm1 }
 0x49f   : > { %v5503_v16 = vsel %vm3621_vm6, %v5471_v19, %v5224_v49  ;;  %v5377_v2 = vsel %vm1642_vm13, %v7068_v40, %v5027_v56  ;;  %v7038_v49 = vld [vmem:[#allocation3 + $0xb0] ss:$0 sps:$4 sm:$0x11]   ;;  %v5379_v19 = vsel %vm1642_vm13, %v7069_v36, %v9510_v4 }
 0x4a0   : > { %v5535_v43 = vsel %vm3654_vm5, %v5503_v16, %v9476_v34  ;;  %v5087_v34 = vsel %vm1290_vm8, %v5085_v41, %v5086_v6  ;;  %v5409_v55 = vsel %vm1708_vm15, %v5377_v2, %v9493_v8  ;;  %v5095_v59 = vrot.slane %v7038_v49, 1 }
 0x4a1   : > { %5274 = vrot.lane.b32.xlu1 %v9525_v13, %s7090_s22  ;;  %v5567_v42 = vsel %vm3687_vm10, %v5535_v43, %v5308_v45  ;;  %v9556_v53 = vpop.permute.xlu0 %5264  ;;  %v5441_v45 = vsel %vm1774_vm7, %v5409_v55, %v9474_v1  ;;  %v4999_v8 = vshll.u32 %v9573_v27, 16  ;;  %v5411_v41 = vsel %vm1708_vm15, %v5379_v19, %v9495_v12 }
 0x4a2   : > { %5358 = vrot.lane.b32.xlu0 %v5090_v20, %s7091_s23  ;;  %v5599_v11 = vsel %vm3720_vm0, %v5567_v42, %v5343_v48  ;;  %v9554_v10 = vpop.permute.xlu1 %5147  ;;  %v4961_v48 = vshrl.u32 %v9525_v13, 16  ;;  %v5096_v29 = vsel %vm1290_vm8, %v5094_v61, %v5095_v59  ;;  %v5473_v37 = vsel %vm10168_vm1, %v5441_v45, %v9501_v0  ;;  %v7070_v61 = vld [vmem:[#allocation3 + $0x3c] sm:$0xff]   ;;  %v9649_v45 = vld [vmem:[#allocation3 + $0xb4] sm:$0xff]  }
 0x4a3   : > { %6848 = vmatprep.mubr.msk.bf16.mxu0 %vm3753_vm3, %v5599_v11  ;;  %v5001_v1 = vrot.slane %v4999_v8, 1  ;;  %v5505_v16 = vsel %vm3621_vm6, %v5473_v37, %v9486_v25  ;;  %v4997_v0 = vshrl.u32 %v9573_v27, 16  ;;  %v4987_v42 = vshll.u32 %v9584_v54, 16 }
 0x4a4   : > { %v4966_v3 = vor.u32 %v4965_v39, %v4961_v48  ;;  %v5093_v6 = vsel %vm1290_vm8, %v5091_v33, %v5092_v23  ;;  %v5097_v33 = vrot.slane %v9649_v45, 1 }
 0x4a5   : > { %5241 = vrot.lane.b32.xlu1 %v5090_v20, %s7092_s25  ;;  %v5146_v26 = vpop.permute.xlu0 %5145  ;;  %v5002_v58 = vor.u32 %v5001_v1, %v4997_v0 }
 0x4a6   : > { %5124 = vrot.lane.b32.xlu0 %v5090_v20, %s7088_s16  ;;  %v5263_v28 = vpop.permute.xlu1 %5262  ;;  %v4971_v14 = vsel %vm1065_vm11, %v4966_v3, %v4970_v5  ;;  %v5004_v20 = vshll.u32 %v7038_v49, 16  ;;  %v5443_v25 = vsel %vm1774_vm7, %v5411_v41, %v5146_v26  ;;  %v4992_v26 = vshll.u32 %v7039_v62, 16  ;;  %v7043_v62 = vld [vmem:[#allocation3 + $0xbc] ss:$0 sps:$4 sm:$0x11]  }
 0x4a7   : > { %v5537_v43 = vsel %vm3654_vm5, %v5505_v16, %v5263_v28  ;;  %v4985_v28 = vshrl.u32 %v9584_v54, 16  ;;  %v5098_v23 = vrot.slane %v7043_v62, 1 }
 0x4a9   : > { %5122 = vrot.lane.b32.xlu1 %v5087_v34, %s7088_s16  ;;  %v5099_v0 = vsel %vm1290_vm8, %v5097_v33, %v5098_v23 }
 0x4aa   : > { %5356 = vrot.lane.b32.xlu0 %v5087_v34, %s7091_s23 }
 0x4ad   : > { %5206 = vrot.lane.b32.xlu1 %v4983_v57, %s7087_s10 }
 0x4ae   : > { %5239 = vrot.lane.b32.xlu0 %v5087_v34, %s7092_s25  ;;  %v5006_v34 = vrot.slane %v5004_v20, 1 }
 0x4b0   : > { %v5007_v24 = vsel %vm1065_vm11, %v5002_v58, %v5006_v34 }
 0x4b1   : > { %5044 = vrot.lane.b32.xlu1 %v4983_v57, %s7082_s24 }
 0x4b2   : > { %5323 = vrot.lane.b32.xlu0 %v4983_v57, %s7093_s26  ;;  %v4989_v57 = vrot.slane %v4987_v42, 1 }
 0x4b3   : > { %v9567_v15 = vpop.permute.xlu1 %5229  ;;  %v5347_v44 = vpop.permute.xlu0 %5346 }
 0x4b5   : > { %5321 = vrot.lane.b32.xlu1 %v4971_v14, %s7093_s26 }
 0x4b6   : > { %5204 = vrot.lane.b32.xlu0 %v4971_v14, %s7087_s10 }
 0x4b7   : > { %v9571_v18 = vpop.permute.xlu0 %5112 }
 0x4b9   : > { %5042 = vrot.lane.b32.xlu1 %v4971_v14, %s7082_s24  ;;  %v9576_v22 = vpop.permute.xlu1 %5110  ;;  %v4994_v14 = vrot.slane %v4992_v26, 1 }
 0x4ba   : > { %5280 = vrot.lane.b32.xlu0 %v9573_v27, %s7090_s22 }
 0x4bb   : > { %v5345_v50 = vpop.permute.xlu0 %5344 }
 0x4bd   : > { %5163 = vrot.lane.b32.xlu1 %v9573_v27, %s7084_s28 }
 0x4be   : > { %5161 = vrot.lane.b32.xlu0 %v9584_v54, %s7084_s28 }
 0x4bf   : > { %v9587_v7 = vpop.permute.xlu1 %5194  ;;  %v5228_v51 = vpop.permute.xlu0 %5227 }
 0x4c1   : > { %5278 = vrot.lane.b32.xlu1 %v9584_v54, %s7090_s22 }
 0x4c2   : > { %5362 = vrot.lane.b32.xlu0 %v5096_v29, %s7091_s23 }
 0x4c3   : > { %v9599_v47 = vpop.permute.xlu1 %5032  ;;  %v5312_v60 = vpop.permute.xlu0 %5311 }
 0x4c5   : > { %5245 = vrot.lane.b32.xlu1 %v5096_v29, %s7092_s25 }
 0x4c6   : > { %5128 = vrot.lane.b32.xlu0 %v5096_v29, %s7088_s16 }
 0x4c7   : > { %v5310_v56 = vpop.permute.xlu1 %5309  ;;  %v5193_v9 = vpop.permute.xlu0 %5192 }
 0x4c8   : > { %v5569_v4 = vsel %vm3687_vm10, %v5537_v43, %v5310_v56  ;;  %v5475_v30 = vsel %vm10169_vm2, %v5443_v25, %v5193_v9  ;;  %v5011_v43 = vshll.u32 %v9649_v45, 16  ;;  %vm10176_vm2 = vmmov %vm10168_vm1 }
 0x4c9   : > { %5126 = vrot.lane.b32.xlu1 %v5093_v6, %s7088_s16  ;;  %v5601_v11 = vsel %vm3720_vm0, %v5569_v4, %v5345_v50  ;;  %v5507_v12 = vsel %vm3621_vm6, %v5475_v30, %v5228_v51  ;;  %v7040_v50 = vld [vmem:[#allocation3 + $0xc0] sm:$0xff]   ;;  %v7042_v51 = vld [vmem:[#allocation3 + $0xc8] ss:$0 sps:$4 sm:$0x11]  }
 0x4ca   : > { %6849 = vmatmul.mubr.msk.bf16.gmra.mrb[20].mxu0 %vm3753_vm3, %v5601_v11  ;;  %5360 = vrot.lane.b32.xlu0 %v5093_v6, %s7091_s23  ;;  %v5539_v35 = vsel %vm3654_vm5, %v5507_v12, %v9556_v53  ;;  %v4990_v53 = vor.u32 %v4989_v57, %v4985_v28  ;;  %v5175_v1 = vshll.u32 %v7040_v50, 16  ;;  %v5217_v16 = vrot.slane %v7042_v51, 1 }
 0x4cb   : > { %v5031_v38 = vpop.permute.xlu1 %5030  ;;  %v9627_v39 = vpop.permute.xlu0 %5268  ;;  %v5571_v48 = vsel %vm3687_vm10, %v5539_v35, %v5312_v60  ;;  %v5216_v60 = vrot.slane %v7040_v50, 1  ;;  %v5173_v41 = vshrl.u32 %v7040_v50, 16  ;;  %v5180_v4 = vshll.u32 %v7042_v51, 16 }
 0x4cc   : > { %v5603_v17 = vsel %vm3720_vm0, %v5571_v48, %v5347_v44  ;;  %v4995_v2 = vsel %vm1065_vm11, %v4990_v53, %v4994_v14  ;;  %v5381_v59 = vsel %vm1642_vm13, %v7070_v61, %v5031_v38  ;;  %v5177_v20 = vrot.slane %v5175_v1, 1  ;;  %v7044_v53 = vld [vmem:[#allocation3 + $0xd4] ss:$0 sps:$4 sm:$0x11]  }
 0x4cd   : > { %5210 = vrot.lane.b32.xlu1 %v5007_v24, %s7087_s10  ;;  %6852 = vmatprep.mubr.msk.bf16.mxu0 %vm3753_vm3, %v5603_v17  ;;  %v5413_v29 = vsel %vm1708_vm15, %v5381_v59, %v9576_v22  ;;  %v5009_v38 = vshrl.u32 %v9649_v45, 16  ;;  %v5182_v35 = vrot.slane %v5180_v4, 1  ;;  %v5299_v33 = vshll.u32 %v7044_v53, 16 }
 0x4ce   : > { %5243 = vrot.lane.b32.xlu0 %v5093_v6, %s7092_s25  ;;  %v5445_v19 = vsel %vm1774_vm7, %v5413_v29, %v9554_v10  ;;  %v5218_v10 = vsel %vm1290_vm8, %v5216_v60, %v5217_v16  ;;  %v7071_v6 = vld [vmem:[#allocation3 + $0x48] sm:$0xff]   ;;  %v5178_v9 = vor.u32 %v5177_v20, %v5173_v41 }
 0x4cf   : > { %v9632_v3 = vpop.permute.xlu1 %5151  ;;  %v5150_v5 = vpop.permute.xlu0 %5149  ;;  %v5477_v56 = vsel %vm10170_vm12, %v5445_v19, %v9587_v7  ;;  %v5383_v58 = vsel %vm1642_vm13, %v7071_v6, %v9599_v47  ;;  %v5013_v7 = vrot.slane %v5011_v43, 1  ;;  %v5301_v19 = vrot.slane %v5299_v33, 1  ;;  %vm10177_vm12 = vmmov %vm10168_vm1 }
 0x4d0   : > { %v5509_v11 = vsel %vm3621_vm6, %v5477_v56, %v9567_v15  ;;  %v5415_v12 = vsel %vm1708_vm15, %v5383_v58, %v9571_v18  ;;  %v5183_v28 = vsel %vm1065_vm11, %v5178_v9, %v5182_v35  ;;  %v7072_v18 = vld [vmem:[#allocation3 + $0xcc] sm:$0xff]  }
 0x4d1   : > { %5048 = vrot.lane.b32.xlu1 %v5007_v24, %s7082_s24  ;;  %v5447_v57 = vsel %vm1774_vm7, %v5415_v12, %v5150_v5  ;;  %v5014_v26 = vor.u32 %v5013_v7, %v5009_v38  ;;  %v5294_v14 = vshll.u32 %v7072_v18, 16 }
 0x4d2   : > { %5327 = vrot.lane.b32.xlu0 %v5007_v24, %s7093_s26  ;;  %v5016_v24 = vshll.u32 %v7043_v62, 16  ;;  %v5292_v62 = vshrl.u32 %v7072_v18, 16 }
 0x4d3   : > { %v5267_v40 = vpop.permute.xlu1 %5266  ;;  %v9640_v44 = vpop.permute.xlu0 %5350 }
 0x4d4   : > { %v5541_v30 = vsel %vm3654_vm5, %v5509_v11, %v5267_v40 }
 0x4d5   : > { %5325 = vrot.lane.b32.xlu1 %v4995_v2, %s7093_s26 }
 0x4d6   : > { %5208 = vrot.lane.b32.xlu0 %v4995_v2, %s7087_s10 }
 0x4d7   : > { %v9642_v49 = vpop.permute.xlu1 %5233  ;;  %v9646_v55 = vpop.permute.xlu0 %5116 }
 0x4d9   : > { %5046 = vrot.lane.b32.xlu1 %v4995_v2, %s7082_s24 }
 0x4da   : > { %5284 = vrot.lane.b32.xlu0 %v7040_v50, %s7090_s22 }
 0x4db   : > { %v9651_v8 = vpop.permute.xlu1 %5114  ;;  %v5349_v37 = vpop.permute.xlu0 %5348 }
 0x4dd   : > { %5167 = vrot.lane.b32.xlu1 %v7040_v50, %s7084_s28  ;;  %v5018_v50 = vrot.slane %v5016_v24, 1 }
 0x4de   : > { %5165 = vrot.lane.b32.xlu0 %v9649_v45, %s7084_s28 }
 0x4df   : > { %v9658_v36 = vpop.permute.xlu1 %5198  ;;  %v5232_v22 = vpop.permute.xlu0 %5231  ;;  %v5019_v51 = vsel %vm1065_vm11, %v5014_v26, %v5018_v50 }
 0x4e1   : > { %5282 = vrot.lane.b32.xlu1 %v9649_v45, %s7090_s22 }
 0x4e2   : > { %5364 = vrot.lane.b32.xlu0 %v5099_v0, %s7091_s23 }
 0x4e3   : > { %v9670_v42 = vpop.permute.xlu1 %5036  ;;  %v5316_v25 = vpop.permute.xlu0 %5315 }
 0x4e5   : > { %5249 = vrot.lane.b32.xlu1 %v5218_v10, %s7092_s25 }
 0x4e6   : > { %5247 = vrot.lane.b32.xlu0 %v5099_v0, %s7092_s25  ;;  %s9832_s25 = scalar_lea.vmem %s9989_s3, %s6562_s14 }
 0x4e7   : > { %v5314_v34 = vpop.permute.xlu1 %5313  ;;  %v5197_v48 = vpop.permute.xlu0 %5196 }
 0x4e8   : > { %v5573_v47 = vsel %vm3687_vm10, %v5541_v30, %v5314_v34  ;;  %v5479_v17 = vsel %vm10171_vm14, %v5447_v57, %v5197_v48  ;;  %vm10178_vm14 = vmmov %vm10168_vm1 }
 0x4e9   : > { %5130 = vrot.lane.b32.xlu1 %v5099_v0, %s7088_s16  ;;  %v5605_v15 = vsel %vm3720_vm0, %v5573_v47, %v5349_v37  ;;  %v5511_v2 = vsel %vm3621_vm6, %v5479_v17, %v5232_v22  ;;  %v5296_v37 = vrot.slane %v5294_v14, 1  ;;  %v5335_v22 = vrot.slane %v7072_v18, 1 }
 0x4ea   : > { %6853 = vmatmul.mubr.msk.bf16.gmra.mrb[24].mxu0 %vm3753_vm3, %v5605_v15  ;;  %5331 = vrot.lane.b32.xlu0 %v5183_v28, %s7093_s26  ;;  %v5543_v5 = vsel %vm3654_vm5, %v5511_v2, %v9627_v39  ;;  %v5336_v0 = vrot.slane %v7044_v53, 1 }
 0x4eb   : > { %v5035_v40 = vpop.permute.xlu1 %5034  ;;  %v5273_v61 = vpop.permute.xlu0 %5272  ;;  %v5575_v59 = vsel %vm3687_vm10, %v5543_v5, %v5316_v25  ;;  %v5297_v1 = vor.u32 %v5296_v37, %v5292_v62 }
 0x4ec   : > { %v5607_v29 = vsel %vm3720_vm0, %v5575_v59, %v9640_v44  ;;  %v5385_v56 = vsel %vm1642_vm13, %v9382_v52, %v5035_v40  ;;  %v5337_v41 = vsel %vm1290_vm8, %v5335_v22, %v5336_v0  ;;  %v5387_v52 = vsel %vm1642_vm13, %v9360_v32, %v9670_v42  ;;  %vm10173_vm8 = vmmov %vm10168_vm1 }
 0x4ed   : > { %5214 = vrot.lane.b32.xlu1 %v5183_v28, %s7087_s10  ;;  %6856 = vmatprep.mubr.msk.bf16.mxu0 %vm3753_vm3, %v5607_v29  ;;  %v5302_v44 = vsel %vm1065_vm11, %v5297_v1, %v5301_v19  ;;  %vm10172_vm11 = vmmov %vm10168_vm1  ;;  %v5419_v12 = vsel %vm1708_vm15, %v5387_v52, %v9646_v55 }
 0x4ee   : > { %5212 = vrot.lane.b32.xlu0 %v5019_v51, %s7087_s10 }
 0x4ef   : > { %v5156_v23 = vpop.permute.xlu1 %5155  ;;  %v5154_v39 = vpop.permute.xlu0 %5153 }
 0x4f0   : > { %v5451_v47 = vsel %vm1774_vm7, %v5419_v12, %v5154_v39 }
 0x4f1   : > { %5329 = vrot.lane.b32.xlu1 %v5019_v51, %s7093_s26 }
 0x4f2   : > { %5366 = vrot.lane.b32.xlu0 %v5218_v10, %s7091_s23  ;;  %v5417_v10 = vsel %vm1708_vm15, %v5385_v56, %v9651_v8 }
 0x4f3   : > { %v5271_v60 = vpop.permute.xlu1 %5270  ;;  %v5355_v16 = vpop.permute.xlu0 %5354  ;;  %v5449_v25 = vsel %vm1774_vm7, %v5417_v10, %v9632_v3 }
 0x4f4   : > { %v5481_v9 = vsel %vm10172_vm11, %v5449_v25, %v9658_v36  ;;  %vm10179_vm11 = vmmov %vm10168_vm1 }
 0x4f5   : > { %5050 = vrot.lane.b32.xlu1 %v5019_v51, %s7082_s24  ;;  %v5513_v8 = vsel %vm3621_vm6, %v5481_v9, %v9642_v49 }
 0x4f6   : > { %v5545_v34 = vsel %vm3654_vm5, %v5513_v8, %v5271_v60 }
 0x4f7   : > { %v5238_v20 = vpop.permute.xlu1 %5237  ;;  %v5121_v43 = vpop.permute.xlu0 %5120 }
 0x4f9   : > { %5333 = vrot.lane.b32.xlu1 %v5302_v44, %s7093_s26 }
 0x4fb   : > { %v5119_v4 = vpop.permute.xlu1 %5118  ;;  %v5353_v6 = vpop.permute.xlu0 %5352 }
 0x4fd   : > { %5368 = vrot.lane.b32.xlu1 %v5337_v41, %s7091_s23 }
 0x4ff   : > { %v5203_v58 = vpop.permute.xlu1 %5202  ;;  %v5236_v11 = vpop.permute.xlu0 %5235 }
 0x503   : > { %v5041_v7 = vpop.permute.xlu1 %5040  ;;  %v5320_v30 = vpop.permute.xlu0 %5319 }
 0x504   : > { %v5391_v29 = vsel %vm1642_vm13, %v9441_v21, %v5041_v7 }
 0x505   : > { %v5423_v1 = vsel %vm1708_vm15, %v5391_v29, %v5121_v43 }
 0x507   : > { %v5318_v38 = vpop.permute.xlu1 %5317  ;;  %v5201_v35 = vpop.permute.xlu0 %5200 }
 0x508   : > { %v5577_v3 = vsel %vm3687_vm10, %v5545_v34, %v5318_v38  ;;  %v5483_v32 = vsel %vm10173_vm8, %v5451_v47, %v5201_v35 }
 0x509   : > { %v5609_v36 = vsel %vm3720_vm0, %v5577_v3, %v5353_v6  ;;  %v5515_v49 = vsel %vm3621_vm6, %v5483_v32, %v5236_v11 }
 0x50a   : > { %6857 = vmatmul.mubr.msk.bf16.gmra.mrb[28].mxu0 %vm3753_vm3, %v5609_v36  ;;  %v5547_v24 = vsel %vm3654_vm5, %v5515_v49, %v5273_v61 }
 0x50b   : > { %v5039_v42 = vpop.permute.xlu1 %5038  ;;  %v5277_v57 = vpop.permute.xlu0 %5276  ;;  %v5579_v15 = vsel %vm3687_vm10, %v5547_v24, %v5320_v30 }
 0x50c   : > { %v5611_v55 = vsel %vm3720_vm0, %v5579_v15, %v5355_v16  ;;  %v5389_v14 = vsel %vm1642_vm13, %v9454_v31, %v5039_v42 }
 0x50d   : > { %6860 = vmatprep.mubr.msk.bf16.mxu0 %vm3753_vm3, %v5611_v55  ;;  %v5421_v2 = vsel %vm1708_vm15, %v5389_v14, %v5119_v4 }
 0x50e   : > { %v5453_v61 = vsel %vm1774_vm7, %v5421_v2, %v5156_v23 }
 0x50f   : > { %v5160_v48 = vpop.permute.xlu1 %5159  ;;  %v5485_v62 = vsel %vm10174_vm4, %v5453_v61, %v5203_v58 }
 0x510   : > { %v5158_v17 = vpop.permute.xlu0 %5157  ;;  %v5517_v33 = vsel %vm3621_vm6, %v5485_v62, %v5238_v20 }
 0x511   : > { %v5455_v60 = vsel %vm1774_vm7, %v5423_v1, %v5158_v17 }
 0x513   : > { %v5275_v28 = vpop.permute.xlu1 %5274 }
 0x514   : > { %v5359_v26 = vpop.permute.xlu0 %5358  ;;  %v5549_v39 = vsel %vm3654_vm5, %v5517_v33, %v5275_v28 }
 0x517   : > { %v5242_v53 = vpop.permute.xlu1 %5241 }
 0x518   : > { %v5125_v18 = vpop.permute.xlu0 %5124 }
 0x51b   : > { %v5123_v40 = vpop.permute.xlu1 %5122 }
 0x51c   : > { %v5357_v5 = vpop.permute.xlu0 %5356 }
 0x51f   : > { %v5207_v50 = vpop.permute.xlu1 %5206 }
 0x520   : > { %v5240_v59 = vpop.permute.xlu0 %5239 }
 0x523   : > { %v5045_v51 = vpop.permute.xlu1 %5044 }
 0x524   : > { %v5324_v37 = vpop.permute.xlu0 %5323  ;;  %v5395_v3 = vsel %vm1642_vm13, %v9513_v63, %v5045_v51 }
 0x525   : > { %v5427_v32 = vsel %vm1708_vm15, %v5395_v3, %v5125_v18 }
 0x527   : > { %v5322_v31 = vpop.permute.xlu1 %5321 }
 0x528   : > { %v5581_v19 = vsel %vm3687_vm10, %v5549_v39, %v5322_v31  ;;  %v5205_v16 = vpop.permute.xlu0 %5204 }
 0x529   : > { %v5613_v23 = vsel %vm3720_vm0, %v5581_v19, %v5357_v5  ;;  %v5487_v44 = vsel %vm10175_vm9, %v5455_v60, %v5205_v16 }
 0x52a   : > { %6861 = vmatmul.mubr.msk.bf16.gmra.mrb[32].mxu0 %vm3753_vm3, %v5613_v23  ;;  %v5519_v22 = vsel %vm3621_vm6, %v5487_v44, %v5240_v59 }
 0x52b   : > { %v5043_v21 = vpop.permute.xlu1 %5042  ;;  %v5551_v0 = vsel %vm3654_vm5, %v5519_v22, %v5277_v57 }
 0x52c   : > { %v5281_v20 = vpop.permute.xlu0 %5280  ;;  %v5583_v56 = vsel %vm3687_vm10, %v5551_v0, %v5324_v37  ;;  %v5393_v11 = vsel %vm1642_vm13, %v9525_v13, %v5043_v21 }
 0x52d   : > { %v5615_v43 = vsel %vm3720_vm0, %v5583_v56, %v5359_v26  ;;  %v5425_v7 = vsel %vm1708_vm15, %v5393_v11, %v5123_v40 }
 0x52e   : > { %6864 = vmatprep.mubr.msk.bf16.mxu0 %vm3753_vm3, %v5615_v43  ;;  %v5457_v8 = vsel %vm1774_vm7, %v5425_v7, %v5160_v48  ;;  %v9807_v7 = vld [vmem:[%s9988_s2 + $0x4] ss:$0 sm:$0xff] }
 0x52f   : > { %v5164_v41 = vpop.permute.xlu1 %5163  ;;  %v5489_v38 = vsel %vm10168_vm1, %v5457_v8, %v5207_v50 }
 0x530   : > { %v5162_v4 = vpop.permute.xlu0 %5161  ;;  %v5521_v36 = vsel %vm3621_vm6, %v5489_v38, %v5242_v53 }
 0x531   : > { %v5459_v49 = vsel %vm1774_vm7, %v5427_v32, %v5162_v4 }
 0x533   : > { %v5279_v10 = vpop.permute.xlu1 %5278 }
 0x534   : > { %v5363_v6 = vpop.permute.xlu0 %5362  ;;  %v5553_v35 = vsel %vm3654_vm5, %v5521_v36, %v5279_v10 }
 0x537   : > { %v5246_v58 = vpop.permute.xlu1 %5245 }
 0x538   : > { %v5129_v25 = vpop.permute.xlu0 %5128 }
 0x53b   : > { %v5127_v9 = vpop.permute.xlu1 %5126 }
 0x53c   : > { %v5361_v52 = vpop.permute.xlu0 %5360 }
 0x53f   : > { %v5211_v30 = vpop.permute.xlu1 %5210 }
 0x540   : > { %v5244_v34 = vpop.permute.xlu0 %5243 }
 0x543   : > { %v5049_v12 = vpop.permute.xlu1 %5048 }
 0x544   : > { %v5328_v47 = vpop.permute.xlu0 %5327  ;;  %v5399_v51 = vsel %vm1642_vm13, %v9573_v27, %v5049_v12 }
 0x545   : > { %v5431_v39 = vsel %vm1708_vm15, %v5399_v51, %v5129_v25 }
 0x547   : > { %v5326_v13 = vpop.permute.xlu1 %5325 }
 0x548   : > { %v5585_v42 = vsel %vm3687_vm10, %v5553_v35, %v5326_v13  ;;  %v5209_v57 = vpop.permute.xlu0 %5208  ;;  %v10180_v13 = vld [vmem:[#allocation6_spill] sm:$0xff] }
 0x549   : > { %v5617_v24 = vsel %vm3720_vm0, %v5585_v42, %v5361_v52  ;;  %v5491_v15 = vsel %vm10176_vm2, %v5459_v49, %v5209_v57  ;;  %v10181_v49 = vld [vmem:[#allocation7_spill] sm:$0xff] }
 0x54a   : > { %6865 = vmatmul.mubr.msk.bf16.gmra.mrb[36].mxu0 %vm3753_vm3, %v5617_v24  ;;  %v5523_v55 = vsel %vm3621_vm6, %v5491_v15, %v5244_v34 }
 0x54b   : > { %v5047_v63 = vpop.permute.xlu1 %5046  ;;  %v5555_v48 = vsel %vm3654_vm5, %v5523_v55, %v5281_v20 }
 0x54c   : > { %v5285_v17 = vpop.permute.xlu0 %5284  ;;  %v5587_v28 = vsel %vm3687_vm10, %v5555_v48, %v5328_v47  ;;  %v5397_v2 = vsel %vm1642_vm13, %v9584_v54, %v5047_v63  ;;  %v10182_v63 = vld [vmem:[#allocation8_spill] sm:$0xff] }
 0x54d   : > { %v5619_v26 = vsel %vm3720_vm0, %v5587_v28, %v5363_v6  ;;  %v5429_v50 = vsel %vm1708_vm15, %v5397_v2, %v5127_v9 }
 0x54e   : > { %6868 = vmatprep.mubr.msk.bf16.mxu0 %vm3753_vm3, %v5619_v26  ;;  %v5461_v62 = vsel %vm1774_vm7, %v5429_v50, %v5164_v41 }
 0x54f   : > { %v5168_v53 = vpop.permute.xlu1 %5167  ;;  %v5493_v37 = vsel %vm10177_vm12, %v5461_v62, %v5211_v30  ;;  %v9814_v30 = vld [vmem:[%s9988_s2 + $0x5] ss:$0 sm:$0xff] }
 0x550   : > { %v5166_v18 = vpop.permute.xlu0 %5165  ;;  %v5525_v54 = vsel %vm3621_vm6, %v5493_v37, %v5246_v58 }
 0x551   : > { %v5463_v31 = vsel %vm1774_vm7, %v5431_v39, %v5166_v18 }
 0x553   : > { %v5283_v14 = vpop.permute.xlu1 %5282 }
 0x554   : > { %v5365_v40 = vpop.permute.xlu0 %5364  ;;  %v5557_v60 = vsel %vm3654_vm5, %v5525_v54, %v5283_v14 }
 0x557   : > { %v5250_v5 = vpop.permute.xlu1 %5249 }
 0x558   : > { %v5248_v61 = vpop.permute.xlu0 %5247 }
 0x55b   : > { %v5131_v59 = vpop.permute.xlu1 %5130 }
 0x55c   : > { %v5332_v29 = vpop.permute.xlu0 %5331 }
 0x55f   : > { %v5215_v33 = vpop.permute.xlu1 %5214 }
 0x560   : > { %v5213_v1 = vpop.permute.xlu0 %5212 }
 0x561   : > { %v5495_v19 = vsel %vm10178_vm14, %v5463_v31, %v5213_v1  ;;  %v10188_v31 = vld [vmem:[#allocation11_spill] sm:$0xff] }
 0x562   : > { %v5527_v16 = vsel %vm3621_vm6, %v5495_v19, %v5248_v61  ;;  %v10189_v19 = vld [vmem:[#allocation12_spill] sm:$0xff] }
 0x563   : > { %v5330_v23 = vpop.permute.xlu1 %5329  ;;  %v5559_v44 = vsel %vm3654_vm5, %v5527_v16, %v5285_v17  ;;  %v10183_v17 = vld [vmem:[#allocation9_spill] sm:$0xff] }
 0x564   : > { %v5589_v27 = vsel %vm3687_vm10, %v5557_v60, %v5330_v23  ;;  %v5591_v22 = vsel %vm3687_vm10, %v5559_v44, %v5332_v29  ;;  %v5367_v0 = vpop.permute.xlu0 %5366 }
 0x565   : > { %v5621_v21 = vsel %vm3720_vm0, %v5589_v27, %v5365_v40  ;;  %v5623_v20 = vsel %vm3720_vm0, %v5591_v22, %v5367_v0  ;;  %v10190_v27 = vld [vmem:[#allocation13_spill] sm:$0xff]  ;;  %v10191_v22 = vld [vmem:[#allocation14_spill] sm:$0xff] }
 0x566   : > { %6869 = vmatmul.mubr.msk.bf16.gmra.mrb[40].mxu0 %vm3753_vm3, %v5621_v21 }
 0x567   : > { %v5051_v56 = vpop.permute.xlu1 %5050  ;;  %6872 = vmatprep.mubr.msk.bf16.mxu0 %vm3753_vm3, %v5623_v20 }
 0x568   : > { %v5401_v43 = vsel %vm1642_vm13, %v9649_v45, %v5051_v56  ;;  %vm10184_vm13 = vcmask 60416  }
 0x569   : > { %v5433_v41 = vsel %vm1708_vm15, %v5401_v43, %v5131_v59  ;;  %vm10185_vm15 = vmmov %vm10184_vm13 }
 0x56a   : > { %v5465_v4 = vsel %vm1774_vm7, %v5433_v41, %v5168_v53  ;;  %vm10186_vm7 = vmmov %vm10184_vm13 }
 0x56b   : > { %v5497_v10 = vsel %vm10179_vm11, %v5465_v4, %v5215_v33  ;;  %v5334_v6 = vpop.permute.xlu1 %5333 }
 0x56c   : > { %v5529_v58 = vsel %vm3621_vm6, %v5497_v10, %v5250_v5 }
 0x56d   : > { %v5561_v25 = vsel %vm3654_vm5, %v5529_v58, %v9370_v46  ;;  %vm10187_vm5 = vmmov %vm10186_vm7 }
 0x56e   : > { %v5593_v11 = vsel %vm3687_vm10, %v5561_v25, %v5334_v6  ;;  %vm10192_vm6 = vmmov %vm10187_vm5 }
 0x56f   : > { %v5369_v9 = vpop.permute.xlu1 %5368  ;;  %vm10193_vm10 = vmmov %vm10187_vm5 }
 0x570   : > { %v5625_v45 = vsel %vm3720_vm0, %v5593_v11, %v5369_v9  ;;  %v6846_v52 = vpop.f32.mrb[16].mxu0  ;;  %vm10194_vm0 = vmmov %vm10187_vm5 }
 0x571   : > { %6873 = vmatmul.mubr.msk.bf16.gmra.mrb[44].mxu0 %vm3753_vm3, %v5625_v45  ;;  %v5891_v46 = vmul.f32 %v6846_v52, %v9807_v7  ;;  %v5757_v8 = vpop.f32.mrb[17].mxu0  ;;  %vm10195_vm3 = vmmov %vm10194_vm0 }
 0x572   : > { %v5889_v34 = vmul.f32 %v9807_v7, %v5757_v8  ;;  %v6847_v38 = vpop.f32.mrb[18].mxu0  ;;  %vm10200_vm8 = vmmov %vm10194_vm0 }
 0x573   : > { %v5928_v12 = vadd.f32 %v9814_v30, %v5891_v46  ;;  %v5892_v3 = vmul.f32 %v6847_v38, %v9807_v7  ;;  %v5760_v47 = vpop.f32.mrb[19].mxu0  ;;  %v10196_v38 = vld [vmem:[#allocation15_spill] sm:$0xff]  ;;  %vm10201_vm4 = vmmov %vm10194_vm0 }
 0x574   : > { %v5926_v36 = vadd.f32 %v9814_v30, %v5889_v34  ;;  %v5890_v35 = vmul.f32 %v9807_v7, %v5760_v47  ;;  %v10197_v47 = vld [vmem:[#allocation16_spill] sm:$0xff]  ;;  %vm10202_vm9 = vmmov %vm10194_vm0 }
 0x575   : > { %v5960_v32 = vadd.f32 %v5928_v12, %v10180_v13  ;;  %v5929_v42 = vadd.f32 %v9814_v30, %v5892_v3  ;;  %vm10203_vm1 = vmmov %vm10194_vm0 }
 0x576   : > { %v5958_v24 = vadd.f32 %v5926_v36, %v10181_v49  ;;  %v5927_v57 = vadd.f32 %v9814_v30, %v5890_v35  ;;  %vm10208_vm2 = vmmov %vm10194_vm0 }
 0x577   : > { %v5992_v15 = vmax.f32 %v5960_v32, 0.0  ;;  %v5961_v55 = vadd.f32 %v5929_v42, %v10182_v63  ;;  %v10198_v32 = vld [vmem:[#allocation17_spill] sm:$0xff]  ;;  %vm10209_vm12 = vmmov %vm10194_vm0 }
 0x578   : > { %v5990_v48 = vmax.f32 %v5958_v24, 0.0  ;;  %v5959_v28 = vadd.f32 %v5927_v57, %v10183_v17  ;;  %v10199_v24 = vld [vmem:[#allocation18_spill] sm:$0xff]  ;;  %vm10210_vm14 = vmmov %vm10194_vm0 }
 0x579   : > { %v6630_v26 = vpack.c.bf16 %v5992_v15, %v5992_v15  ;;  %v5993_v53 = vmax.f32 %v5961_v55, 0.0  ;;  %vm10211_vm11 = vmmov %vm10194_vm0 }
 0x57a   : > { %v6628_v18 = vpack.c.bf16 %v5990_v48, %v5990_v48  ;;  %v5991_v14 = vmax.f32 %v5959_v28, 0.0 }
 0x57b   : > { %6152 = vst.msk [vmem:[%s9832_s25 + $0x8] sm:$0xf] %vm10184_vm13, %v6630_v26  ;;  %v6631_v40 = vpack.c.bf16 %v5993_v53, %v5993_v53  ;;  %vm10216_vm13 = vmmov %vm10194_vm0 }
 0x57c   : > { %6150 = vst.msk [vmem:[%s9832_s25] sm:$0xf] %vm10185_vm15, %v6628_v18  ;;  %v6629_v2 = vpack.c.bf16 %v5991_v14, %v5991_v14  ;;  %vm10217_vm15 = vmmov %vm10194_vm0 }
 0x57d   : > { %6153 = vst.msk [vmem:[%s9832_s25 + $0xc] sm:$0xf] %vm10186_vm7, %v6631_v40  ;;  %vm10218_vm7 = vmmov %vm10194_vm0 }
 0x57e   : > { %6151 = vst.msk [vmem:[%s9832_s25 + $0x4] sm:$0xf] %vm10187_vm5, %v6629_v2  ;;  %vm10219_vm5 = vmmov %vm10194_vm0 }
 0x59d   : > { %v6850_v5 = vpop.f32.mrb[20].mxu0 }
 0x59e   : > { %v5895_v50 = vmul.f32 %v6850_v5, %v9807_v7  ;;  %v5773_v61 = vpop.f32.mrb[21].mxu0 }
 0x59f   : > { %v5893_v59 = vmul.f32 %v9807_v7, %v5773_v61  ;;  %v6851_v62 = vpop.f32.mrb[22].mxu0 }
 0x5a0   : > { %v5932_v51 = vadd.f32 %v9814_v30, %v5895_v50  ;;  %v5896_v29 = vmul.f32 %v6851_v62, %v9807_v7  ;;  %v5776_v37 = vpop.f32.mrb[23].mxu0  ;;  %v10204_v62 = vld [vmem:[#allocation19_spill] sm:$0xff] }
 0x5a1   : > { %v5930_v33 = vadd.f32 %v9814_v30, %v5893_v59  ;;  %v5894_v39 = vmul.f32 %v9807_v7, %v5776_v37  ;;  %v10205_v37 = vld [vmem:[#allocation20_spill] sm:$0xff] }
 0x5a2   : > { %v5964_v1 = vadd.f32 %v5932_v51, %v10188_v31  ;;  %v5933_v54 = vadd.f32 %v9814_v30, %v5896_v29 }
 0x5a3   : > { %v5962_v60 = vadd.f32 %v5930_v33, %v10189_v19  ;;  %v5931_v23 = vadd.f32 %v9814_v30, %v5894_v39 }
 0x5a4   : > { %v5996_v16 = vmax.f32 %v5964_v1, 0.0  ;;  %v5965_v44 = vadd.f32 %v5933_v54, %v10190_v27  ;;  %v10206_v1 = vld [vmem:[#allocation21_spill] sm:$0xff] }
 0x5a5   : > { %v5994_v21 = vmax.f32 %v5962_v60, 0.0  ;;  %v5963_v0 = vadd.f32 %v5931_v23, %v10191_v22  ;;  %v10207_v60 = vld [vmem:[#allocation22_spill] sm:$0xff] }
 0x5a6   : > { %v6634_v20 = vpack.c.bf16 %v5996_v16, %v5996_v16  ;;  %v5997_v56 = vmax.f32 %v5965_v44, 0.0 }
 0x5a7   : > { %v6632_v43 = vpack.c.bf16 %v5994_v21, %v5994_v21  ;;  %v5995_v41 = vmax.f32 %v5963_v0, 0.0 }
 0x5a8   : > { %6156 = vst.msk [vmem:[%s9832_s25 + $0x18] sm:$0xf] %vm10192_vm6, %v6634_v20  ;;  %v6635_v4 = vpack.c.bf16 %v5997_v56, %v5997_v56  ;;  %vm10224_vm6 = vmmov %vm10194_vm0 }
 0x5a9   : > { %6154 = vst.msk [vmem:[%s9832_s25 + $0x10] sm:$0xf] %vm10193_vm10, %v6632_v43  ;;  %v6633_v10 = vpack.c.bf16 %v5995_v41, %v5995_v41  ;;  %vm10225_vm10 = vmmov %vm10194_vm0 }
 0x5aa   : > { %6157 = vst.msk [vmem:[%s9832_s25 + $0x1c] sm:$0xf] %vm10194_vm0, %v6635_v4 }
 0x5ab   : > { %6155 = vst.msk [vmem:[%s9832_s25 + $0x14] sm:$0xf] %vm10195_vm3, %v6633_v10  ;;  %vm10226_vm3 = vmmov %vm10194_vm0 }
 0x5bd   : > { %v6854_v6 = vpop.f32.mrb[24].mxu0 }
 0x5be   : > { %v5899_v58 = vmul.f32 %v6854_v6, %v9807_v7  ;;  %v5789_v25 = vpop.f32.mrb[25].mxu0 }
 0x5bf   : > { %v5897_v11 = vmul.f32 %v9807_v7, %v5789_v25  ;;  %v6855_v9 = vpop.f32.mrb[26].mxu0 }
 0x5c0   : > { %v5936_v45 = vadd.f32 %v9814_v30, %v5899_v58  ;;  %v5900_v52 = vmul.f32 %v6855_v9, %v9807_v7  ;;  %v5792_v46 = vpop.f32.mrb[27].mxu0  ;;  %v10212_v9 = vld [vmem:[#allocation23_spill] sm:$0xff] }
 0x5c1   : > { %v5934_v8 = vadd.f32 %v9814_v30, %v5897_v11  ;;  %v5898_v34 = vmul.f32 %v9807_v7, %v5792_v46  ;;  %v10213_v46 = vld [vmem:[#allocation24_spill] sm:$0xff] }
 0x5c2   : > { %v5968_v12 = vadd.f32 %v5936_v45, %v10196_v38  ;;  %v5937_v3 = vadd.f32 %v9814_v30, %v5900_v52 }
 0x5c3   : > { %v5966_v36 = vadd.f32 %v5934_v8, %v10197_v47  ;;  %v5935_v35 = vadd.f32 %v9814_v30, %v5898_v34 }
 0x5c4   : > { %v6000_v13 = vmax.f32 %v5968_v12, 0.0  ;;  %v5969_v42 = vadd.f32 %v5937_v3, %v10198_v32  ;;  %v10214_v12 = vld [vmem:[#allocation25_spill] sm:$0xff] }
 0x5c5   : > { %v5998_v49 = vmax.f32 %v5966_v36, 0.0  ;;  %v5967_v57 = vadd.f32 %v5935_v35, %v10199_v24  ;;  %v10215_v36 = vld [vmem:[#allocation26_spill] sm:$0xff] }
 0x5c6   : > { %v6638_v15 = vpack.c.bf16 %v6000_v13, %v6000_v13  ;;  %v6001_v63 = vmax.f32 %v5969_v42, 0.0 }
 0x5c7   : > { %v6636_v55 = vpack.c.bf16 %v5998_v49, %v5998_v49  ;;  %v5999_v48 = vmax.f32 %v5967_v57, 0.0 }
 0x5c8   : > { %6160 = vst.msk [vmem:[%s9832_s25 + $0x28] sm:$0xf] %vm10200_vm8, %v6638_v15  ;;  %v6639_v17 = vpack.c.bf16 %v6001_v63, %v6001_v63  ;;  %vm10231_vm8 = vmmov %vm10194_vm0 }
 0x5c9   : > { %6158 = vst.msk [vmem:[%s9832_s25 + $0x20] sm:$0xf] %vm10201_vm4, %v6636_v55  ;;  %v6637_v28 = vpack.c.bf16 %v5999_v48, %v5999_v48  ;;  %vm10232_vm4 = vmmov %vm10194_vm0 }
 0x5ca   : > { %6161 = vst.msk [vmem:[%s9832_s25 + $0x2c] sm:$0xf] %vm10202_vm9, %v6639_v17  ;;  %vm10233_vm9 = vmmov %vm10194_vm0 }
 0x5cb   : > { %6159 = vst.msk [vmem:[%s9832_s25 + $0x24] sm:$0xf] %vm10203_vm1, %v6637_v28  ;;  %vm10234_vm1 = vmmov %vm10194_vm0 }
 0x5dd   : > { %v6858_v26 = vpop.f32.mrb[28].mxu0 }
 0x5de   : > { %v5903_v53 = vmul.f32 %v6858_v26, %v9807_v7  ;;  %v5805_v18 = vpop.f32.mrb[29].mxu0 }
 0x5df   : > { %v5901_v14 = vmul.f32 %v9807_v7, %v5805_v18  ;;  %v6859_v40 = vpop.f32.mrb[30].mxu0 }
 0x5e0   : > { %v5940_v2 = vadd.f32 %v9814_v30, %v5903_v53  ;;  %v5904_v5 = vmul.f32 %v6859_v40, %v9807_v7  ;;  %v5808_v50 = vpop.f32.mrb[31].mxu0  ;;  %v10220_v40 = vld [vmem:[#allocation27_spill] sm:$0xff] }
 0x5e1   : > { %v5938_v61 = vadd.f32 %v9814_v30, %v5901_v14  ;;  %v5902_v59 = vmul.f32 %v9807_v7, %v5808_v50  ;;  %v10221_v50 = vld [vmem:[#allocation28_spill] sm:$0xff] }
 0x5e2   : > { %v5972_v51 = vadd.f32 %v5940_v2, %v10204_v62  ;;  %v5941_v29 = vadd.f32 %v9814_v30, %v5904_v5 }
 0x5e3   : > { %v5970_v33 = vadd.f32 %v5938_v61, %v10205_v37  ;;  %v5939_v39 = vadd.f32 %v9814_v30, %v5902_v59 }
 0x5e4   : > { %v6004_v31 = vmax.f32 %v5972_v51, 0.0  ;;  %v5973_v54 = vadd.f32 %v5941_v29, %v10206_v1  ;;  %v10222_v51 = vld [vmem:[#allocation29_spill] sm:$0xff] }
 0x5e5   : > { %v6002_v19 = vmax.f32 %v5970_v33, 0.0  ;;  %v5971_v23 = vadd.f32 %v5939_v39, %v10207_v60  ;;  %v10223_v33 = vld [vmem:[#allocation30_spill] sm:$0xff] }
 0x5e6   : > { %v6642_v16 = vpack.c.bf16 %v6004_v31, %v6004_v31  ;;  %v6005_v27 = vmax.f32 %v5973_v54, 0.0 }
 0x5e7   : > { %v6640_v44 = vpack.c.bf16 %v6002_v19, %v6002_v19  ;;  %v6003_v21 = vmax.f32 %v5971_v23, 0.0 }
 0x5e8   : > { %6164 = vst.msk [vmem:[%s9832_s25 + $0x38] sm:$0xf] %vm10208_vm2, %v6642_v16  ;;  %v6643_v22 = vpack.c.bf16 %v6005_v27, %v6005_v27  ;;  %vm10239_vm2 = vmmov %vm10194_vm0 }
 0x5e9   : > { %6162 = vst.msk [vmem:[%s9832_s25 + $0x30] sm:$0xf] %vm10209_vm12, %v6640_v44  ;;  %v6641_v0 = vpack.c.bf16 %v6003_v21, %v6003_v21  ;;  %vm10240_vm12 = vmmov %vm10194_vm0 }
 0x5ea   : > { %6165 = vst.msk [vmem:[%s9832_s25 + $0x3c] sm:$0xf] %vm10210_vm14, %v6643_v22  ;;  %vm10241_vm14 = vmmov %vm10194_vm0 }
 0x5eb   : > { %6163 = vst.msk [vmem:[%s9832_s25 + $0x34] sm:$0xf] %vm10211_vm11, %v6641_v0  ;;  %vm10242_vm11 = vmmov %vm10194_vm0 }
 0x5fd   : > { %v6862_v20 = vpop.f32.mrb[32].mxu0 }
 0x5fe   : > { %v5907_v56 = vmul.f32 %v6862_v20, %v9807_v7  ;;  %v5821_v43 = vpop.f32.mrb[33].mxu0 }
 0x5ff   : > { %v5905_v41 = vmul.f32 %v9807_v7, %v5821_v43  ;;  %v6863_v4 = vpop.f32.mrb[34].mxu0 }
 0x600   : > { %v5944_v10 = vadd.f32 %v9814_v30, %v5907_v56  ;;  %v5908_v6 = vmul.f32 %v6863_v4, %v9807_v7  ;;  %v5824_v58 = vpop.f32.mrb[35].mxu0  ;;  %v10227_v4 = vld [vmem:[#allocation31_spill] sm:$0xff] }
 0x601   : > { %v5942_v25 = vadd.f32 %v9814_v30, %v5905_v41  ;;  %v5906_v11 = vmul.f32 %v9807_v7, %v5824_v58  ;;  %v10228_v58 = vld [vmem:[#allocation32_spill] sm:$0xff] }
 0x602   : > { %v5976_v45 = vadd.f32 %v5944_v10, %v10212_v9  ;;  %v5945_v52 = vadd.f32 %v9814_v30, %v5908_v6 }
 0x603   : > { %v5974_v8 = vadd.f32 %v5942_v25, %v10213_v46  ;;  %v5943_v34 = vadd.f32 %v9814_v30, %v5906_v11 }
 0x604   : > { %v6008_v38 = vmax.f32 %v5976_v45, 0.0  ;;  %v5977_v3 = vadd.f32 %v5945_v52, %v10214_v12  ;;  %v10229_v45 = vld [vmem:[#allocation33_spill] sm:$0xff] }
 0x605   : > { %v6006_v47 = vmax.f32 %v5974_v8, 0.0  ;;  %v5975_v35 = vadd.f32 %v5943_v34, %v10215_v36  ;;  %v10230_v8 = vld [vmem:[#allocation34_spill] sm:$0xff] }
 0x606   : > { %v6646_v13 = vpack.c.bf16 %v6008_v38, %v6008_v38  ;;  %v6009_v32 = vmax.f32 %v5977_v3, 0.0 }
 0x607   : > { %v6644_v42 = vpack.c.bf16 %v6006_v47, %v6006_v47  ;;  %v6007_v49 = vmax.f32 %v5975_v35, 0.0 }
 0x608   : > { %6168 = vst.msk [vmem:[%s9832_s25 + $0x48] sm:$0xf] %vm10216_vm13, %v6646_v13  ;;  %v6647_v24 = vpack.c.bf16 %v6009_v32, %v6009_v32 }
 0x609   : > { %6166 = vst.msk [vmem:[%s9832_s25 + $0x40] sm:$0xf] %vm10217_vm15, %v6644_v42  ;;  %v6645_v57 = vpack.c.bf16 %v6007_v49, %v6007_v49 }
 0x60a   : > { %6169 = vst.msk [vmem:[%s9832_s25 + $0x4c] sm:$0xf] %vm10218_vm7, %v6647_v24 }
 0x60b   : > { %6167 = vst.msk [vmem:[%s9832_s25 + $0x44] sm:$0xf] %vm10219_vm5, %v6645_v57 }
 0x61d   : > { %v6866_v15 = vpop.f32.mrb[36].mxu0 }
 0x61e   : > { %v5911_v63 = vmul.f32 %v6866_v15, %v9807_v7  ;;  %v5837_v55 = vpop.f32.mrb[37].mxu0 }
 0x61f   : > { %v5909_v48 = vmul.f32 %v9807_v7, %v5837_v55  ;;  %v6867_v17 = vpop.f32.mrb[38].mxu0 }
 0x620   : > { %v5948_v28 = vadd.f32 %v9814_v30, %v5911_v63  ;;  %v5912_v26 = vmul.f32 %v6867_v17, %v9807_v7  ;;  %v5840_v53 = vpop.f32.mrb[39].mxu0  ;;  %v10235_v17 = vld [vmem:[#allocation35_spill] sm:$0xff] }
 0x621   : > { %v5946_v18 = vadd.f32 %v9814_v30, %v5909_v48  ;;  %v5910_v14 = vmul.f32 %v9807_v7, %v5840_v53  ;;  %v10236_v53 = vld [vmem:[#allocation36_spill] sm:$0xff] }
 0x622   : > { %v5980_v2 = vadd.f32 %v5948_v28, %v10220_v40  ;;  %v5949_v5 = vadd.f32 %v9814_v30, %v5912_v26 }
 0x623   : > { %v5978_v61 = vadd.f32 %v5946_v18, %v10221_v50  ;;  %v5947_v59 = vadd.f32 %v9814_v30, %v5910_v14 }
 0x624   : > { %v6012_v62 = vmax.f32 %v5980_v2, 0.0  ;;  %v5981_v29 = vadd.f32 %v5949_v5, %v10222_v51  ;;  %v10237_v2 = vld [vmem:[#allocation37_spill] sm:$0xff] }
 0x625   : > { %v6010_v37 = vmax.f32 %v5978_v61, 0.0  ;;  %v5979_v39 = vadd.f32 %v5947_v59, %v10223_v33  ;;  %v10238_v61 = vld [vmem:[#allocation38_spill] sm:$0xff] }
 0x626   : > { %v6650_v31 = vpack.c.bf16 %v6012_v62, %v6012_v62  ;;  %v6013_v1 = vmax.f32 %v5981_v29, 0.0 }
 0x627   : > { %v6648_v54 = vpack.c.bf16 %v6010_v37, %v6010_v37  ;;  %v6011_v19 = vmax.f32 %v5979_v39, 0.0 }
 0x628   : > { %6172 = vst.msk [vmem:[%s9832_s25 + $0x58] sm:$0xf] %vm10224_vm6, %v6650_v31  ;;  %v6651_v60 = vpack.c.bf16 %v6013_v1, %v6013_v1 }
 0x629   : > { %6170 = vst.msk [vmem:[%s9832_s25 + $0x50] sm:$0xf] %vm10225_vm10, %v6648_v54  ;;  %v6649_v23 = vpack.c.bf16 %v6011_v19, %v6011_v19 }
 0x62a   : > { %6173 = vst.msk [vmem:[%s9832_s25 + $0x5c] sm:$0xf] %vm10194_vm0, %v6651_v60 }
 0x62b   : > { %6171 = vst.msk [vmem:[%s9832_s25 + $0x54] sm:$0xf] %vm10226_vm3, %v6649_v23 }
 0x639   : > { %v6870_v16 = vpop.f32.mrb[40].mxu0 }
 0x63a   : > { %v5915_v27 = vmul.f32 %v6870_v16, %v9807_v7  ;;  %v5853_v44 = vpop.f32.mrb[41].mxu0 }
 0x63b   : > { %v5913_v21 = vmul.f32 %v9807_v7, %v5853_v44  ;;  %v6871_v22 = vpop.f32.mrb[42].mxu0 }
 0x63c   : > { %v5952_v0 = vadd.f32 %v9814_v30, %v5915_v27  ;;  %v5916_v20 = vmul.f32 %v6871_v22, %v9807_v7  ;;  %v5856_v56 = vpop.f32.mrb[43].mxu0 }
 0x63d   : > { %v5950_v43 = vadd.f32 %v9814_v30, %v5913_v21  ;;  %v5914_v41 = vmul.f32 %v9807_v7, %v5856_v56 }
 0x63e   : > { %v5984_v10 = vadd.f32 %v5952_v0, %v10227_v4  ;;  %v5953_v6 = vadd.f32 %v9814_v30, %v5916_v20 }
 0x63f   : > { %v5982_v25 = vadd.f32 %v5950_v43, %v10228_v58  ;;  %v5951_v11 = vadd.f32 %v9814_v30, %v5914_v41 }
 0x640   : > { %v6016_v9 = vmax.f32 %v5984_v10, 0.0  ;;  %v5985_v52 = vadd.f32 %v5953_v6, %v10229_v45 }
 0x641   : > { %v6014_v46 = vmax.f32 %v5982_v25, 0.0  ;;  %v5983_v34 = vadd.f32 %v5951_v11, %v10230_v8 }
 0x642   : > { %v6654_v38 = vpack.c.bf16 %v6016_v9, %v6016_v9  ;;  %v6017_v12 = vmax.f32 %v5985_v52, 0.0 }
 0x643   : > { %v6652_v3 = vpack.c.bf16 %v6014_v46, %v6014_v46  ;;  %v6015_v47 = vmax.f32 %v5983_v34, 0.0 }
 0x644   : > { %6176 = vst.msk [vmem:[%s9832_s25 + $0x68] sm:$0xf] %vm10231_vm8, %v6654_v38  ;;  %v6655_v36 = vpack.c.bf16 %v6017_v12, %v6017_v12  ;;  %v6874_v35 = vpop.f32.mrb[44].mxu0 }
 0x645   : > { %6174 = vst.msk [vmem:[%s9832_s25 + $0x60] sm:$0xf] %vm10232_vm4, %v6652_v3  ;;  %v6653_v13 = vpack.c.bf16 %v6015_v47, %v6015_v47  ;;  %v5919_v32 = vmul.f32 %v6874_v35, %v9807_v7  ;;  %v5869_v42 = vpop.f32.mrb[45].mxu0 }
 0x646   : > { %6177 = vst.msk [vmem:[%s9832_s25 + $0x6c] sm:$0xf] %vm10233_vm9, %v6655_v36  ;;  %v5917_v49 = vmul.f32 %v9807_v7, %v5869_v42  ;;  %v6875_v24 = vpop.f32.mrb[46].mxu0 }
 0x647   : > { %6175 = vst.msk [vmem:[%s9832_s25 + $0x64] sm:$0xf] %vm10234_vm1, %v6653_v13  ;;  %v5956_v57 = vadd.f32 %v9814_v30, %v5919_v32  ;;  %v5920_v15 = vmul.f32 %v6875_v24, %v9807_v7  ;;  %v5872_v63 = vpop.f32.mrb[47].mxu0 }
 0x648   : > { %v5954_v55 = vadd.f32 %v9814_v30, %v5917_v49  ;;  %v5918_v48 = vmul.f32 %v9807_v7, %v5872_v63 }
 0x649   : > { %v5988_v28 = vadd.f32 %v5956_v57, %v10235_v17  ;;  %v5957_v26 = vadd.f32 %v9814_v30, %v5920_v15 }
 0x64a   : > { %v5986_v18 = vadd.f32 %v5954_v55, %v10236_v53  ;;  %v5955_v14 = vadd.f32 %v9814_v30, %v5918_v48 }
 0x64b   : > { %v6020_v40 = vmax.f32 %v5988_v28, 0.0  ;;  %v5989_v5 = vadd.f32 %v5957_v26, %v10237_v2 }
 0x64c   : > { %v6018_v50 = vmax.f32 %v5986_v18, 0.0  ;;  %v5987_v59 = vadd.f32 %v5955_v14, %v10238_v61 }
 0x64d   : > { %v6658_v62 = vpack.c.bf16 %v6020_v40, %v6020_v40  ;;  %v6021_v51 = vmax.f32 %v5989_v5, 0.0 }
 0x64e   : > { %v6656_v29 = vpack.c.bf16 %v6018_v50, %v6018_v50  ;;  %v6019_v7 = vmax.f32 %v5987_v59, 0.0 }
 0x64f   : > { %6180 = vst.msk [vmem:[%s9832_s25 + $0x78] sm:$0xf] %vm10239_vm2, %v6658_v62  ;;  %v6659_v37 = vpack.c.bf16 %v6021_v51, %v6021_v51 }
 0x650   : > { %6178 = vst.msk [vmem:[%s9832_s25 + $0x70] sm:$0xf] %vm10240_vm12, %v6656_v29  ;;  %v6657_v33 = vpack.c.bf16 %v6019_v7, %v6019_v7 }
 0x651   : > { %6181 = vst.msk [vmem:[%s9832_s25 + $0x7c] sm:$0xf] %vm10241_vm14, %v6659_v37 }
 0x652   : > { %6179 = vst.msk [vmem:[%s9832_s25 + $0x74] sm:$0xf] %vm10242_vm11, %v6657_v33 }
 0x653 PF: > { %s13_s12 = sadd.s32 1, %s7079_s12  }
 0x654   : > { %p10_p4 = scmp.ge.s32.totalorder %s13_s12, 4  }
 0x656   :  { %12 = sbr.rel (!%p10_p4) target bundleno = 1 (0x1), region = 68 }

</bundles_post_ra>
